<compile_context>
chip_gen: v5e
topology: v5e:2x2
jax: 0.10.0
libtpu: 0.0.40
codegen_flags: <defaults>
</compile_context>

<pallas_src>
import functools

import jax
import jax.numpy as jnp
from jax import lax
from jax.experimental import pallas as pl
from jax.experimental.pallas import tpu as pltpu


def _se_bottleneck_kernel(x_ref, w1_ref, w2_ref, wfc1_ref, wfc2_ref, alpha_ref,
                          s1_ref, b1_ref, s2_ref, b2_ref, s3_ref, b3_ref,
                          *rest, H, W, Cin, Cout, stride, dim_match):
    if dim_match:
        out_ref, yp_ref, zp_ref = rest
    else:
        ws_ref, ss_ref, bs_ref, out_ref, yp_ref, zp_ref = rest

    f32 = jnp.float32
    bf16 = jnp.bfloat16
    Ho, Wo = H // stride, W // stride

    def conv3x3(src_ref, w_ref, ho, wo, st, cin):
        """3x3 pad-1 conv read from a zero-padded VMEM scratch ref, evaluated
        only at the `st`-strided output positions (bf16 MXU, f32 acc)."""
        acc = jnp.zeros((ho * wo, Cout), f32)
        for dy in range(3):
            for dx in range(3):
                if st == 1:
                    tap = src_ref[dy:dy + ho, dx:dx + wo, :]
                else:
                    tap = src_ref[pl.ds(dy, ho, stride=st),
                                  pl.ds(dx, wo, stride=st), :]
                acc = acc + jnp.dot(tap.reshape(ho * wo, cin).astype(bf16),
                                    w_ref[dy, dx],
                                    preferred_element_type=f32)
        return acc

    # ---------------- res branch ----------------
    x = x_ref[...]                                         # (H, W, Cin) f32
    # BatchNorm2d(in_channel) (folded inference affine)
    y = x * s1_ref[...] + b1_ref[...]
    yp_ref[...] = jnp.zeros(yp_ref.shape, yp_ref.dtype)
    yp_ref[1:H + 1, 1:W + 1, :] = y
    # Conv2d(in, out, 3, stride=1, pad=1, bias=False)
    z = conv3x3(yp_ref, w1_ref, H, W, 1, Cin)              # (H*W, Cout) f32
    # BatchNorm2d(out_channel) + PReLU(out_channel)
    z = z * s2_ref[...] + b2_ref[...]
    z = jnp.where(z > 0, z, alpha_ref[...] * z)
    zp_ref[...] = jnp.zeros(zp_ref.shape, zp_ref.dtype)
    zp_ref[1:H + 1, 1:W + 1, :] = z.reshape(H, W, Cout)
    # Conv2d(out, out, 3, stride=s, pad=1, bias=False) -- strided outputs only
    r = conv3x3(zp_ref, w2_ref, Ho, Wo, stride, Cout)      # (Ho*Wo, Cout) f32
    # BatchNorm2d(out_channel)
    r = r * s3_ref[...] + b3_ref[...]

    # SEModule(out_channel, 16)
    pooled = jnp.mean(r, axis=0, keepdims=True)                        # (1, Cout)
    h = jnp.maximum(jnp.dot(pooled, wfc1_ref[...],
                            preferred_element_type=f32), 0.0)          # (1, Cmid)
    g = jnp.dot(h, wfc2_ref[...], preferred_element_type=f32)          # (1, Cout)
    gate = 1.0 / (1.0 + jnp.exp(-g))
    r = r * gate

    # ---------------- shortcut branch ----------------
    if dim_match:
        sc = x.reshape(Ho * Wo, Cout)        # identity (dim_match => stride 1)
    else:
        if stride == 1:
            xs = x
        else:
            xs = x_ref[pl.ds(0, Ho, stride=stride),
                       pl.ds(0, Wo, stride=stride), :]
        # Conv2d(in, out, 1, stride=s, bias=False) + BatchNorm2d(out)
        sc = jnp.dot(xs.reshape(Ho * Wo, Cin).astype(bf16), ws_ref[...],
                     preferred_element_type=f32)
        sc = sc * ss_ref[...] + bs_ref[...]

    out_ref[...] = (sc + r).reshape(Ho, Wo, Cout).astype(out_ref.dtype)


def se_bottleneck_ir(x_nchw, params, *, stride, dim_match):
    """Forward of SE_BottleNeck_IR. x_nchw: (N, Cin, H, W) -> (N, Cout, H/s, W/s)."""
    N, Cin, H, W = x_nchw.shape
    Cout = params["w1"].shape[-1]
    Cmid = params["wfc1"].shape[-1]
    assert H % stride == 0 and W % stride == 0
    # keep in-kernel (h, w, c) <-> (h*w, c) reshapes sublane-aligned
    assert W % 8 == 0 and (W // stride) % 8 == 0
    if dim_match:
        assert Cin == Cout and stride == 1
    Ho, Wo = H // stride, W // stride
    bf16 = jnp.bfloat16

    x = jnp.transpose(x_nchw, (0, 2, 3, 1)).astype(jnp.float32)   # NHWC

    kernel = functools.partial(_se_bottleneck_kernel, H=H, W=W, Cin=Cin,
                               Cout=Cout, stride=stride, dim_match=dim_match)

    def cspec(C):
        return pl.BlockSpec((1, C), lambda n: (0, 0))

    in_specs = [
        pl.BlockSpec((None, H, W, Cin), lambda n: (n, 0, 0, 0)),      # x
        pl.BlockSpec((3, 3, Cin, Cout), lambda n: (0, 0, 0, 0)),      # w1
        pl.BlockSpec((3, 3, Cout, Cout), lambda n: (0, 0, 0, 0)),     # w2
        pl.BlockSpec((Cout, Cmid), lambda n: (0, 0)),                 # wfc1
        pl.BlockSpec((Cmid, Cout), lambda n: (0, 0)),                 # wfc2
        cspec(Cout),                                                  # alpha
        cspec(Cin), cspec(Cin),                                       # s1, b1
        cspec(Cout), cspec(Cout),                                     # s2, b2
        cspec(Cout), cspec(Cout),                                     # s3, b3
    ]
    args = [x,
            params["w1"].astype(bf16), params["w2"].astype(bf16),
            params["wfc1"], params["wfc2"], params["alpha"],
            params["s1"], params["b1"], params["s2"], params["b2"],
            params["s3"], params["b3"]]
    if not dim_match:
        in_specs += [pl.BlockSpec((Cin, Cout), lambda n: (0, 0)),     # ws
                     cspec(Cout), cspec(Cout)]                        # ss, bs
        args += [params["ws"].astype(bf16), params["ss"], params["bs"]]

    out = pl.pallas_call(
        kernel,
        out_shape=jax.ShapeDtypeStruct((N, Ho, Wo, Cout), jnp.float32),
        grid_spec=pltpu.PrefetchScalarGridSpec(
            num_scalar_prefetch=0,
            grid=(N,),
            in_specs=in_specs,
            out_specs=pl.BlockSpec((None, Ho, Wo, Cout),
                                   lambda n: (n, 0, 0, 0)),
            scratch_shapes=[
                pltpu.VMEM((H + 2, W + 2, Cin), jnp.float32),    # padded BN1(x)
                pltpu.VMEM((H + 2, W + 2, Cout), jnp.float32),   # padded PReLU
            ]),
        compiler_params=pltpu.CompilerParams(
            dimension_semantics=("parallel",)),
    )(*args)

    return jnp.transpose(out, (0, 3, 1, 2))


# ---------------- deterministic parameter init ----------------
def _fold_bn(key, C, eps=1e-5):
    kg, kb, km, kv = jax.random.split(key, 4)
    gamma = 1.0 + 0.1 * jax.random.normal(kg, (C,), jnp.float32)
    beta = 0.1 * jax.random.normal(kb, (C,), jnp.float32)
    mean = 0.1 * jax.random.normal(km, (C,), jnp.float32)
    var = 0.5 + jnp.abs(jax.random.normal(kv, (C,), jnp.float32))
    scale = gamma / jnp.sqrt(var + eps)
    bias = beta - mean * scale
    return scale.reshape(1, C), bias.reshape(1, C)


def init_params(key, Cin, Cout, reduction=16):
    Cmid = max(1, Cout // reduction)
    ks = jax.random.split(key, 10)
    s1, b1 = _fold_bn(ks[0], Cin)      # BN on the input
    s2, b2 = _fold_bn(ks[1], Cout)     # BN after conv1
    s3, b3 = _fold_bn(ks[2], Cout)     # BN after conv2
    ss, bs = _fold_bn(ks[3], Cout)     # BN in the shortcut
    w1 = 0.1 * jax.random.normal(ks[4], (3, 3, Cin, Cout), jnp.float32)
    w2 = 0.1 * jax.random.normal(ks[5], (3, 3, Cout, Cout), jnp.float32)
    ws = 0.1 * jax.random.normal(ks[6], (Cin, Cout), jnp.float32)
    wfc1 = 0.2 * jax.random.normal(ks[7], (Cout, Cmid), jnp.float32)
    wfc2 = 0.2 * jax.random.normal(ks[8], (Cmid, Cout), jnp.float32)
    alpha = (0.25 + 0.05 * jax.random.normal(ks[9], (Cout,), jnp.float32)
             ).reshape(1, Cout)
    return dict(w1=w1, w2=w2, ws=ws, wfc1=wfc1, wfc2=wfc2, alpha=alpha,
                s1=s1, b1=b1, s2=s2, b2=b2, s3=s3, b3=b3, ss=ss, bs=bs)


# ---------------- pure-JAX reference (for verification) ----------------
def ref_forward(x_nchw, p, *, stride, dim_match):
    x = jnp.transpose(x_nchw, (0, 2, 3, 1)).astype(jnp.float32)
    dn = ("NHWC", "HWIO", "NHWC")
    y = x * p["s1"] + p["b1"]
    z = lax.conv_general_dilated(y, p["w1"], (1, 1), ((1, 1), (1, 1)),
                                 dimension_numbers=dn)
    z = z * p["s2"] + p["b2"]
    z = jnp.where(z > 0, z, p["alpha"] * z)
    r = lax.conv_general_dilated(z, p["w2"], (stride, stride), ((1, 1), (1, 1)),
                                 dimension_numbers=dn)
    r = r * p["s3"] + p["b3"]
    g = jnp.mean(r, axis=(1, 2), keepdims=True)
    h = jnp.maximum(jnp.einsum("nijc,cm->nijm", g, p["wfc1"]), 0.0)
    gate = jax.nn.sigmoid(jnp.einsum("nijm,mc->nijc", h, p["wfc2"]))
    r = r * gate
    if dim_match:
        sc = x
    else:
        sc = lax.conv_general_dilated(x, p["ws"][None, None],
                                      (stride, stride), ((0, 0), (0, 0)),
                                      dimension_numbers=dn)
        sc = sc * p["ss"] + p["bs"]
    return jnp.transpose(sc + r, (0, 3, 1, 2))


if __name__ == "__main__":
    key = jax.random.PRNGKey(0)
    kx1, kx2, kp1, kp2 = jax.random.split(key, 4)

    ok = True

    # Case 1: channel expansion, stride 2 -> (1x1 conv + BN) shortcut.
    N, Cin, Cout, H, W, stride, dim_match = 2, 16, 32, 16, 16, 2, False
    x = jax.random.normal(kx1, (N, Cin, H, W), jnp.float32)
    p = init_params(kp1, Cin, Cout)
    out = jax.block_until_ready(se_bottleneck_ir(x, p, stride=stride,
                                                 dim_match=dim_match))
    ref = ref_forward(x, p, stride=stride, dim_match=dim_match)
    ok &= out.shape == (N, Cout, H // stride, W // stride)
    err = jnp.max(jnp.abs(out - ref)) / (jnp.max(jnp.abs(ref)) + 1e-6)
    ok &= bool(err < 3e-2)

    # Case 2: dim_match -> identity shortcut (stride 1).
    N2, C2 = 2, 32
    x2 = jax.random.normal(kx2, (N2, C2, H, W), jnp.float32)
    p2 = init_params(kp2, C2, C2)
    out2 = jax.block_until_ready(se_bottleneck_ir(x2, p2, stride=1,
                                                  dim_match=True))
    ref2 = ref_forward(x2, p2, stride=1, dim_match=True)
    ok &= out2.shape == (N2, C2, H, W)
    err2 = jnp.max(jnp.abs(out2 - ref2)) / (jnp.max(jnp.abs(ref2)) + 1e-6)
    ok &= bool(err2 < 3e-2)

    if not ok:
        raise SystemExit("mismatch vs JAX reference")
    print("KERNEL_OK")
</pallas_src>

<mosaic_0001>
module attributes {stable_mosaic.version = 11 : i64} {
  func.func @_se_bottleneck_kernel(%arg0: i32, %arg1: memref<1x16x16x16xf32, #tpu.memory_space<vmem>>, %arg2: memref<3x3x16x32xbf16, #tpu.memory_space<vmem>>, %arg3: memref<3x3x32x32xbf16, #tpu.memory_space<vmem>>, %arg4: memref<32x2xf32, #tpu.memory_space<vmem>>, %arg5: memref<2x32xf32, #tpu.memory_space<vmem>>, %arg6: memref<1x32xf32, #tpu.memory_space<vmem>>, %arg7: memref<1x16xf32, #tpu.memory_space<vmem>>, %arg8: memref<1x16xf32, #tpu.memory_space<vmem>>, %arg9: memref<1x32xf32, #tpu.memory_space<vmem>>, %arg10: memref<1x32xf32, #tpu.memory_space<vmem>>, %arg11: memref<1x32xf32, #tpu.memory_space<vmem>>, %arg12: memref<1x32xf32, #tpu.memory_space<vmem>>, %arg13: memref<16x32xbf16, #tpu.memory_space<vmem>>, %arg14: memref<1x32xf32, #tpu.memory_space<vmem>>, %arg15: memref<1x32xf32, #tpu.memory_space<vmem>>, %arg16: memref<1x8x8x32xf32, #tpu.memory_space<vmem>>, %arg17: memref<18x18x16xf32, #tpu.memory_space<vmem>>, %arg18: memref<18x18x32xf32, #tpu.memory_space<vmem>>) attributes {dimension_semantics = [#tpu.dimension_semantics<parallel>], iteration_bounds = array<i64: 2>, scalar_prefetch = 0 : i64, scratch_operands = 2 : i64, tpu.core_type = #tpu.core_type<tc>, window_params = [{transform_indices = @transform_0, window_bounds = array<i64: 1, 16, 16, 16>}, {pipeline_mode = #tpu.pipeline_mode<synchronous>, transform_indices = @transform_1, window_bounds = array<i64: 3, 3, 16, 32>}, {pipeline_mode = #tpu.pipeline_mode<synchronous>, transform_indices = @transform_2, window_bounds = array<i64: 3, 3, 32, 32>}, {pipeline_mode = #tpu.pipeline_mode<synchronous>, transform_indices = @transform_3, window_bounds = array<i64: 32, 2>}, {pipeline_mode = #tpu.pipeline_mode<synchronous>, transform_indices = @transform_4, window_bounds = array<i64: 2, 32>}, {pipeline_mode = #tpu.pipeline_mode<synchronous>, transform_indices = @transform_5, window_bounds = array<i64: 1, 32>}, {pipeline_mode = #tpu.pipeline_mode<synchronous>, transform_indices = @transform_6, window_bounds = array<i64: 1, 16>}, {pipeline_mode = #tpu.pipeline_mode<synchronous>, transform_indices = @transform_7, window_bounds = array<i64: 1, 16>}, {pipeline_mode = #tpu.pipeline_mode<synchronous>, transform_indices = @transform_8, window_bounds = array<i64: 1, 32>}, {pipeline_mode = #tpu.pipeline_mode<synchronous>, transform_indices = @transform_9, window_bounds = array<i64: 1, 32>}, {pipeline_mode = #tpu.pipeline_mode<synchronous>, transform_indices = @transform_10, window_bounds = array<i64: 1, 32>}, {pipeline_mode = #tpu.pipeline_mode<synchronous>, transform_indices = @transform_11, window_bounds = array<i64: 1, 32>}, {pipeline_mode = #tpu.pipeline_mode<synchronous>, transform_indices = @transform_12, window_bounds = array<i64: 16, 32>}, {pipeline_mode = #tpu.pipeline_mode<synchronous>, transform_indices = @transform_13, window_bounds = array<i64: 1, 32>}, {pipeline_mode = #tpu.pipeline_mode<synchronous>, transform_indices = @transform_14, window_bounds = array<i64: 1, 32>}, {transform_indices = @transform_15, window_bounds = array<i64: 1, 8, 8, 32>}]} {
    %c0 = arith.constant 0 : index
    %c0_0 = arith.constant 0 : index
    %c0_1 = arith.constant 0 : index
    %c0_2 = arith.constant 0 : index
    %0 = vector.load %arg1[%c0, %c0_0, %c0_1, %c0_2] : memref<1x16x16x16xf32, #tpu.memory_space<vmem>>, vector<1x16x16x16xf32>
    %1 = vector.shape_cast %0 : vector<1x16x16x16xf32> to vector<16x16x16xf32>
    %c0_3 = arith.constant 0 : index
    %c0_4 = arith.constant 0 : index
    %2 = vector.load %arg7[%c0_3, %c0_4] : memref<1x16xf32, #tpu.memory_space<vmem>>, vector<1x16xf32>
    %3 = vector.shape_cast %2 : vector<1x16xf32> to vector<1x1x16xf32>
    %4 = vector.broadcast %3 : vector<1x1x16xf32> to vector<16x16x16xf32>
    %5 = arith.mulf %1, %4 : vector<16x16x16xf32>
    %c0_5 = arith.constant 0 : index
    %c0_6 = arith.constant 0 : index
    %6 = vector.load %arg8[%c0_5, %c0_6] : memref<1x16xf32, #tpu.memory_space<vmem>>, vector<1x16xf32>
    %7 = vector.shape_cast %6 : vector<1x16xf32> to vector<1x1x16xf32>
    %8 = vector.broadcast %7 : vector<1x1x16xf32> to vector<16x16x16xf32>
    %9 = arith.addf %5, %8 : vector<16x16x16xf32>
    %cst = arith.constant 0.000000e+00 : f32
    %10 = vector.broadcast %cst : f32 to vector<18x18x16xf32>
    %c0_7 = arith.constant 0 : index
    %c0_8 = arith.constant 0 : index
    %c0_9 = arith.constant 0 : index
    %11 = vector.load %arg17[%c0_7, %c0_8, %c0_9] : memref<18x18x16xf32, #tpu.memory_space<vmem>>, vector<18x18x16xf32>
    tpu.vector_store %arg17[%c0_7, %c0_8, %c0_9], %10 {strides = array<i32>} : memref<18x18x16xf32, #tpu.memory_space<vmem>>, vector<18x18x16xf32>,
    %c1 = arith.constant 1 : index
    %c1_10 = arith.constant 1 : index
    %c0_11 = arith.constant 0 : index
    %12 = vector.load %arg17[%c1, %c1_10, %c0_11] : memref<18x18x16xf32, #tpu.memory_space<vmem>>, vector<16x16x16xf32>
    tpu.vector_store %arg17[%c1, %c1_10, %c0_11], %9 {strides = array<i32>} : memref<18x18x16xf32, #tpu.memory_space<vmem>>, vector<16x16x16xf32>,
    %cst_12 = arith.constant 0.000000e+00 : f32
    %13 = vector.broadcast %cst_12 : f32 to vector<256x32xf32>
    %c0_13 = arith.constant 0 : index
    %c0_14 = arith.constant 0 : index
    %c0_15 = arith.constant 0 : index
    %14 = vector.load %arg17[%c0_13, %c0_14, %c0_15] : memref<18x18x16xf32, #tpu.memory_space<vmem>>, vector<16x16x16xf32>
    %15 = vector.shape_cast %14 : vector<16x16x16xf32> to vector<256x16xf32>
    %16 = arith.truncf %15 : vector<256x16xf32> to vector<256x16xbf16>
    %c0_16 = arith.constant 0 : index
    %c0_17 = arith.constant 0 : index
    %c0_18 = arith.constant 0 : index
    %c0_19 = arith.constant 0 : index
    %17 = vector.load %arg2[%c0_16, %c0_17, %c0_18, %c0_19] : memref<3x3x16x32xbf16, #tpu.memory_space<vmem>>, vector<1x1x16x32xbf16>
    %18 = vector.shape_cast %17 : vector<1x1x16x32xbf16> to vector<16x32xbf16>
    %cst_20 = arith.constant dense<0.000000e+00> : vector<256x32xf32>
    %19 = tpu.matmul %16, %18, %cst_20 {dimension_numbers = #tpu.dot_dimension_numbers<[1], [0], [0], [1], [0, 0, 1, 1], [], []>} : vector<256x16xbf16>, vector<16x32xbf16>, vector<256x32xf32> -> vector<256x32xf32>
    %20 = arith.addf %13, %19 : vector<256x32xf32>
    %c0_21 = arith.constant 0 : index
    %c1_22 = arith.constant 1 : index
    %c0_23 = arith.constant 0 : index
    %21 = vector.load %arg17[%c0_21, %c1_22, %c0_23] : memref<18x18x16xf32, #tpu.memory_space<vmem>>, vector<16x16x16xf32>
    %22 = vector.shape_cast %21 : vector<16x16x16xf32> to vector<256x16xf32>
    %23 = arith.truncf %22 : vector<256x16xf32> to vector<256x16xbf16>
    %c0_24 = arith.constant 0 : index
    %c1_25 = arith.constant 1 : index
    %c0_26 = arith.constant 0 : index
    %c0_27 = arith.constant 0 : index
    %24 = vector.load %arg2[%c0_24, %c1_25, %c0_26, %c0_27] : memref<3x3x16x32xbf16, #tpu.memory_space<vmem>>, vector<1x1x16x32xbf16>
    %25 = vector.shape_cast %24 : vector<1x1x16x32xbf16> to vector<16x32xbf16>
    %cst_28 = arith.constant dense<0.000000e+00> : vector<256x32xf32>
    %26 = tpu.matmul %23, %25, %cst_28 {dimension_numbers = #tpu.dot_dimension_numbers<[1], [0], [0], [1], [0, 0, 1, 1], [], []>} : vector<256x16xbf16>, vector<16x32xbf16>, vector<256x32xf32> -> vector<256x32xf32>
    %27 = arith.addf %20, %26 : vector<256x32xf32>
    %c0_29 = arith.constant 0 : index
    %c2 = arith.constant 2 : index
    %c0_30 = arith.constant 0 : index
    %28 = vector.load %arg17[%c0_29, %c2, %c0_30] : memref<18x18x16xf32, #tpu.memory_space<vmem>>, vector<16x16x16xf32>
    %29 = vector.shape_cast %28 : vector<16x16x16xf32> to vector<256x16xf32>
    %30 = arith.truncf %29 : vector<256x16xf32> to vector<256x16xbf16>
    %c0_31 = arith.constant 0 : index
    %c2_32 = arith.constant 2 : index
    %c0_33 = arith.constant 0 : index
    %c0_34 = arith.constant 0 : index
    %31 = vector.load %arg2[%c0_31, %c2_32, %c0_33, %c0_34] : memref<3x3x16x32xbf16, #tpu.memory_space<vmem>>, vector<1x1x16x32xbf16>
    %32 = vector.shape_cast %31 : vector<1x1x16x32xbf16> to vector<16x32xbf16>
    %cst_35 = arith.constant dense<0.000000e+00> : vector<256x32xf32>
    %33 = tpu.matmul %30, %32, %cst_35 {dimension_numbers = #tpu.dot_dimension_numbers<[1], [0], [0], [1], [0, 0, 1, 1], [], []>} : vector<256x16xbf16>, vector<16x32xbf16>, vector<256x32xf32> -> vector<256x32xf32>
    %34 = arith.addf %27, %33 : vector<256x32xf32>
    %c1_36 = arith.constant 1 : index
    %c0_37 = arith.constant 0 : index
    %c0_38 = arith.constant 0 : index
    %35 = vector.load %arg17[%c1_36, %c0_37, %c0_38] : memref<18x18x16xf32, #tpu.memory_space<vmem>>, vector<16x16x16xf32>
    %36 = vector.shape_cast %35 : vector<16x16x16xf32> to vector<256x16xf32>
    %37 = arith.truncf %36 : vector<256x16xf32> to vector<256x16xbf16>
    %c1_39 = arith.constant 1 : index
    %c0_40 = arith.constant 0 : index
    %c0_41 = arith.constant 0 : index
    %c0_42 = arith.constant 0 : index
    %38 = vector.load %arg2[%c1_39, %c0_40, %c0_41, %c0_42] : memref<3x3x16x32xbf16, #tpu.memory_space<vmem>>, vector<1x1x16x32xbf16>
    %39 = vector.shape_cast %38 : vector<1x1x16x32xbf16> to vector<16x32xbf16>
    %cst_43 = arith.constant dense<0.000000e+00> : vector<256x32xf32>
    %40 = tpu.matmul %37, %39, %cst_43 {dimension_numbers = #tpu.dot_dimension_numbers<[1], [0], [0], [1], [0, 0, 1, 1], [], []>} : vector<256x16xbf16>, vector<16x32xbf16>, vector<256x32xf32> -> vector<256x32xf32>
    %41 = arith.addf %34, %40 : vector<256x32xf32>
    %c1_44 = arith.constant 1 : index
    %c1_45 = arith.constant 1 : index
    %c0_46 = arith.constant 0 : index
    %42 = vector.load %arg17[%c1_44, %c1_45, %c0_46] : memref<18x18x16xf32, #tpu.memory_space<vmem>>, vector<16x16x16xf32>
    %43 = vector.shape_cast %42 : vector<16x16x16xf32> to vector<256x16xf32>
    %44 = arith.truncf %43 : vector<256x16xf32> to vector<256x16xbf16>
    %c1_47 = arith.constant 1 : index
    %c1_48 = arith.constant 1 : index
    %c0_49 = arith.constant 0 : index
    %c0_50 = arith.constant 0 : index
    %45 = vector.load %arg2[%c1_47, %c1_48, %c0_49, %c0_50] : memref<3x3x16x32xbf16, #tpu.memory_space<vmem>>, vector<1x1x16x32xbf16>
    %46 = vector.shape_cast %45 : vector<1x1x16x32xbf16> to vector<16x32xbf16>
    %cst_51 = arith.constant dense<0.000000e+00> : vector<256x32xf32>
    %47 = tpu.matmul %44, %46, %cst_51 {dimension_numbers = #tpu.dot_dimension_numbers<[1], [0], [0], [1], [0, 0, 1, 1], [], []>} : vector<256x16xbf16>, vector<16x32xbf16>, vector<256x32xf32> -> vector<256x32xf32>
    %48 = arith.addf %41, %47 : vector<256x32xf32>
    %c1_52 = arith.constant 1 : index
    %c2_53 = arith.constant 2 : index
    %c0_54 = arith.constant 0 : index
    %49 = vector.load %arg17[%c1_52, %c2_53, %c0_54] : memref<18x18x16xf32, #tpu.memory_space<vmem>>, vector<16x16x16xf32>
    %50 = vector.shape_cast %49 : vector<16x16x16xf32> to vector<256x16xf32>
    %51 = arith.truncf %50 : vector<256x16xf32> to vector<256x16xbf16>
    %c1_55 = arith.constant 1 : index
    %c2_56 = arith.constant 2 : index
    %c0_57 = arith.constant 0 : index
    %c0_58 = arith.constant 0 : index
    %52 = vector.load %arg2[%c1_55, %c2_56, %c0_57, %c0_58] : memref<3x3x16x32xbf16, #tpu.memory_space<vmem>>, vector<1x1x16x32xbf16>
    %53 = vector.shape_cast %52 : vector<1x1x16x32xbf16> to vector<16x32xbf16>
    %cst_59 = arith.constant dense<0.000000e+00> : vector<256x32xf32>
    %54 = tpu.matmul %51, %53, %cst_59 {dimension_numbers = #tpu.dot_dimension_numbers<[1], [0], [0], [1], [0, 0, 1, 1], [], []>} : vector<256x16xbf16>, vector<16x32xbf16>, vector<256x32xf32> -> vector<256x32xf32>
    %55 = arith.addf %48, %54 : vector<256x32xf32>
    %c2_60 = arith.constant 2 : index
    %c0_61 = arith.constant 0 : index
    %c0_62 = arith.constant 0 : index
    %56 = vector.load %arg17[%c2_60, %c0_61, %c0_62] : memref<18x18x16xf32, #tpu.memory_space<vmem>>, vector<16x16x16xf32>
    %57 = vector.shape_cast %56 : vector<16x16x16xf32> to vector<256x16xf32>
    %58 = arith.truncf %57 : vector<256x16xf32> to vector<256x16xbf16>
    %c2_63 = arith.constant 2 : index
    %c0_64 = arith.constant 0 : index
    %c0_65 = arith.constant 0 : index
    %c0_66 = arith.constant 0 : index
    %59 = vector.load %arg2[%c2_63, %c0_64, %c0_65, %c0_66] : memref<3x3x16x32xbf16, #tpu.memory_space<vmem>>, vector<1x1x16x32xbf16>
    %60 = vector.shape_cast %59 : vector<1x1x16x32xbf16> to vector<16x32xbf16>
    %cst_67 = arith.constant dense<0.000000e+00> : vector<256x32xf32>
    %61 = tpu.matmul %58, %60, %cst_67 {dimension_numbers = #tpu.dot_dimension_numbers<[1], [0], [0], [1], [0, 0, 1, 1], [], []>} : vector<256x16xbf16>, vector<16x32xbf16>, vector<256x32xf32> -> vector<256x32xf32>
    %62 = arith.addf %55, %61 : vector<256x32xf32>
    %c2_68 = arith.constant 2 : index
    %c1_69 = arith.constant 1 : index
    %c0_70 = arith.constant 0 : index
    %63 = vector.load %arg17[%c2_68, %c1_69, %c0_70] : memref<18x18x16xf32, #tpu.memory_space<vmem>>, vector<16x16x16xf32>
    %64 = vector.shape_cast %63 : vector<16x16x16xf32> to vector<256x16xf32>
    %65 = arith.truncf %64 : vector<256x16xf32> to vector<256x16xbf16>
    %c2_71 = arith.constant 2 : index
    %c1_72 = arith.constant 1 : index
    %c0_73 = arith.constant 0 : index
    %c0_74 = arith.constant 0 : index
    %66 = vector.load %arg2[%c2_71, %c1_72, %c0_73, %c0_74] : memref<3x3x16x32xbf16, #tpu.memory_space<vmem>>, vector<1x1x16x32xbf16>
    %67 = vector.shape_cast %66 : vector<1x1x16x32xbf16> to vector<16x32xbf16>
    %cst_75 = arith.constant dense<0.000000e+00> : vector<256x32xf32>
    %68 = tpu.matmul %65, %67, %cst_75 {dimension_numbers = #tpu.dot_dimension_numbers<[1], [0], [0], [1], [0, 0, 1, 1], [], []>} : vector<256x16xbf16>, vector<16x32xbf16>, vector<256x32xf32> -> vector<256x32xf32>
    %69 = arith.addf %62, %68 : vector<256x32xf32>
    %c2_76 = arith.constant 2 : index
    %c2_77 = arith.constant 2 : index
    %c0_78 = arith.constant 0 : index
    %70 = vector.load %arg17[%c2_76, %c2_77, %c0_78] : memref<18x18x16xf32, #tpu.memory_space<vmem>>, vector<16x16x16xf32>
    %71 = vector.shape_cast %70 : vector<16x16x16xf32> to vector<256x16xf32>
    %72 = arith.truncf %71 : vector<256x16xf32> to vector<256x16xbf16>
    %c2_79 = arith.constant 2 : index
    %c2_80 = arith.constant 2 : index
    %c0_81 = arith.constant 0 : index
    %c0_82 = arith.constant 0 : index
    %73 = vector.load %arg2[%c2_79, %c2_80, %c0_81, %c0_82] : memref<3x3x16x32xbf16, #tpu.memory_space<vmem>>, vector<1x1x16x32xbf16>
    %74 = vector.shape_cast %73 : vector<1x1x16x32xbf16> to vector<16x32xbf16>
    %cst_83 = arith.constant dense<0.000000e+00> : vector<256x32xf32>
    %75 = tpu.matmul %72, %74, %cst_83 {dimension_numbers = #tpu.dot_dimension_numbers<[1], [0], [0], [1], [0, 0, 1, 1], [], []>} : vector<256x16xbf16>, vector<16x32xbf16>, vector<256x32xf32> -> vector<256x32xf32>
    %76 = arith.addf %69, %75 : vector<256x32xf32>
    %c0_84 = arith.constant 0 : index
    %c0_85 = arith.constant 0 : index
    %77 = vector.load %arg9[%c0_84, %c0_85] : memref<1x32xf32, #tpu.memory_space<vmem>>, vector<1x32xf32>
    %78 = vector.broadcast %77 : vector<1x32xf32> to vector<256x32xf32>
    %79 = arith.mulf %76, %78 : vector<256x32xf32>
    %c0_86 = arith.constant 0 : index
    %c0_87 = arith.constant 0 : index
    %80 = vector.load %arg10[%c0_86, %c0_87] : memref<1x32xf32, #tpu.memory_space<vmem>>, vector<1x32xf32>
    %81 = vector.broadcast %80 : vector<1x32xf32> to vector<256x32xf32>
    %82 = arith.addf %79, %81 : vector<256x32xf32>
    %cst_88 = arith.constant 0.000000e+00 : f32
    %83 = vector.broadcast %cst_88 : f32 to vector<256x32xf32>
    %84 = arith.cmpf ogt, %82, %83 : vector<256x32xf32>
    %c0_89 = arith.constant 0 : index
    %c0_90 = arith.constant 0 : index
    %85 = vector.load %arg6[%c0_89, %c0_90] : memref<1x32xf32, #tpu.memory_space<vmem>>, vector<1x32xf32>
    %86 = vector.broadcast %85 : vector<1x32xf32> to vector<256x32xf32>
    %87 = arith.mulf %86, %82 : vector<256x32xf32>
    %88 = arith.select %84, %82, %87 : vector<256x32xi1>, vector<256x32xf32>
    %cst_91 = arith.constant 0.000000e+00 : f32
    %89 = vector.broadcast %cst_91 : f32 to vector<18x18x32xf32>
    %c0_92 = arith.constant 0 : index
    %c0_93 = arith.constant 0 : index
    %c0_94 = arith.constant 0 : index
    %90 = vector.load %arg18[%c0_92, %c0_93, %c0_94] : memref<18x18x32xf32, #tpu.memory_space<vmem>>, vector<18x18x32xf32>
    tpu.vector_store %arg18[%c0_92, %c0_93, %c0_94], %89 {strides = array<i32>} : memref<18x18x32xf32, #tpu.memory_space<vmem>>, vector<18x18x32xf32>,
    %91 = vector.shape_cast %88 : vector<256x32xf32> to vector<16x16x32xf32>
    %c1_95 = arith.constant 1 : index
    %c1_96 = arith.constant 1 : index
    %c0_97 = arith.constant 0 : index
    %92 = vector.load %arg18[%c1_95, %c1_96, %c0_97] : memref<18x18x32xf32, #tpu.memory_space<vmem>>, vector<16x16x32xf32>
    tpu.vector_store %arg18[%c1_95, %c1_96, %c0_97], %91 {strides = array<i32>} : memref<18x18x32xf32, #tpu.memory_space<vmem>>, vector<16x16x32xf32>,
    %cst_98 = arith.constant 0.000000e+00 : f32
    %93 = vector.broadcast %cst_98 : f32 to vector<64x32xf32>
    %c0_99 = arith.constant 0 : index
    %c0_100 = arith.constant 0 : index
    %c0_101 = arith.constant 0 : index
    %94 = tpu.strided_load %arg18[%c0_99, %c0_100, %c0_101] {strides = array<i32: 2, 2, 1>} : memref<18x18x32xf32, #tpu.memory_space<vmem>>, vector<8x8x32xf32>
    %95 = vector.shape_cast %94 : vector<8x8x32xf32> to vector<64x32xf32>
    %96 = arith.truncf %95 : vector<64x32xf32> to vector<64x32xbf16>
    %c0_102 = arith.constant 0 : index
    %c0_103 = arith.constant 0 : index
    %c0_104 = arith.constant 0 : index
    %c0_105 = arith.constant 0 : index
    %97 = vector.load %arg3[%c0_102, %c0_103, %c0_104, %c0_105] : memref<3x3x32x32xbf16, #tpu.memory_space<vmem>>, vector<1x1x32x32xbf16>
    %98 = vector.shape_cast %97 : vector<1x1x32x32xbf16> to vector<32x32xbf16>
    %cst_106 = arith.constant dense<0.000000e+00> : vector<64x32xf32>
    %99 = tpu.matmul %96, %98, %cst_106 {dimension_numbers = #tpu.dot_dimension_numbers<[1], [0], [0], [1], [0, 0, 1, 1], [], []>} : vector<64x32xbf16>, vector<32x32xbf16>, vector<64x32xf32> -> vector<64x32xf32>
    %100 = arith.addf %93, %99 : vector<64x32xf32>
    %c0_107 = arith.constant 0 : index
    %c1_108 = arith.constant 1 : index
    %c0_109 = arith.constant 0 : index
    %101 = tpu.strided_load %arg18[%c0_107, %c1_108, %c0_109] {strides = array<i32: 2, 2, 1>} : memref<18x18x32xf32, #tpu.memory_space<vmem>>, vector<8x8x32xf32>
    %102 = vector.shape_cast %101 : vector<8x8x32xf32> to vector<64x32xf32>
    %103 = arith.truncf %102 : vector<64x32xf32> to vector<64x32xbf16>
    %c0_110 = arith.constant 0 : index
    %c1_111 = arith.constant 1 : index
    %c0_112 = arith.constant 0 : index
    %c0_113 = arith.constant 0 : index
    %104 = vector.load %arg3[%c0_110, %c1_111, %c0_112, %c0_113] : memref<3x3x32x32xbf16, #tpu.memory_space<vmem>>, vector<1x1x32x32xbf16>
    %105 = vector.shape_cast %104 : vector<1x1x32x32xbf16> to vector<32x32xbf16>
    %cst_114 = arith.constant dense<0.000000e+00> : vector<64x32xf32>
    %106 = tpu.matmul %103, %105, %cst_114 {dimension_numbers = #tpu.dot_dimension_numbers<[1], [0], [0], [1], [0, 0, 1, 1], [], []>} : vector<64x32xbf16>, vector<32x32xbf16>, vector<64x32xf32> -> vector<64x32xf32>
    %107 = arith.addf %100, %106 : vector<64x32xf32>
    %c0_115 = arith.constant 0 : index
    %c2_116 = arith.constant 2 : index
    %c0_117 = arith.constant 0 : index
    %108 = tpu.strided_load %arg18[%c0_115, %c2_116, %c0_117] {strides = array<i32: 2, 2, 1>} : memref<18x18x32xf32, #tpu.memory_space<vmem>>, vector<8x8x32xf32>
    %109 = vector.shape_cast %108 : vector<8x8x32xf32> to vector<64x32xf32>
    %110 = arith.truncf %109 : vector<64x32xf32> to vector<64x32xbf16>
    %c0_118 = arith.constant 0 : index
    %c2_119 = arith.constant 2 : index
    %c0_120 = arith.constant 0 : index
    %c0_121 = arith.constant 0 : index
    %111 = vector.load %arg3[%c0_118, %c2_119, %c0_120, %c0_121] : memref<3x3x32x32xbf16, #tpu.memory_space<vmem>>, vector<1x1x32x32xbf16>
    %112 = vector.shape_cast %111 : vector<1x1x32x32xbf16> to vector<32x32xbf16>
    %cst_122 = arith.constant dense<0.000000e+00> : vector<64x32xf32>
    %113 = tpu.matmul %110, %112, %cst_122 {dimension_numbers = #tpu.dot_dimension_numbers<[1], [0], [0], [1], [0, 0, 1, 1], [], []>} : vector<64x32xbf16>, vector<32x32xbf16>, vector<64x32xf32> -> vector<64x32xf32>
    %114 = arith.addf %107, %113 : vector<64x32xf32>
    %c1_123 = arith.constant 1 : index
    %c0_124 = arith.constant 0 : index
    %c0_125 = arith.constant 0 : index
    %115 = tpu.strided_load %arg18[%c1_123, %c0_124, %c0_125] {strides = array<i32: 2, 2, 1>} : memref<18x18x32xf32, #tpu.memory_space<vmem>>, vector<8x8x32xf32>
    %116 = vector.shape_cast %115 : vector<8x8x32xf32> to vector<64x32xf32>
    %117 = arith.truncf %116 : vector<64x32xf32> to vector<64x32xbf16>
    %c1_126 = arith.constant 1 : index
    %c0_127 = arith.constant 0 : index
    %c0_128 = arith.constant 0 : index
    %c0_129 = arith.constant 0 : index
    %118 = vector.load %arg3[%c1_126, %c0_127, %c0_128, %c0_129] : memref<3x3x32x32xbf16, #tpu.memory_space<vmem>>, vector<1x1x32x32xbf16>
    %119 = vector.shape_cast %118 : vector<1x1x32x32xbf16> to vector<32x32xbf16>
    %cst_130 = arith.constant dense<0.000000e+00> : vector<64x32xf32>
    %120 = tpu.matmul %117, %119, %cst_130 {dimension_numbers = #tpu.dot_dimension_numbers<[1], [0], [0], [1], [0, 0, 1, 1], [], []>} : vector<64x32xbf16>, vector<32x32xbf16>, vector<64x32xf32> -> vector<64x32xf32>
    %121 = arith.addf %114, %120 : vector<64x32xf32>
    %c1_131 = arith.constant 1 : index
    %c1_132 = arith.constant 1 : index
    %c0_133 = arith.constant 0 : index
    %122 = tpu.strided_load %arg18[%c1_131, %c1_132, %c0_133] {strides = array<i32: 2, 2, 1>} : memref<18x18x32xf32, #tpu.memory_space<vmem>>, vector<8x8x32xf32>
    %123 = vector.shape_cast %122 : vector<8x8x32xf32> to vector<64x32xf32>
    %124 = arith.truncf %123 : vector<64x32xf32> to vector<64x32xbf16>
    %c1_134 = arith.constant 1 : index
    %c1_135 = arith.constant 1 : index
    %c0_136 = arith.constant 0 : index
    %c0_137 = arith.constant 0 : index
    %125 = vector.load %arg3[%c1_134, %c1_135, %c0_136, %c0_137] : memref<3x3x32x32xbf16, #tpu.memory_space<vmem>>, vector<1x1x32x32xbf16>
    %126 = vector.shape_cast %125 : vector<1x1x32x32xbf16> to vector<32x32xbf16>
    %cst_138 = arith.constant dense<0.000000e+00> : vector<64x32xf32>
    %127 = tpu.matmul %124, %126, %cst_138 {dimension_numbers = #tpu.dot_dimension_numbers<[1], [0], [0], [1], [0, 0, 1, 1], [], []>} : vector<64x32xbf16>, vector<32x32xbf16>, vector<64x32xf32> -> vector<64x32xf32>
    %128 = arith.addf %121, %127 : vector<64x32xf32>
    %c1_139 = arith.constant 1 : index
    %c2_140 = arith.constant 2 : index
    %c0_141 = arith.constant 0 : index
    %129 = tpu.strided_load %arg18[%c1_139, %c2_140, %c0_141] {strides = array<i32: 2, 2, 1>} : memref<18x18x32xf32, #tpu.memory_space<vmem>>, vector<8x8x32xf32>
    %130 = vector.shape_cast %129 : vector<8x8x32xf32> to vector<64x32xf32>
    %131 = arith.truncf %130 : vector<64x32xf32> to vector<64x32xbf16>
    %c1_142 = arith.constant 1 : index
    %c2_143 = arith.constant 2 : index
    %c0_144 = arith.constant 0 : index
    %c0_145 = arith.constant 0 : index
    %132 = vector.load %arg3[%c1_142, %c2_143, %c0_144, %c0_145] : memref<3x3x32x32xbf16, #tpu.memory_space<vmem>>, vector<1x1x32x32xbf16>
    %133 = vector.shape_cast %132 : vector<1x1x32x32xbf16> to vector<32x32xbf16>
    %cst_146 = arith.constant dense<0.000000e+00> : vector<64x32xf32>
    %134 = tpu.matmul %131, %133, %cst_146 {dimension_numbers = #tpu.dot_dimension_numbers<[1], [0], [0], [1], [0, 0, 1, 1], [], []>} : vector<64x32xbf16>, vector<32x32xbf16>, vector<64x32xf32> -> vector<64x32xf32>
    %135 = arith.addf %128, %134 : vector<64x32xf32>
    %c2_147 = arith.constant 2 : index
    %c0_148 = arith.constant 0 : index
    %c0_149 = arith.constant 0 : index
    %136 = tpu.strided_load %arg18[%c2_147, %c0_148, %c0_149] {strides = array<i32: 2, 2, 1>} : memref<18x18x32xf32, #tpu.memory_space<vmem>>, vector<8x8x32xf32>
    %137 = vector.shape_cast %136 : vector<8x8x32xf32> to vector<64x32xf32>
    %138 = arith.truncf %137 : vector<64x32xf32> to vector<64x32xbf16>
    %c2_150 = arith.constant 2 : index
    %c0_151 = arith.constant 0 : index
    %c0_152 = arith.constant 0 : index
    %c0_153 = arith.constant 0 : index
    %139 = vector.load %arg3[%c2_150, %c0_151, %c0_152, %c0_153] : memref<3x3x32x32xbf16, #tpu.memory_space<vmem>>, vector<1x1x32x32xbf16>
    %140 = vector.shape_cast %139 : vector<1x1x32x32xbf16> to vector<32x32xbf16>
    %cst_154 = arith.constant dense<0.000000e+00> : vector<64x32xf32>
    %141 = tpu.matmul %138, %140, %cst_154 {dimension_numbers = #tpu.dot_dimension_numbers<[1], [0], [0], [1], [0, 0, 1, 1], [], []>} : vector<64x32xbf16>, vector<32x32xbf16>, vector<64x32xf32> -> vector<64x32xf32>
    %142 = arith.addf %135, %141 : vector<64x32xf32>
    %c2_155 = arith.constant 2 : index
    %c1_156 = arith.constant 1 : index
    %c0_157 = arith.constant 0 : index
    %143 = tpu.strided_load %arg18[%c2_155, %c1_156, %c0_157] {strides = array<i32: 2, 2, 1>} : memref<18x18x32xf32, #tpu.memory_space<vmem>>, vector<8x8x32xf32>
    %144 = vector.shape_cast %143 : vector<8x8x32xf32> to vector<64x32xf32>
    %145 = arith.truncf %144 : vector<64x32xf32> to vector<64x32xbf16>
    %c2_158 = arith.constant 2 : index
    %c1_159 = arith.constant 1 : index
    %c0_160 = arith.constant 0 : index
    %c0_161 = arith.constant 0 : index
    %146 = vector.load %arg3[%c2_158, %c1_159, %c0_160, %c0_161] : memref<3x3x32x32xbf16, #tpu.memory_space<vmem>>, vector<1x1x32x32xbf16>
    %147 = vector.shape_cast %146 : vector<1x1x32x32xbf16> to vector<32x32xbf16>
    %cst_162 = arith.constant dense<0.000000e+00> : vector<64x32xf32>
    %148 = tpu.matmul %145, %147, %cst_162 {dimension_numbers = #tpu.dot_dimension_numbers<[1], [0], [0], [1], [0, 0, 1, 1], [], []>} : vector<64x32xbf16>, vector<32x32xbf16>, vector<64x32xf32> -> vector<64x32xf32>
    %149 = arith.addf %142, %148 : vector<64x32xf32>
    %c2_163 = arith.constant 2 : index
    %c2_164 = arith.constant 2 : index
    %c0_165 = arith.constant 0 : index
    %150 = tpu.strided_load %arg18[%c2_163, %c2_164, %c0_165] {strides = array<i32: 2, 2, 1>} : memref<18x18x32xf32, #tpu.memory_space<vmem>>, vector<8x8x32xf32>
    %151 = vector.shape_cast %150 : vector<8x8x32xf32> to vector<64x32xf32>
    %152 = arith.truncf %151 : vector<64x32xf32> to vector<64x32xbf16>
    %c2_166 = arith.constant 2 : index
    %c2_167 = arith.constant 2 : index
    %c0_168 = arith.constant 0 : index
    %c0_169 = arith.constant 0 : index
    %153 = vector.load %arg3[%c2_166, %c2_167, %c0_168, %c0_169] : memref<3x3x32x32xbf16, #tpu.memory_space<vmem>>, vector<1x1x32x32xbf16>
    %154 = vector.shape_cast %153 : vector<1x1x32x32xbf16> to vector<32x32xbf16>
    %cst_170 = arith.constant dense<0.000000e+00> : vector<64x32xf32>
    %155 = tpu.matmul %152, %154, %cst_170 {dimension_numbers = #tpu.dot_dimension_numbers<[1], [0], [0], [1], [0, 0, 1, 1], [], []>} : vector<64x32xbf16>, vector<32x32xbf16>, vector<64x32xf32> -> vector<64x32xf32>
    %156 = arith.addf %149, %155 : vector<64x32xf32>
    %c0_171 = arith.constant 0 : index
    %c0_172 = arith.constant 0 : index
    %157 = vector.load %arg11[%c0_171, %c0_172] : memref<1x32xf32, #tpu.memory_space<vmem>>, vector<1x32xf32>
    %158 = vector.broadcast %157 : vector<1x32xf32> to vector<64x32xf32>
    %159 = arith.mulf %156, %158 : vector<64x32xf32>
    %c0_173 = arith.constant 0 : index
    %c0_174 = arith.constant 0 : index
    %160 = vector.load %arg12[%c0_173, %c0_174] : memref<1x32xf32, #tpu.memory_space<vmem>>, vector<1x32xf32>
    %161 = vector.broadcast %160 : vector<1x32xf32> to vector<64x32xf32>
    %162 = arith.addf %159, %161 : vector<64x32xf32>
    %cst_175 = arith.constant dense<0.000000e+00> : vector<32xf32>
    %163 = vector.multi_reduction <add>, %162, %cst_175 [0] : vector<64x32xf32> to vector<32xf32>
    %164 = vector.shape_cast %163 : vector<32xf32> to vector<1x32xf32>
    %cst_176 = arith.constant 6.400000e+01 : f32
    %165 = vector.broadcast %cst_176 : f32 to vector<1x32xf32>
    %166 = arith.divf %164, %165 : vector<1x32xf32>
    %c0_177 = arith.constant 0 : index
    %c0_178 = arith.constant 0 : index
    %167 = vector.load %arg4[%c0_177, %c0_178] : memref<32x2xf32, #tpu.memory_space<vmem>>, vector<32x2xf32>
    %cst_179 = arith.constant dense<0.000000e+00> : vector<1x2xf32>
    %168 = tpu.matmul %166, %167, %cst_179 {dimension_numbers = #tpu.dot_dimension_numbers<[1], [0], [0], [1], [0, 0, 1, 1], [], []>} : vector<1x32xf32>, vector<32x2xf32>, vector<1x2xf32> -> vector<1x2xf32>
    %cst_180 = arith.constant 0.000000e+00 : f32
    %169 = vector.broadcast %cst_180 : f32 to vector<1x2xf32>
    %170 = arith.maximumf %168, %169 : vector<1x2xf32>
    %c0_181 = arith.constant 0 : index
    %c0_182 = arith.constant 0 : index
    %171 = vector.load %arg5[%c0_181, %c0_182] : memref<2x32xf32, #tpu.memory_space<vmem>>, vector<2x32xf32>
    %cst_183 = arith.constant dense<0.000000e+00> : vector<1x32xf32>
    %172 = tpu.matmul %170, %171, %cst_183 {dimension_numbers = #tpu.dot_dimension_numbers<[1], [0], [0], [1], [0, 0, 1, 1], [], []>} : vector<1x2xf32>, vector<2x32xf32>, vector<1x32xf32> -> vector<1x32xf32>
    %cst_184 = arith.constant 0.000000e+00 : f32
    %173 = vector.broadcast %cst_184 : f32 to vector<1x32xf32>
    %174 = arith.subf %173, %172 : vector<1x32xf32>
    %175 = math.exp %174 : vector<1x32xf32>
    %cst_185 = arith.constant 1.000000e+00 : f32
    %176 = vector.broadcast %cst_185 : f32 to vector<1x32xf32>
    %177 = arith.addf %176, %175 : vector<1x32xf32>
    %cst_186 = arith.constant 1.000000e+00 : f32
    %178 = vector.broadcast %cst_186 : f32 to vector<1x32xf32>
    %179 = arith.divf %178, %177 : vector<1x32xf32>
    %180 = vector.broadcast %179 : vector<1x32xf32> to vector<64x32xf32>
    %181 = arith.mulf %162, %180 : vector<64x32xf32>
    %c0_187 = arith.constant 0 : index
    %c0_188 = arith.constant 0 : index
    %c0_189 = arith.constant 0 : index
    %c0_190 = arith.constant 0 : index
    %182 = tpu.strided_load %arg1[%c0_187, %c0_188, %c0_189, %c0_190] {strides = array<i32: 1, 2, 2, 1>} : memref<1x16x16x16xf32, #tpu.memory_space<vmem>>, vector<1x8x8x16xf32>
    %183 = vector.shape_cast %182 : vector<1x8x8x16xf32> to vector<8x8x16xf32>
    %184 = vector.shape_cast %183 : vector<8x8x16xf32> to vector<64x16xf32>
    %185 = arith.truncf %184 : vector<64x16xf32> to vector<64x16xbf16>
    %c0_191 = arith.constant 0 : index
    %c0_192 = arith.constant 0 : index
    %186 = vector.load %arg13[%c0_191, %c0_192] : memref<16x32xbf16, #tpu.memory_space<vmem>>, vector<16x32xbf16>
    %cst_193 = arith.constant dense<0.000000e+00> : vector<64x32xf32>
    %187 = tpu.matmul %185, %186, %cst_193 {dimension_numbers = #tpu.dot_dimension_numbers<[1], [0], [0], [1], [0, 0, 1, 1], [], []>} : vector<64x16xbf16>, vector<16x32xbf16>, vector<64x32xf32> -> vector<64x32xf32>
    %c0_194 = arith.constant 0 : index
    %c0_195 = arith.constant 0 : index
    %188 = vector.load %arg14[%c0_194, %c0_195] : memref<1x32xf32, #tpu.memory_space<vmem>>, vector<1x32xf32>
    %189 = vector.broadcast %188 : vector<1x32xf32> to vector<64x32xf32>
    %190 = arith.mulf %187, %189 : vector<64x32xf32>
    %c0_196 = arith.constant 0 : index
    %c0_197 = arith.constant 0 : index
    %191 = vector.load %arg15[%c0_196, %c0_197] : memref<1x32xf32, #tpu.memory_space<vmem>>, vector<1x32xf32>
    %192 = vector.broadcast %191 : vector<1x32xf32> to vector<64x32xf32>
    %193 = arith.addf %190, %192 : vector<64x32xf32>
    %194 = arith.addf %193, %181 : vector<64x32xf32>
    %195 = vector.shape_cast %194 : vector<64x32xf32> to vector<8x8x32xf32>
    %c0_198 = arith.constant 0 : index
    %c0_199 = arith.constant 0 : index
    %c0_200 = arith.constant 0 : index
    %c0_201 = arith.constant 0 : index
    %196 = vector.load %arg16[%c0_198, %c0_199, %c0_200, %c0_201] : memref<1x8x8x32xf32, #tpu.memory_space<vmem>>, vector<1x8x8x32xf32>
    %197 = vector.shape_cast %196 : vector<1x8x8x32xf32> to vector<8x8x32xf32>
    %198 = vector.shape_cast %195 : vector<8x8x32xf32> to vector<1x8x8x32xf32>
    tpu.vector_store %arg16[%c0_198, %c0_199, %c0_200, %c0_201], %198 {strides = array<i32>} : memref<1x8x8x32xf32, #tpu.memory_space<vmem>>, vector<1x8x8x32xf32>,
    return
  }
  func.func @transform_0(%arg0: i32) -> (i32, i32, i32, i32) {
    %c0_i32 = arith.constant 0 : i32
    %c0_i32_0 = arith.constant 0 : i32
    %c0_i32_1 = arith.constant 0 : i32
    %c0_i32_2 = arith.constant 0 : i32
    return %arg0, %c0_i32, %c0_i32_0, %c0_i32_1 : i32, i32, i32, i32
  }
  func.func @transform_1(%arg0: i32) -> (i32, i32, i32, i32) {
    %c0_i32 = arith.constant 0 : i32
    %c0_i32_0 = arith.constant 0 : i32
    %c0_i32_1 = arith.constant 0 : i32
    %c0_i32_2 = arith.constant 0 : i32
    %c0_i32_3 = arith.constant 0 : i32
    return %c0_i32, %c0_i32_0, %c0_i32_1, %c0_i32_2 : i32, i32, i32, i32
  }
  func.func @transform_2(%arg0: i32) -> (i32, i32, i32, i32) {
    %c0_i32 = arith.constant 0 : i32
    %c0_i32_0 = arith.constant 0 : i32
    %c0_i32_1 = arith.constant 0 : i32
    %c0_i32_2 = arith.constant 0 : i32
    %c0_i32_3 = arith.constant 0 : i32
    return %c0_i32, %c0_i32_0, %c0_i32_1, %c0_i32_2 : i32, i32, i32, i32
  }
  func.func @transform_3(%arg0: i32) -> (i32, i32) {
    %c0_i32 = arith.constant 0 : i32
    %c0_i32_0 = arith.constant 0 : i32
    %c0_i32_1 = arith.constant 0 : i32
    return %c0_i32, %c0_i32_0 : i32, i32
  }
  func.func @transform_4(%arg0: i32) -> (i32, i32) {
    %c0_i32 = arith.constant 0 : i32
    %c0_i32_0 = arith.constant 0 : i32
    %c0_i32_1 = arith.constant 0 : i32
    return %c0_i32, %c0_i32_0 : i32, i32
  }
  func.func @transform_5(%arg0: i32) -> (i32, i32) {
    %c0_i32 = arith.constant 0 : i32
    %c0_i32_0 = arith.constant 0 : i32
    %c0_i32_1 = arith.constant 0 : i32
    return %c0_i32, %c0_i32_0 : i32, i32
  }
  func.func @transform_6(%arg0: i32) -> (i32, i32) {
    %c0_i32 = arith.constant 0 : i32
    %c0_i32_0 = arith.constant 0 : i32
    %c0_i32_1 = arith.constant 0 : i32
    return %c0_i32, %c0_i32_0 : i32, i32
  }
  func.func @transform_7(%arg0: i32) -> (i32, i32) {
    %c0_i32 = arith.constant 0 : i32
    %c0_i32_0 = arith.constant 0 : i32
    %c0_i32_1 = arith.constant 0 : i32
    return %c0_i32, %c0_i32_0 : i32, i32
  }
  func.func @transform_8(%arg0: i32) -> (i32, i32) {
    %c0_i32 = arith.constant 0 : i32
    %c0_i32_0 = arith.constant 0 : i32
    %c0_i32_1 = arith.constant 0 : i32
    return %c0_i32, %c0_i32_0 : i32, i32
  }
  func.func @transform_9(%arg0: i32) -> (i32, i32) {
    %c0_i32 = arith.constant 0 : i32
    %c0_i32_0 = arith.constant 0 : i32
    %c0_i32_1 = arith.constant 0 : i32
    return %c0_i32, %c0_i32_0 : i32, i32
  }
  func.func @transform_10(%arg0: i32) -> (i32, i32) {
    %c0_i32 = arith.constant 0 : i32
    %c0_i32_0 = arith.constant 0 : i32
    %c0_i32_1 = arith.constant 0 : i32
    return %c0_i32, %c0_i32_0 : i32, i32
  }
  func.func @transform_11(%arg0: i32) -> (i32, i32) {
    %c0_i32 = arith.constant 0 : i32
    %c0_i32_0 = arith.constant 0 : i32
    %c0_i32_1 = arith.constant 0 : i32
    return %c0_i32, %c0_i32_0 : i32, i32
  }
  func.func @transform_12(%arg0: i32) -> (i32, i32) {
    %c0_i32 = arith.constant 0 : i32
    %c0_i32_0 = arith.constant 0 : i32
    %c0_i32_1 = arith.constant 0 : i32
    return %c0_i32, %c0_i32_0 : i32, i32
  }
  func.func @transform_13(%arg0: i32) -> (i32, i32) {
    %c0_i32 = arith.constant 0 : i32
    %c0_i32_0 = arith.constant 0 : i32
    %c0_i32_1 = arith.constant 0 : i32
    return %c0_i32, %c0_i32_0 : i32, i32
  }
  func.func @transform_14(%arg0: i32) -> (i32, i32) {
    %c0_i32 = arith.constant 0 : i32
    %c0_i32_0 = arith.constant 0 : i32
    %c0_i32_1 = arith.constant 0 : i32
    return %c0_i32, %c0_i32_0 : i32, i32
  }
  func.func @transform_15(%arg0: i32) -> (i32, i32, i32, i32) {
    %c0_i32 = arith.constant 0 : i32
    %c0_i32_0 = arith.constant 0 : i32
    %c0_i32_1 = arith.constant 0 : i32
    %c0_i32_2 = arith.constant 0 : i32
    return %arg0, %c0_i32, %c0_i32_0, %c0_i32_1 : i32, i32, i32, i32
  }
}

</mosaic_0001>

<bundles_post_ra>
// kernel: tpu_custom_call.1
= control target key start
LH: loop header
LB: loop body
LE: loop exit
PB: predicated region body
PF: predicated region fallthrough
CT: control target
= control target key end

     0   :  { %s6422_s0 = inlined_call_operand.hbm [shape: f32[2,16,16,16], index: 0, kind: input, shape index: {}]   ;;  %s6423_s1 = inlined_call_operand.hbm [shape: bf16[3,3,16,32], index: 1, kind: input, shape index: {}]   ;;  %s6424_s2 = inlined_call_operand.hbm [shape: bf16[3,3,32,32], index: 2, kind: input, shape index: {}]   ;;  %s6425_s3 = inlined_call_operand.vmem [shape: f32[32,2], index: 3, kind: input, shape index: {}]   ;;  %s6426_s4 = inlined_call_operand.vmem [shape: f32[2,32], index: 4, kind: input, shape index: {}]   ;;  %s6427_s5 = inlined_call_operand.vmem [shape: f32[1,32], index: 5, kind: input, shape index: {}]   ;;  %s6428_s6 = inlined_call_operand.vmem [shape: f32[1,16], index: 6, kind: input, shape index: {}]   ;;  %s6429_s7 = inlined_call_operand.vmem [shape: f32[1,16], index: 7, kind: input, shape index: {}]   ;;  %s6430_s8 = inlined_call_operand.vmem [shape: f32[1,32], index: 8, kind: input, shape index: {}]   ;;  %s6431_s9 = inlined_call_operand.vmem [shape: f32[1,32], index: 9, kind: input, shape index: {}]   ;;  %s6432_s10 = inlined_call_operand.vmem [shape: f32[1,32], index: 10, kind: input, shape index: {}]   ;;  %s6433_s11 = inlined_call_operand.vmem [shape: f32[1,32], index: 11, kind: input, shape index: {}]   ;;  %s6434_s12 = inlined_call_operand.vmem [shape: bf16[16,32], index: 12, kind: input, shape index: {}]   ;;  %s6435_s13 = inlined_call_operand.vmem [shape: f32[1,32], index: 13, kind: input, shape index: {}]   ;;  %s6436_s14 = inlined_call_operand.vmem [shape: f32[1,32], index: 14, kind: input, shape index: {}]   ;;  %s6437_s15 = inlined_call_operand.hbm [shape: f32[2,8,8,32], index: 15, kind: output, shape index: {}]  }
   0x1   :  { %6449 = sst [smem:[#allocation34_spill]] %s6423_s1 }
   0x2   :  { %6450 = sst [smem:[#allocation35_spill]] %s6424_s2 }
   0x3   :  { %6451 = sst [smem:[#allocation36_spill]] %s6436_s14 }
   0x4   :  { %6452 = sst [smem:[#allocation37_spill]] %s6437_s15 }
   0x5   :  { %20 = vsyncpa [#allocation5], 0 }
   0x6   :  { %22 = vsyncpa [#allocation5 + $0x1], 0 }
   0x7   :  { %23 = vsyncpa [#allocation8], 0 }
   0x8   :  { %24 = vsyncpa [#allocation6], 0 }
   0x9   :  { %26 = vsyncpa [#allocation6 + $0x1], 0  ;;  %s4826_s18 = smov 0   ;;  %s4828_s19 = smov 0  }
   0xa   :  { %s4830_s20 = smov 0   ;;  %s4832_s21 = smov 0  }
   0xb LB: > { %6453 = sst [smem:[#allocation14_spill]] %s4722_s18  ;;  %s4847_s22 = sadd.s32 4294967295, %s4734_s21   ;;  %s4734_s21 = sphi %s4832_s21, %s6520_s21   ;;  %s4730_s20 = sphi %s4830_s20, %s6525_s20   ;;  %s4726_s19 = sphi %s4828_s19, %s6524_s19   ;;  %s4722_s18 = sphi %s4826_s18, %s6523_s18  }
   0xc   : > { %6454 = sst [smem:[#allocation15_spill]] %s4730_s20  ;;  %s4128_s23 = sadd.s32 4294967294, %s4734_s21  }
   0xd   : > { %p52_p0 = scmp.ne.s32.totalorder %s4726_s19, %s4722_s18  ;;  %p53_p1 = scmp.eq.s32.totalorder %s4847_s22, 0 }
   0xe   : > { %p370_p2 = scmp.eq.s32.totalorder %s4847_s22, 1  ;;  %p376_p3 = scmp.eq.s32.totalorder %s4128_s23, 1 }
   0xf   : > { %p4856_p4 = por %p53_p1, %p52_p0  ;;  %p4129_p5 = scmp.ge.s32.totalorder %s4734_s21, 1 }
  0x10   : > { %p4861_p6 = por %p376_p3, %p52_p0  ;;  %p383_p7 = scmp.lt.s32.totalorder %s4734_s21, 3 }
  0x11   : > { %s6458_s1 = sld [smem:[#allocation34_spill]]  ;;  %s4736_s30 = smov [#allocation7]  }
  0x12   : > { %s6456_s25 = scalar_select %p4861_p6, 1, 0 }
  0x13   : > { %p4869_p8 = pnand %p4129_p5, %p383_p7  ;;  %s396_s16 = sshll.u32 %s4736_s30, 4  ;;  %s397_s16 = int_to_ptr.vmem [resolvable:$true] %s396_s16 }
  0x14   : > { %6457 = sst [smem:[#allocation16_spill]] %s6456_s25  ;;  %s4737_s27 = smov 64  }
  0x15   : > { %p4496_p9 = pneg %p4869_p8  ;;  %s6460_s2 = sld [smem:[#allocation35_spill]] }
  0x16   : > { %s4739_s30 = smov [#allocation9]   ;;  %s4882_s18 = sadd.s32 1, %s4734_s21  }
  0x17   : > { %s394_s28 = sshll.u32 %s6458_s1, 4  ;;  %p4497_p10 = pnand %p4496_p9, %p53_p1  ;;  %s395_s28 = int_to_ptr.hbm [resolvable:$true] %s394_s28 }
  0x18   : > { %s4738_s1 = smov 4   ;;  %s410_s25 = sshll.u32 %s4739_s30, 4  ;;  %s411_s25 = int_to_ptr.vmem [resolvable:$true] %s410_s25 }
  0x19   : > { %4499 = dma.hbm_to_vmem [thread:$0]  (!%p4497_p10), %s395_s28, 1152, %s397_s16, [#allocation8], %s4737_s27, %s4737_s27, %s4738_s1  }
  0x1a   : > { %6461 = sst [smem:[#allocation17_spill]] %s4882_s18  ;;  %s39_s15 = sadd.s32 1, %s4730_s20 }
  0x1b   : > { %s408_s26 = sshll.u32 %s6460_s2, 4  ;;  %s36_s14 = ssub.s32 %s4734_s21, %s4882_s18  ;;  %s409_s26 = int_to_ptr.hbm [resolvable:$true] %s408_s26 }
  0x1c   : > { %4502 = dma.hbm_to_vmem [thread:$0]  (!%p4497_p10), %s409_s26, 2304, %s411_s25, [#allocation8], %s4737_s27, %s4737_s27, %s4738_s1  }
  0x1d   : > { %p46_p12 = scmp.ne.s32.totalorder %s4730_s20, %s4726_s19  ;;  %p37_p13 = scmp.eq.s32.totalorder %s36_s14, 0 }
  0x1e   : > { %p47_p0 = scmp.eq.s32.totalorder %s4734_s21, 0  ;;  %p4513_p5 = scmp.lt.s32.totalorder %s4734_s21, 2 }
  0x1f   : > { %p4892_p3 = por %p370_p2, %p46_p12  ;;  %s460_s16 = sand.u32 1, %s4730_s20  }
  0x20   : > { %s4898_s28 = scalar_select %p37_p13, %s4730_s20, %s39_s15  }
  0x21   : > { %p48_p7 = por %p47_p0, %p46_p12  ;;  %s4133_s23 = sshll.u32 %s460_s16, 8 }
  0x22   : > { %6463 = sst [smem:[#allocation18_spill]] %s4898_s28  ;;  %s4452_s1 = sshll.u32 %s4734_s21, 8 }
  0x23   : > { %s469_s27 = scalar_lea.hbm %s6422_s0, %s4452_s1  ;;  %s464_s30 = scalar_lea.vmem [#allocation4], %s4133_s23 }
  0x24   : > { %s472_s2 = sshll.u32 %s464_s30, 4  ;;  %s470_s14 = sshll.u32 %s469_s27, 4  ;;  %s473_s2 = int_to_ptr.vmem [resolvable:$true] %s472_s2  ;;  %s471_s14 = int_to_ptr.hbm [resolvable:$true] %s470_s14 }
  0x25   : > { %p4905_p2 = pnand %p4513_p5, %p48_p7  ;;  %s461_s15 = scalar_lea.sflag [#allocation5], %s460_s16 }
  0x26   : > { %s4634_s28 = sshra.s32 %s471_s14, 4  ;;  %s4641_s25 = scalar_lea.hbm %s6422_s0, 512  ;;  %s4635_s28 = int_to_ptr.hbm [resolvable:$true] %s4634_s28 }
  0x27   : > { %s4636_s20 = scalar_lea.hbm %s4635_s28, 256  ;;  %p4638_p10 = pneg %p4905_p2 }
  0x28   : > { %p4637_p9 = scmp.ne.s32.totalorder %s4635_s28, %s4636_s20  ;;  %p4642_p0 = scmp.lt.s32.totalorder %s4635_s28, %s6422_s0 }
  0x29   : > { %p4643_p5 = scmp.lt.s32.totalorder %s4641_s25, %s4636_s20 }
  0x2a   : > { %p4639_p12 = pnand %p4638_p10, %p4637_p9 }
  0x2b   : > { %p4644_p7 = por %p4643_p5, %p4642_p0 }
  0x2c   : > { %p4640_p13 = pneg %p4639_p12 }
  0x2e   : > { %p4645_p11 = pnand %p4644_p7, %p4640_p13 }
  0x30   : > { %4648 = shalt.err (!%p4645_p11)
}
  0x31   : > { %s4740_s16 = smov 128   ;;  %s4741_s30 = smov 8  }
  0x32   : > { %4506 = dma.hbm_to_vmem [thread:$0]  (!%p4905_p2), %s471_s14, 4096, %s473_s2, %s461_s15, %s4740_s16, %s4740_s16, %s4741_s30  }
  0x33   : > { %484 = sbr.rel (%p4869_p8) target bundleno = 1622 (0x656), region = 80 }
  0x38   : > { %s4922_s1 = sand.u32 1, %s4726_s19  }
  0x39   : > { %s4137_s23 = sshll.u32 %s4922_s1, 8  ;;  %s487_s28 = scalar_lea.sflag [#allocation5], %s4922_s1 }
  0x3a   : > { %s4926_s20 = scalar_lea.vmem [#allocation4], %s4137_s23 }
  0x3b   : > { %4709 = dma.done.wait (%p4856_p4), %s487_s28, 4096  }
  0x3c   : > { %4711 = vsyncadd (%p4856_p4), %s487_s28, 4294963200 }
  0x3d   : > { %4713 = dma.done.wait (%p53_p1), [#allocation8], 3456  }
  0x3e   : > { %4715 = vsyncadd (%p53_p1), [#allocation8], 4294963840  ;;  %vm2884_vm0 = vcmask 261120   ;;  %vm2887_vm1 = vcmask 254976   ;;  %v4742_v0 = vmov 0.0   ;;  %v4454_v1 = vld [vmem:[#allocation7 + $0x8] sm:$0xff] }
  0x3f   : > { %2885 = vst.msk [vmem:[#allocation3] sm:$0xff] %vm2884_vm0, %v4742_v0  ;;  %v4455_v2 = vld [vmem:[#allocation7 + $0x10] sm:$0xff]  ;;  %904 = vmatpush.bf16.msra.mxu0 %v4454_v1  ;;  %4482 = vmatpush.bf16.msra.mxu1 %v4454_v1  ;;  %vm653_vm2 = vcmask 130048   ;;  %vm656_vm3 = vcmask 123904   ;;  %v4457_v9 = vld [vmem:[#allocation7 + $0x20] sm:$0xff]  ;;  %v578_v13 = vld [vmem:[%s4926_s20 + $0xe8] sm:$0xff] }
  0x40   : > { %2886 = vst.msk [vmem:[#allocation3 + $0x8] sm:$0xff] %vm2884_vm0, %v4742_v0  ;;  %1241 = vmatpush.bf16.msra.mxu2 %v4455_v2  ;;  %v4453_v10 = vld [vmem:[#allocation7] sm:$0xff]  ;;  %v550_v17 = vld [vmem:[%s4926_s20 + $0x8] sm:$0xff]  ;;  %v551_v19 = vld [vmem:[%s4926_s20 + $0x10] sm:$0xff]  ;;  %s6515_s29 = sld [smem:[#allocation36_spill]]  ;;  %s4140_s14 = sshll.u32 %s4922_s1, 6 }
  0x41   : > { %2888 = vst.msk [vmem:[#allocation3 + $0x10] sm:$0x3] %vm2887_vm1, %v4742_v0  ;;  %v5129_v11 = vld [vmem:[%s6428_s6] ss:$0 sm:$0xff]  ;;  %v552_v21 = vld [vmem:[%s4926_s20 + $0x18] sm:$0xff]  ;;  %v554_v33 = vld [vmem:[%s4926_s20 + $0x28] sm:$0xff] }
  0x42   : > { %2889 = vst.msk [vmem:[#allocation3 + $0x18] sm:$0xff] %vm2884_vm0, %v4742_v0  ;;  %v577_v12 = vld [vmem:[%s4926_s20 + $0xe0] sm:$0xff]  ;;  %v614_v18 = vmul.f32 %v5129_v11, %v578_v13  ;;  %v586_v22 = vmul.f32 %v5129_v11, %v550_v17  ;;  %v587_v24 = vmul.f32 %v5129_v11, %v551_v19  ;;  %v588_v26 = vmul.f32 %v5129_v11, %v552_v21  ;;  %v4456_v27 = vld [vmem:[#allocation7 + $0x18] sm:$0xff]  ;;  %v555_v50 = vld [vmem:[%s4926_s20 + $0x30] sm:$0xff]  ;;  %s4481_s15 = sshll.u32 %s4847_s22, 6  ;;  %s6516_s26 = sld [smem:[#allocation37_spill]] }
  0x43   : > { %2890 = vst.msk [vmem:[#allocation3 + $0x20] sm:$0xff] %vm2884_vm0, %v4742_v0  ;;  %1693 = vmatpush.bf16.msrb.mxu0 %v4457_v9  ;;  %1047 = vmatpush.bf16.msrb.mxu1 %v4453_v10  ;;  %v549_v14 = vld [vmem:[%s4926_s20] sm:$0xff]  ;;  %v613_v15 = vmul.f32 %v5129_v11, %v577_v12  ;;  %v590_v35 = vmul.f32 %v5129_v11, %v554_v33  ;;  %v556_v51 = vld [vmem:[%s4926_s20 + $0x38] sm:$0xff]  ;;  %s547_s16 = scalar_lea.vmem [#allocation10], %s4140_s14  ;;  %s3975_s28 = scalar_lea.sflag [#allocation6], %s4922_s1 }
  0x44   : > { %2891 = vst.msk [vmem:[#allocation3 + $0x28] sm:$0x3] %vm2887_vm1, %v4742_v0  ;;  %v5146_v16 = vld [vmem:[%s6429_s7] ss:$0 sm:$0xff]  ;;  %v585_v20 = vmul.f32 %v5129_v11, %v549_v14  ;;  %4483 = vmatpush.bf16.msra.mxu3 %v4456_v27  ;;  %1467 = vmatpush.bf16.msrb.mxu2 %v4456_v27  ;;  %v591_v52 = vmul.f32 %v5129_v11, %v555_v50  ;;  %s3987_s30 = sshll.u32 %s547_s16, 4  ;;  %s3988_s30 = int_to_ptr.vmem [resolvable:$true] %s3987_s30 }
  0x45   : > { %2892 = vst.msk [vmem:[#allocation3 + $0x30] sm:$0xff] %vm2884_vm0, %v4742_v0  ;;  %v649_v23 = vadd.f32 %v5146_v16, %v613_v15  ;;  %v650_v25 = vadd.f32 %v5146_v16, %v614_v18  ;;  %v622_v29 = vadd.f32 %v5146_v16, %v586_v22  ;;  %v623_v30 = vadd.f32 %v5146_v16, %v587_v24  ;;  %v553_v32 = vld [vmem:[%s4926_s20 + $0x20] sm:$0xff]  ;;  %v559_v24 = vld [vmem:[%s4926_s20 + $0x50] sm:$0xff] }
  0x46   : > { %2893 = vst.msk [vmem:[#allocation3 + $0x38] sm:$0xff] %vm2884_vm0, %v4742_v0  ;;  %v621_v28 = vadd.f32 %v5146_v16, %v585_v20  ;;  %v624_v31 = vadd.f32 %v5146_v16, %v588_v26  ;;  %v589_v34 = vmul.f32 %v5129_v11, %v553_v32  ;;  %v626_v37 = vadd.f32 %v5146_v16, %v590_v35 }
  0x47   : > { %2894 = vst.msk [vmem:[#allocation3 + $0x40] sm:$0x3] %vm2887_vm1, %v4742_v0  ;;  %v592_v53 = vmul.f32 %v5129_v11, %v556_v51  ;;  %v627_v56 = vadd.f32 %v5146_v16, %v591_v52  ;;  %v595_v26 = vmul.f32 %v5129_v11, %v559_v24 }
  0x48   : > { %2895 = vst.msk [vmem:[#allocation3 + $0x48] sm:$0xff] %vm2884_vm0, %v4742_v0  ;;  %v625_v36 = vadd.f32 %v5146_v16, %v589_v34  ;;  %s3986_s27 = scalar_lea.hbm %s6516_s26, %s4481_s15 }
  0x49   : > { %2896 = vst.msk [vmem:[#allocation3 + $0x50] sm:$0xff] %vm2884_vm0, %v4742_v0  ;;  %v628_v57 = vadd.f32 %v5146_v16, %v592_v53  ;;  %s3989_s23 = sshll.u32 %s3986_s27, 4  ;;  %s3990_s23 = int_to_ptr.hbm [resolvable:$true] %s3989_s23 }
  0x4a   : > { %2897 = vst.msk [vmem:[#allocation3 + $0x58] sm:$0x3] %vm2887_vm1, %v4742_v0 }
  0x4b   : > { %2898 = vst.msk [vmem:[#allocation3 + $0x60] sm:$0xff] %vm2884_vm0, %v4742_v0 }
  0x4c   : > { %2899 = vst.msk [vmem:[#allocation3 + $0x68] sm:$0xff] %vm2884_vm0, %v4742_v0 }
  0x4d   : > { %2900 = vst.msk [vmem:[#allocation3 + $0x70] sm:$0x3] %vm2887_vm1, %v4742_v0 }
  0x4e   : > { %2901 = vst.msk [vmem:[#allocation3 + $0x78] sm:$0xff] %vm2884_vm0, %v4742_v0 }
  0x4f   : > { %2902 = vst.msk [vmem:[#allocation3 + $0x80] sm:$0xff] %vm2884_vm0, %v4742_v0 }
  0x50   : > { %2903 = vst.msk [vmem:[#allocation3 + $0x88] sm:$0x3] %vm2887_vm1, %v4742_v0 }
  0x51   : > { %2904 = vst.msk [vmem:[#allocation3 + $0x90] sm:$0xff] %vm2884_vm0, %v4742_v0 }
  0x52   : > { %2905 = vst.msk [vmem:[#allocation3 + $0x98] sm:$0xff] %vm2884_vm0, %v4742_v0 }
  0x53   : > { %2906 = vst.msk [vmem:[#allocation3 + $0xa0] sm:$0x3] %vm2887_vm1, %v4742_v0 }
  0x54   : > { %2907 = vst.msk [vmem:[#allocation3 + $0xa8] sm:$0xff] %vm2884_vm0, %v4742_v0 }
  0x55   : > { %2908 = vst.msk [vmem:[#allocation3 + $0xb0] sm:$0xff] %vm2884_vm0, %v4742_v0 }
  0x56   : > { %2909 = vst.msk [vmem:[#allocation3 + $0xb8] sm:$0x3] %vm2887_vm1, %v4742_v0 }
  0x57   : > { %2910 = vst.msk [vmem:[#allocation3 + $0xc0] sm:$0xff] %vm2884_vm0, %v4742_v0 }
  0x58   : > { %2911 = vst.msk [vmem:[#allocation3 + $0xc8] sm:$0xff] %vm2884_vm0, %v4742_v0 }
  0x59   : > { %2912 = vst.msk [vmem:[#allocation3 + $0xd0] sm:$0x3] %vm2887_vm1, %v4742_v0 }
  0x5a   : > { %2913 = vst.msk [vmem:[#allocation3 + $0xd8] sm:$0xff] %vm2884_vm0, %v4742_v0 }
  0x5b   : > { %2914 = vst.msk [vmem:[#allocation3 + $0xe0] sm:$0xff] %vm2884_vm0, %v4742_v0 }
  0x5c   : > { %2915 = vst.msk [vmem:[#allocation3 + $0xe8] sm:$0x3] %vm2887_vm1, %v4742_v0 }
  0x5d   : > { %2916 = vst.msk [vmem:[#allocation3 + $0xf0] sm:$0xff] %vm2884_vm0, %v4742_v0 }
  0x5e   : > { %2917 = vst.msk [vmem:[#allocation3 + $0xf8] sm:$0xff] %vm2884_vm0, %v4742_v0 }
  0x5f   : > { %2918 = vst.msk [vmem:[#allocation3 + $0x100] sm:$0x3] %vm2887_vm1, %v4742_v0 }
  0x60   : > { %2919 = vst.msk [vmem:[#allocation3 + $0x108] sm:$0xff] %vm2884_vm0, %v4742_v0 }
  0x61   : > { %2920 = vst.msk [vmem:[#allocation3 + $0x110] sm:$0xff] %vm2884_vm0, %v4742_v0 }
  0x62   : > { %2921 = vst.msk [vmem:[#allocation3 + $0x118] sm:$0x3] %vm2887_vm1, %v4742_v0 }
  0x63   : > { %2922 = vst.msk [vmem:[#allocation3 + $0x120] sm:$0xff] %vm2884_vm0, %v4742_v0 }
  0x64   : > { %2923 = vst.msk [vmem:[#allocation3 + $0x128] sm:$0xff] %vm2884_vm0, %v4742_v0 }
  0x65   : > { %2924 = vst.msk [vmem:[#allocation3 + $0x130] sm:$0x3] %vm2887_vm1, %v4742_v0 }
  0x66   : > { %2925 = vst.msk [vmem:[#allocation3 + $0x138] sm:$0xff] %vm2884_vm0, %v4742_v0 }
  0x67   : > { %2926 = vst.msk [vmem:[#allocation3 + $0x140] sm:$0xff] %vm2884_vm0, %v4742_v0 }
  0x68   : > { %2927 = vst.msk [vmem:[#allocation3 + $0x148] sm:$0x3] %vm2887_vm1, %v4742_v0 }
  0x69   : > { %2928 = vst.msk [vmem:[#allocation3 + $0x150] sm:$0xff] %vm2884_vm0, %v4742_v0 }
  0x6a   : > { %2929 = vst.msk [vmem:[#allocation3 + $0x158] sm:$0xff] %vm2884_vm0, %v4742_v0 }
  0x6b   : > { %2930 = vst.msk [vmem:[#allocation3 + $0x160] sm:$0x3] %vm2887_vm1, %v4742_v0 }
  0x6c   : > { %2931 = vst.msk [vmem:[#allocation3 + $0x168] sm:$0xff] %vm2884_vm0, %v4742_v0 }
  0x6d   : > { %2932 = vst.msk [vmem:[#allocation3 + $0x170] sm:$0xff] %vm2884_vm0, %v4742_v0 }
  0x6e   : > { %2933 = vst.msk [vmem:[#allocation3 + $0x178] sm:$0x3] %vm2887_vm1, %v4742_v0 }
  0x6f   : > { %2934 = vst.msk [vmem:[#allocation3 + $0x180] sm:$0xff] %vm2884_vm0, %v4742_v0 }
  0x70   : > { %2935 = vst.msk [vmem:[#allocation3 + $0x188] sm:$0xff] %vm2884_vm0, %v4742_v0 }
  0x71   : > { %2936 = vst.msk [vmem:[#allocation3 + $0x190] sm:$0x3] %vm2887_vm1, %v4742_v0 }
  0x72   : > { %654 = vst.msk [vmem:[#allocation2] sm:$0xff] %vm653_vm2, %v4742_v0 }
  0x73   : > { %655 = vst.msk [vmem:[#allocation2 + $0x8] sm:$0xff] %vm653_vm2, %v4742_v0 }
  0x74   : > { %657 = vst.msk [vmem:[#allocation2 + $0x10] sm:$0x3] %vm656_vm3, %v4742_v0 }
  0x75   : > { %658 = vst.msk [vmem:[#allocation2 + $0x18] sm:$0xff] %vm653_vm2, %v4742_v0 }
  0x76   : > { %659 = vst.msk [vmem:[#allocation2 + $0x20] sm:$0xff] %vm653_vm2, %v4742_v0 }
  0x77   : > { %660 = vst.msk [vmem:[#allocation2 + $0x28] sm:$0x3] %vm656_vm3, %v4742_v0 }
  0x78   : > { %661 = vst.msk [vmem:[#allocation2 + $0x30] sm:$0xff] %vm653_vm2, %v4742_v0 }
  0x79   : > { %662 = vst.msk [vmem:[#allocation2 + $0x38] sm:$0xff] %vm653_vm2, %v4742_v0  ;;  %v742_v54 = vld [vmem:[#allocation2] sm:$0xff] }
  0x7a   : > { %v792_v3 = vld [vmem:[#allocation2 + $0x1] sm:$0xff]  ;;  %663 = vst.msk [vmem:[#allocation2 + $0x40] sm:$0x3] %vm656_vm3, %v4742_v0 }
  0x7b   : > { %v793_v4 = vld [vmem:[#allocation2 + $0x9] sm:$0xff]  ;;  %664 = vst.msk [vmem:[#allocation2 + $0x48] sm:$0xff] %vm653_vm2, %v4742_v0 }
  0x7c   : > { %v824_v5 = vpack.c.bf16 %v793_v4, %v792_v3  ;;  %665 = vst.msk [vmem:[#allocation2 + $0x50] sm:$0xff] %vm653_vm2, %v4742_v0  ;;  %v1129_v6 = vld [vmem:[#allocation2 + $0x2] sm:$0xff]  ;;  %v1130_v7 = vld [vmem:[#allocation2 + $0xa] sm:$0xff] }
  0x7d   : > { %666 = vst.msk [vmem:[#allocation2 + $0x58] sm:$0x3] %vm656_vm3, %v4742_v0  ;;  %v1161_v8 = vpack.c.bf16 %v1130_v7, %v1129_v6  ;;  %v743_v55 = vld [vmem:[#allocation2 + $0x8] sm:$0xff]  ;;  %v557_v4 = vld [vmem:[%s4926_s20 + $0x40] sm:$0xff] }
  0x7e   : > { %4145 = vmatmul.msk.bf16.vlgmr.msra.gmra.mxu0 %vm653_vm2, %v824_v5  ;;  %667 = vst.msk [vmem:[#allocation2 + $0x60] sm:$0xff] %vm653_vm2, %v4742_v0  ;;  %v774_v62 = vpack.c.bf16 %v743_v55, %v742_v54  ;;  %v558_v5 = vld [vmem:[%s4926_s20 + $0x48] sm:$0xff]  ;;  %v593_v6 = vmul.f32 %v5129_v11, %v557_v4 }
  0x7f   : > { %668 = vst.msk [vmem:[#allocation2 + $0x68] sm:$0xff] %vm653_vm2, %v4742_v0  ;;  %4185 = vmatmul.msk.bf16.vlgmr.msra.gmra.mxu2 %vm653_vm2, %v1161_v8  ;;  %v594_v7 = vmul.f32 %v5129_v11, %v558_v5 }
  0x80   : > { %669 = vst.msk [vmem:[#allocation2 + $0x70] sm:$0x3] %vm656_vm3, %v4742_v0  ;;  %v629_v10 = vadd.f32 %v5146_v16, %v593_v6 }
  0x81   : > { %670 = vst.msk [vmem:[#allocation2 + $0x78] sm:$0xff] %vm653_vm2, %v4742_v0  ;;  %v630_v12 = vadd.f32 %v5146_v16, %v594_v7 }
  0x82   : > { %671 = vst.msk [vmem:[#allocation2 + $0x80] sm:$0xff] %vm653_vm2, %v4742_v0 }
  0x83   : > { %672 = vst.msk [vmem:[#allocation2 + $0x88] sm:$0x3] %vm656_vm3, %v4742_v0 }
  0x84   : > { %673 = vst.msk [vmem:[#allocation2 + $0x90] sm:$0xff] %vm653_vm2, %v4742_v0 }
  0x85   : > { %674 = vst.msk [vmem:[#allocation2 + $0x98] sm:$0xff] %vm653_vm2, %v4742_v0 }
  0x86   : > { %675 = vst.msk [vmem:[#allocation2 + $0xa0] sm:$0x3] %vm656_vm3, %v4742_v0 }
  0x87   : > { %676 = vst.msk [vmem:[#allocation2 + $0xa8] sm:$0xff] %vm653_vm2, %v4742_v0 }
  0x88   : > { %677 = vst.msk [vmem:[#allocation2 + $0xb0] sm:$0xff] %vm653_vm2, %v4742_v0 }
  0x89   : > { %678 = vst.msk [vmem:[#allocation2 + $0xb8] sm:$0x3] %vm656_vm3, %v4742_v0 }
  0x8a   : > { %679 = vst.msk [vmem:[#allocation2 + $0xc0] sm:$0xff] %vm653_vm2, %v4742_v0 }
  0x8b   : > { %680 = vst.msk [vmem:[#allocation2 + $0xc8] sm:$0xff] %vm653_vm2, %v4742_v0 }
  0x8c   : > { %681 = vst.msk [vmem:[#allocation2 + $0xd0] sm:$0x3] %vm656_vm3, %v4742_v0 }
  0x8d   : > { %682 = vst.msk [vmem:[#allocation2 + $0xd8] sm:$0xff] %vm653_vm2, %v4742_v0 }
  0x8e   : > { %683 = vst.msk [vmem:[#allocation2 + $0xe0] sm:$0xff] %vm653_vm2, %v4742_v0 }
  0x8f   : > { %684 = vst.msk [vmem:[#allocation2 + $0xe8] sm:$0x3] %vm656_vm3, %v4742_v0 }
  0x90   : > { %685 = vst.msk [vmem:[#allocation2 + $0xf0] sm:$0xff] %vm653_vm2, %v4742_v0 }
  0x91   : > { %686 = vst.msk [vmem:[#allocation2 + $0xf8] sm:$0xff] %vm653_vm2, %v4742_v0 }
  0x92   : > { %687 = vst.msk [vmem:[#allocation2 + $0x100] sm:$0x3] %vm656_vm3, %v4742_v0 }
  0x93   : > { %688 = vst.msk [vmem:[#allocation2 + $0x108] sm:$0xff] %vm653_vm2, %v4742_v0 }
  0x94   : > { %689 = vst.msk [vmem:[#allocation2 + $0x110] sm:$0xff] %vm653_vm2, %v4742_v0 }
  0x95   : > { %690 = vst.msk [vmem:[#allocation2 + $0x118] sm:$0x3] %vm656_vm3, %v4742_v0 }
  0x96   : > { %691 = vst.msk [vmem:[#allocation2 + $0x120] sm:$0xff] %vm653_vm2, %v4742_v0 }
  0x97   : > { %692 = vst.msk [vmem:[#allocation2 + $0x128] sm:$0xff] %vm653_vm2, %v4742_v0 }
  0x98   : > { %693 = vst.msk [vmem:[#allocation2 + $0x130] sm:$0x3] %vm656_vm3, %v4742_v0 }
  0x99   : > { %694 = vst.msk [vmem:[#allocation2 + $0x138] sm:$0xff] %vm653_vm2, %v4742_v0 }
  0x9a   : > { %695 = vst.msk [vmem:[#allocation2 + $0x140] sm:$0xff] %vm653_vm2, %v4742_v0 }
  0x9b   : > { %696 = vst.msk [vmem:[#allocation2 + $0x148] sm:$0x3] %vm656_vm3, %v4742_v0 }
  0x9c   : > { %697 = vst.msk [vmem:[#allocation2 + $0x150] sm:$0xff] %vm653_vm2, %v4742_v0 }
  0x9d   : > { %698 = vst.msk [vmem:[#allocation2 + $0x158] sm:$0xff] %vm653_vm2, %v4742_v0 }
  0x9e   : > { %699 = vst.msk [vmem:[#allocation2 + $0x160] sm:$0x3] %vm656_vm3, %v4742_v0 }
  0x9f   : > { %700 = vst.msk [vmem:[#allocation2 + $0x168] sm:$0xff] %vm653_vm2, %v4742_v0 }
  0xa0   : > { %701 = vst.msk [vmem:[#allocation2 + $0x170] sm:$0xff] %vm653_vm2, %v4742_v0 }
  0xa1   : > { %702 = vst.msk [vmem:[#allocation2 + $0x178] sm:$0x3] %vm656_vm3, %v4742_v0 }
  0xa2   : > { %703 = vst.msk [vmem:[#allocation2 + $0x180] sm:$0xff] %vm653_vm2, %v4742_v0 }
  0xa3   : > { %704 = vst.msk [vmem:[#allocation2 + $0x188] sm:$0xff] %vm653_vm2, %v4742_v0 }
  0xa4   : > { %705 = vst.msk [vmem:[#allocation2 + $0x190] sm:$0x3] %vm656_vm3, %v4742_v0 }
  0xa5   : > { %706 = vst.msk [vmem:[#allocation2 + $0x198] sm:$0xff] %vm653_vm2, %v4742_v0 }
  0xa6   : > { %707 = vst.msk [vmem:[#allocation2 + $0x1a0] sm:$0xff] %vm653_vm2, %v4742_v0 }
  0xa7   : > { %708 = vst.msk [vmem:[#allocation2 + $0x1a8] sm:$0x3] %vm656_vm3, %v4742_v0 }
  0xa8   : > { %738 = vst.msk [vmem:[#allocation2 + $0x169] sm:$0xff] %vm653_vm2, %v649_v23 }
  0xa9   : > { %739 = vst.msk [vmem:[#allocation2 + $0x171] sm:$0xff] %vm653_vm2, %v650_v25  ;;  %v560_v25 = vld [vmem:[%s4926_s20 + $0x58] sm:$0xff] }
  0xaa   : > { %710 = vst.msk [vmem:[#allocation2 + $0x19] sm:$0xff] %vm653_vm2, %v621_v28  ;;  %v596_v27 = vmul.f32 %v5129_v11, %v560_v25  ;;  %v631_v28 = vadd.f32 %v5146_v16, %v595_v26 }
  0xab   : > { %711 = vst.msk [vmem:[#allocation2 + $0x21] sm:$0xff] %vm653_vm2, %v622_v29 }
  0xac   : > { %712 = vst.msk [vmem:[#allocation2 + $0x31] sm:$0xff] %vm653_vm2, %v623_v30  ;;  %v632_v29 = vadd.f32 %v5146_v16, %v596_v27 }
  0xad   : > { %713 = vst.msk [vmem:[#allocation2 + $0x39] sm:$0xff] %vm653_vm2, %v624_v31 }
  0xae   : > { %714 = vst.msk [vmem:[#allocation2 + $0x49] sm:$0xff] %vm653_vm2, %v625_v36 }
  0xaf   : > { %v822_v38 = vld [vmem:[#allocation2 + $0x169] sm:$0xff]  ;;  %715 = vst.msk [vmem:[#allocation2 + $0x51] sm:$0xff] %vm653_vm2, %v626_v37 }
  0xb0   : > { %v823_v39 = vld [vmem:[#allocation2 + $0x171] sm:$0xff]  ;;  %716 = vst.msk [vmem:[#allocation2 + $0x61] sm:$0xff] %vm653_vm2, %v627_v56 }
  0xb1   : > { %v839_v40 = vpack.c.bf16 %v823_v39, %v822_v38  ;;  %v794_v41 = vld [vmem:[#allocation2 + $0x19] sm:$0xff]  ;;  %717 = vst.msk [vmem:[#allocation2 + $0x69] sm:$0xff] %vm653_vm2, %v628_v57  ;;  %v563_v56 = vld [vmem:[%s4926_s20 + $0x70] sm:$0xff] }
  0xb2   : > { %v795_v42 = vld [vmem:[#allocation2 + $0x21] sm:$0xff]  ;;  %v744_v8 = vld [vmem:[#allocation2 + $0x18] sm:$0xff]  ;;  %718 = vst.msk [vmem:[#allocation2 + $0x79] sm:$0xff] %vm653_vm2, %v629_v10 }
  0xb3   : > { %v1131_v43 = vld [vmem:[#allocation2 + $0x1a] sm:$0xff]  ;;  %v1132_v44 = vld [vmem:[#allocation2 + $0x22] sm:$0xff]  ;;  %4160 = vmatmul.msk.bf16.vlgmr.msra.gmra.mxu1 %vm653_vm2, %v839_v40  ;;  %v5191_v45 = vpack.c.bf16 %v795_v42, %v794_v41  ;;  %v1357_v47 = vld [vmem:[#allocation2 + $0x30] sm:$0xff]  ;;  %719 = vst.msk [vmem:[#allocation2 + $0x81] sm:$0xff] %vm653_vm2, %v630_v12 }
  0xb4   : > { %v1162_v46 = vpack.c.bf16 %v1132_v44, %v1131_v43  ;;  %v1358_v48 = vld [vmem:[#allocation2 + $0x38] sm:$0xff]  ;;  %v745_v9 = vld [vmem:[#allocation2 + $0x20] sm:$0xff]  ;;  %720 = vst.msk [vmem:[#allocation2 + $0x91] sm:$0xff] %vm653_vm2, %v631_v28  ;;  %v562_v40 = vld [vmem:[%s4926_s20 + $0x68] sm:$0xff] }
  0xb5   : > { %4146 = vmatmul.msk.bf16.gmra.mxu0 %vm653_vm2, %v5191_v45  ;;  %v5196_v49 = vpack.c.bf16 %v1358_v48, %v1357_v47  ;;  %v796_v58 = vld [vmem:[#allocation2 + $0x31] sm:$0xff]  ;;  %v797_v59 = vld [vmem:[#allocation2 + $0x39] sm:$0xff]  ;;  %v1359_v1 = vld [vmem:[#allocation2 + $0x48] sm:$0xff]  ;;  %v5225_v18 = vpack.c.bf16 %v745_v9, %v744_v8  ;;  %721 = vst.msk [vmem:[#allocation2 + $0x99] sm:$0xff] %vm653_vm2, %v632_v29  ;;  %v598_v42 = vmul.f32 %v5129_v11, %v562_v40 }
  0xb6   : > { %4186 = vmatmul.msk.bf16.gmra.mxu2 %vm653_vm2, %v1162_v46  ;;  %v1133_v60 = vld [vmem:[#allocation2 + $0x32] sm:$0xff]  ;;  %v1134_v61 = vld [vmem:[#allocation2 + $0x3a] sm:$0xff]  ;;  %v5208_v63 = vpack.c.bf16 %v797_v59, %v796_v58  ;;  %v798_v13 = vld [vmem:[#allocation2 + $0x49] sm:$0xff]  ;;  %v599_v58 = vmul.f32 %v5129_v11, %v563_v56 }
  0xb7   : > { %4206 = vmatmul.msk.bf16.vlgmr.msra.gmra.mxu3 %vm653_vm2, %v5196_v49  ;;  %v1163_v0 = vpack.c.bf16 %v1134_v61, %v1133_v60  ;;  %v1360_v2 = vld [vmem:[#allocation2 + $0x50] sm:$0xff]  ;;  %v1361_v21 = vld [vmem:[#allocation2 + $0x60] sm:$0xff]  ;;  %v634_v44 = vadd.f32 %v5146_v16, %v598_v42  ;;  %v564_v57 = vld [vmem:[%s4926_s20 + $0x78] sm:$0xff] }
  0xb8   : > { %v5211_v3 = vpack.c.bf16 %v1360_v2, %v1359_v1  ;;  %v799_v14 = vld [vmem:[#allocation2 + $0x51] sm:$0xff]  ;;  %v1362_v22 = vld [vmem:[#allocation2 + $0x68] sm:$0xff]  ;;  %v561_v39 = vld [vmem:[%s4926_s20 + $0x60] sm:$0xff]  ;;  %v600_v59 = vmul.f32 %v5129_v11, %v564_v57  ;;  %v635_v60 = vadd.f32 %v5146_v16, %v599_v58 }
  0xb9   : > { %v1135_v15 = vld [vmem:[#allocation2 + $0x4a] sm:$0xff]  ;;  %v1136_v17 = vld [vmem:[#allocation2 + $0x52] sm:$0xff]  ;;  %v5228_v19 = vpack.c.bf16 %v799_v14, %v798_v13  ;;  %v5232_v23 = vpack.c.bf16 %v1362_v22, %v1361_v21  ;;  %v800_v30 = vld [vmem:[#allocation2 + $0x61] sm:$0xff]  ;;  %v597_v41 = vmul.f32 %v5129_v11, %v561_v39  ;;  %723 = vst.msk [vmem:[#allocation2 + $0xb1] sm:$0xff] %vm653_vm2, %v634_v44 }
  0xba   : > { %v1164_v20 = vpack.c.bf16 %v1136_v17, %v1135_v15  ;;  %v801_v31 = vld [vmem:[#allocation2 + $0x69] sm:$0xff]  ;;  %v1363_v36 = vld [vmem:[#allocation2 + $0x78] sm:$0xff]  ;;  %v1364_v37 = vld [vmem:[#allocation2 + $0x80] sm:$0xff]  ;;  %v636_v61 = vadd.f32 %v5146_v16, %v600_v59  ;;  %724 = vst.msk [vmem:[#allocation2 + $0xc1] sm:$0xff] %vm653_vm2, %v635_v60 }
  0xbb   : > { %v1137_v32 = vld [vmem:[#allocation2 + $0x62] sm:$0xff]  ;;  %v1138_v33 = vld [vmem:[#allocation2 + $0x6a] sm:$0xff]  ;;  %v5247_v34 = vpack.c.bf16 %v801_v31, %v800_v30  ;;  %v5251_v38 = vpack.c.bf16 %v1364_v37, %v1363_v36  ;;  %v633_v43 = vadd.f32 %v5146_v16, %v597_v41  ;;  %v802_v46 = vld [vmem:[#allocation2 + $0x79] sm:$0xff] }
  0xbc   : > { %v1165_v35 = vpack.c.bf16 %v1138_v33, %v1137_v32  ;;  %v803_v47 = vld [vmem:[#allocation2 + $0x81] sm:$0xff]  ;;  %v1365_v53 = vld [vmem:[#allocation2 + $0x90] sm:$0xff]  ;;  %v1366_v54 = vld [vmem:[#allocation2 + $0x98] sm:$0xff]  ;;  %725 = vst.msk [vmem:[#allocation2 + $0xc9] sm:$0xff] %vm653_vm2, %v636_v61 }
  0xbd   : > { %v1139_v48 = vld [vmem:[#allocation2 + $0x7a] sm:$0xff]  ;;  %v1140_v50 = vld [vmem:[#allocation2 + $0x82] sm:$0xff]  ;;  %722 = vst.msk [vmem:[#allocation2 + $0xa9] sm:$0xff] %vm653_vm2, %v633_v43  ;;  %v5266_v51 = vpack.c.bf16 %v803_v47, %v802_v46  ;;  %v5270_v55 = vpack.c.bf16 %v1366_v54, %v1365_v53  ;;  %v1141_v1 = vld [vmem:[#allocation2 + $0x92] sm:$0xff] }
  0xbe   : > { %v1166_v52 = vpack.c.bf16 %v1140_v50, %v1139_v48  ;;  %v1142_v2 = vld [vmem:[#allocation2 + $0x9a] sm:$0xff]  ;;  %v566_v10 = vld [vmem:[%s4926_s20 + $0x88] sm:$0xff]  ;;  %v567_v29 = vld [vmem:[%s4926_s20 + $0x90] sm:$0xff] }
  0xbf   : > { %v1167_v5 = vpack.c.bf16 %v1142_v2, %v1141_v1  ;;  %v565_v9 = vld [vmem:[%s4926_s20 + $0x80] sm:$0xff]  ;;  %v602_v13 = vmul.f32 %v5129_v11, %v566_v10  ;;  %v568_v30 = vld [vmem:[%s4926_s20 + $0x98] sm:$0xff]  ;;  %v603_v31 = vmul.f32 %v5129_v11, %v567_v29  ;;  %v570_v53 = vld [vmem:[%s4926_s20 + $0xa8] sm:$0xff] }
  0xc0   : > { %v601_v12 = vmul.f32 %v5129_v11, %v565_v9  ;;  %v1144_v22 = vld [vmem:[#allocation2 + $0xb2] sm:$0xff]  ;;  %v604_v32 = vmul.f32 %v5129_v11, %v568_v30  ;;  %v606_v56 = vmul.f32 %v5129_v11, %v570_v53 }
  0xc1   : > { %v638_v15 = vadd.f32 %v5146_v16, %v602_v13  ;;  %v1369_v26 = vld [vmem:[#allocation2 + $0xc0] sm:$0xff]  ;;  %v639_v33 = vadd.f32 %v5146_v16, %v603_v31 }
  0xc2   : > { %v637_v14 = vadd.f32 %v5146_v16, %v601_v12  ;;  %v808_v36 = vld [vmem:[#allocation2 + $0xc1] sm:$0xff]  ;;  %v642_v58 = vadd.f32 %v5146_v16, %v606_v56 }
  0xc3   : > { %4165 = vmatmul.msk.bf16.vlgmr.msrb.gmra.mxu1 %vm653_vm2, %v774_v62  ;;  %v804_v62 = vld [vmem:[#allocation2 + $0x91] sm:$0xff]  ;;  %727 = vst.msk [vmem:[#allocation2 + $0xe1] sm:$0xff] %vm653_vm2, %v638_v15  ;;  %v1370_v27 = vld [vmem:[#allocation2 + $0xc8] sm:$0xff]  ;;  %v573_v56 = vld [vmem:[%s4926_s20 + $0xc0] sm:$0xff] }
  0xc4   : > { %v1367_v6 = vld [vmem:[#allocation2 + $0xa8] sm:$0xff]  ;;  %v1368_v7 = vld [vmem:[#allocation2 + $0xb0] sm:$0xff]  ;;  %726 = vst.msk [vmem:[#allocation2 + $0xd9] sm:$0xff] %vm653_vm2, %v637_v14  ;;  %v5308_v28 = vpack.c.bf16 %v1370_v27, %v1369_v26  ;;  %v572_v15 = vld [vmem:[%s4926_s20 + $0xb8] sm:$0xff] }
  0xc5   : > { %4147 = vmatmul.msk.bf16.gmra.mxu0 %vm653_vm2, %v5208_v63  ;;  %v5289_v8 = vpack.c.bf16 %v1368_v7, %v1367_v6  ;;  %v806_v17 = vld [vmem:[#allocation2 + $0xa9] sm:$0xff]  ;;  %728 = vst.msk [vmem:[#allocation2 + $0xf1] sm:$0xff] %vm653_vm2, %v639_v33 }
  0xc6   : > { %4187 = vmatmul.msk.bf16.gmra.mxu2 %vm653_vm2, %v1163_v0  ;;  %v805_v0 = vld [vmem:[#allocation2 + $0x99] sm:$0xff]  ;;  %v1143_v21 = vld [vmem:[#allocation2 + $0xaa] sm:$0xff]  ;;  %v1145_v40 = vld [vmem:[#allocation2 + $0xc2] sm:$0xff]  ;;  %731 = vst.msk [vmem:[#allocation2 + $0x111] sm:$0xff] %vm653_vm2, %v642_v58 }
  0xc7   : > { %4207 = vmatmul.msk.bf16.gmra.mxu3 %vm653_vm2, %v5211_v3  ;;  %v5285_v4 = vpack.c.bf16 %v805_v0, %v804_v62  ;;  %v1168_v25 = vpack.c.bf16 %v1144_v22, %v1143_v21  ;;  %v809_v39 = vld [vmem:[#allocation2 + $0xc9] sm:$0xff]  ;;  %v608_v21 = vmul.f32 %v5129_v11, %v572_v15 }
  0xc8   : > { %v1146_v41 = vld [vmem:[#allocation2 + $0xca] sm:$0xff]  ;;  %v5323_v42 = vpack.c.bf16 %v809_v39, %v808_v36 }
  0xc9   : > { %v1169_v43 = vpack.c.bf16 %v1146_v41, %v1145_v40  ;;  %v571_v14 = vld [vmem:[%s4926_s20 + $0xb0] sm:$0xff]  ;;  %v644_v26 = vadd.f32 %v5146_v16, %v608_v21 }
  0xca   : > { %v811_v61 = vld [vmem:[#allocation2 + $0xe1] sm:$0xff] }
  0xcb   : > { %v1371_v44 = vld [vmem:[#allocation2 + $0xd8] sm:$0xff]  ;;  %v1372_v46 = vld [vmem:[#allocation2 + $0xe0] sm:$0xff]  ;;  %733 = vst.msk [vmem:[#allocation2 + $0x129] sm:$0xff] %vm653_vm2, %v644_v26 }
  0xcc   : > { %v5327_v48 = vpack.c.bf16 %v1372_v46, %v1371_v44  ;;  %v810_v59 = vld [vmem:[#allocation2 + $0xd9] sm:$0xff]  ;;  %v1148_v0 = vld [vmem:[#allocation2 + $0xe2] sm:$0xff]  ;;  %v1373_v6 = vld [vmem:[#allocation2 + $0xf0] sm:$0xff] }
  0xcd   : > { %v1147_v62 = vld [vmem:[#allocation2 + $0xda] sm:$0xff]  ;;  %v5344_v2 = vpack.c.bf16 %v811_v61, %v810_v59  ;;  %v812_v27 = vld [vmem:[#allocation2 + $0xf1] sm:$0xff] }
  0xce   : > { %v1152_v15 = vld [vmem:[#allocation2 + $0x112] sm:$0xff] }
  0xd3   : > { %4166 = vmatmul.msk.bf16.gmra.mxu1 %vm653_vm2, %v5225_v18 }
  0xd5   : > { %4148 = vmatmul.msk.bf16.gmra.mxu0 %vm653_vm2, %v5228_v19 }
  0xd6   : > { %4188 = vmatmul.msk.bf16.gmra.mxu2 %vm653_vm2, %v1164_v20  ;;  %v807_v20 = vld [vmem:[#allocation2 + $0xb1] sm:$0xff] }
  0xd7   : > { %4208 = vmatmul.msk.bf16.gmra.mxu3 %vm653_vm2, %v5232_v23  ;;  %v5304_v24 = vpack.c.bf16 %v807_v20, %v806_v17  ;;  %v607_v20 = vmul.f32 %v5129_v11, %v571_v14 }
  0xe3   : > { %4167 = vmatmul.msk.bf16.gmra.mxu1 %vm653_vm2, %v5196_v49 }
  0xe5   : > { %4149 = vmatmul.msk.bf16.gmra.mxu0 %vm653_vm2, %v5247_v34 }
  0xe6   : > { %4189 = vmatmul.msk.bf16.gmra.mxu2 %vm653_vm2, %v1165_v35  ;;  %v640_v35 = vadd.f32 %v5146_v16, %v604_v32 }
  0xe7   : > { %4209 = vmatmul.msk.bf16.gmra.mxu3 %vm653_vm2, %v5251_v38 }
  0xe8   : > { %729 = vst.msk [vmem:[#allocation2 + $0xf9] sm:$0xff] %vm653_vm2, %v640_v35 }
  0xef   : > { %v1374_v7 = vld [vmem:[#allocation2 + $0xf8] sm:$0xff] }
  0xf0   : > { %v5348_v10 = vpack.c.bf16 %v1374_v7, %v1373_v6  ;;  %v813_v29 = vld [vmem:[#allocation2 + $0xf9] sm:$0xff]  ;;  %v815_v7 = vld [vmem:[#allocation2 + $0x111] sm:$0xff] }
  0xf1   : > { %v1149_v30 = vld [vmem:[#allocation2 + $0xf2] sm:$0xff]  ;;  %v1150_v31 = vld [vmem:[#allocation2 + $0xfa] sm:$0xff]  ;;  %v5367_v36 = vpack.c.bf16 %v813_v29, %v812_v27 }
  0xf2   : > { %v1171_v39 = vpack.c.bf16 %v1150_v31, %v1149_v30 }
  0xf3   : > { %4168 = vmatmul.msk.bf16.gmra.mxu1 %vm653_vm2, %v5211_v3 }
  0xf5   : > { %4150 = vmatmul.msk.bf16.gmra.mxu0 %vm653_vm2, %v5266_v51 }
  0xf6   : > { %4190 = vmatmul.msk.bf16.gmra.mxu2 %vm653_vm2, %v1166_v52  ;;  %v569_v52 = vld [vmem:[%s4926_s20 + $0xa0] sm:$0xff] }
  0xf7   : > { %4210 = vmatmul.msk.bf16.gmra.mxu3 %vm653_vm2, %v5270_v55  ;;  %v605_v54 = vmul.f32 %v5129_v11, %v569_v52 }
  0xf9   : > { %v641_v57 = vadd.f32 %v5146_v16, %v605_v54 }
  0xfb   : > { %v906_v37 = vpop.f32.mrf.mxu0  ;;  %730 = vst.msk [vmem:[#allocation2 + $0x109] sm:$0xff] %vm653_vm2, %v641_v57  ;;  %v574_v57 = vld [vmem:[%s4926_s20 + $0xc8] sm:$0xff] }
  0xfc   : > { %v610_v59 = vmul.f32 %v5129_v11, %v574_v57 }
 0x102   : > { %v1243_v47 = vpop.f32.mrf.mxu2  ;;  %v1375_v40 = vld [vmem:[#allocation2 + $0x108] sm:$0xff]  ;;  %v1376_v41 = vld [vmem:[#allocation2 + $0x110] sm:$0xff] }
 0x103   : > { %4169 = vmatmul.msk.bf16.gmra.mxu1 %vm653_vm2, %v5232_v23  ;;  %v908_v50 = vpop.f32.mrf.mxu0  ;;  %v5375_v52 = vpack.c.bf16 %v1376_v41, %v1375_v40  ;;  %v814_v6 = vld [vmem:[#allocation2 + $0x109] sm:$0xff] }
 0x104   : > { %v1151_v14 = vld [vmem:[#allocation2 + $0x10a] sm:$0xff] }
 0x105   : > { %4151 = vmatmul.msk.bf16.gmra.mxu0 %vm653_vm2, %v5285_v4  ;;  %6465 = vst [vmem:[#allocation19_spill] sm:$0xff] %v5375_v52  ;;  %v575_v41 = vld [vmem:[%s4926_s20 + $0xd0] sm:$0xff] }
 0x106   : > { %4191 = vmatmul.msk.bf16.gmra.mxu2 %vm653_vm2, %v1167_v5  ;;  %v1170_v5 = vpack.c.bf16 %v1148_v0, %v1147_v62 }
 0x107   : > { %4211 = vmatmul.msk.bf16.gmra.mxu3 %vm653_vm2, %v5289_v8 }
 0x10a   : > { %v1245_v60 = vpop.f32.mrf.mxu2 }
 0x113   : > { %4170 = vmatmul.msk.bf16.gmra.mxu1 %vm653_vm2, %v5251_v38 }
 0x115   : > { %4152 = vmatmul.msk.bf16.gmra.mxu0 %vm653_vm2, %v5304_v24 }
 0x116   : > { %4192 = vmatmul.msk.bf16.gmra.mxu2 %vm653_vm2, %v1168_v25  ;;  %v643_v25 = vadd.f32 %v5146_v16, %v607_v20 }
 0x117   : > { %4212 = vmatmul.msk.bf16.gmra.mxu3 %vm653_vm2, %v5308_v28 }
 0x118   : > { %732 = vst.msk [vmem:[#allocation2 + $0x121] sm:$0xff] %vm653_vm2, %v643_v25  ;;  %v5394_v25 = vpack.c.bf16 %v815_v7, %v814_v6  ;;  %v817_v6 = vld [vmem:[#allocation2 + $0x129] sm:$0xff] }
 0x11f   : > { %v1377_v26 = vld [vmem:[#allocation2 + $0x120] sm:$0xff]  ;;  %v1378_v27 = vld [vmem:[#allocation2 + $0x128] sm:$0xff] }
 0x120   : > { %v1153_v7 = vld [vmem:[#allocation2 + $0x122] sm:$0xff] }
 0x123   : > { %4171 = vmatmul.msk.bf16.gmra.mxu1 %vm653_vm2, %v5270_v55 }
 0x125   : > { %4153 = vmatmul.msk.bf16.gmra.mxu0 %vm653_vm2, %v5323_v42 }
 0x126   : > { %4193 = vmatmul.msk.bf16.gmra.mxu2 %vm653_vm2, %v1169_v43 }
 0x127   : > { %4213 = vmatmul.msk.bf16.gmra.mxu3 %vm653_vm2, %v5327_v48 }
 0x130   : > { %v5342_v1 = vpop.f32.mrf.mxu1 }
 0x132   : > { %v911_v9 = vpop.f32.mrf.mxu0 }
 0x133   : > { %4172 = vmatmul.msk.bf16.gmra.mxu1 %vm653_vm2, %v5289_v8 }
 0x135   : > { %4154 = vmatmul.msk.bf16.gmra.mxu0 %vm653_vm2, %v5344_v2 }
 0x136   : > { %4194 = vmatmul.msk.bf16.gmra.mxu2 %vm653_vm2, %v1170_v5  ;;  %v646_v5 = vadd.f32 %v5146_v16, %v610_v59 }
 0x137   : > { %4214 = vmatmul.msk.bf16.gmra.mxu3 %vm653_vm2, %v5348_v10 }
 0x138   : > { %v5353_v12 = vpop.f32.mrf.mxu1  ;;  %735 = vst.msk [vmem:[#allocation2 + $0x141] sm:$0xff] %vm653_vm2, %v646_v5  ;;  %v816_v5 = vld [vmem:[#allocation2 + $0x121] sm:$0xff] }
 0x139   : > { %v1248_v13 = vpop.f32.mrf.mxu2 }
 0x13a   : > { %v5359_v17 = vpop.f32.mrf.mxu0  ;;  %v1474_v22 = vpop.f32.mrf.mxu3 }
 0x140   : > { %v1049_v32 = vpop.f32.mrf.mxu1 }
 0x141   : > { %v1250_v33 = vpop.f32.mrf.mxu2  ;;  %v1050_v35 = vadd.f32 %v1049_v32, %v906_v37  ;;  %v5398_v32 = vpack.c.bf16 %v1378_v27, %v1377_v26 }
 0x142   : > { %v5369_v43 = vpop.f32.mrf.mxu0  ;;  %v1476_v44 = vpop.f32.mrf.mxu3 }
 0x143   : > { %4173 = vmatmul.msk.bf16.gmra.mxu1 %vm653_vm2, %v5308_v28  ;;  %v5373_v46 = vadd.f32 %v1243_v47, %v1050_v35  ;;  %v609_v47 = vmul.f32 %v5129_v11, %v573_v56 }
 0x145   : > { %4155 = vmatmul.msk.bf16.gmra.mxu0 %vm653_vm2, %v5367_v36  ;;  %v645_v0 = vadd.f32 %v5146_v16, %v609_v47 }
 0x146   : > { %4195 = vmatmul.msk.bf16.gmra.mxu2 %vm653_vm2, %v1171_v39 }
 0x147   : > { %4215 = vmatmul.msk.bf16.gmra.mxu3 %vm653_vm2, %v5375_v52  ;;  %734 = vst.msk [vmem:[#allocation2 + $0x139] sm:$0xff] %vm653_vm2, %v645_v0 }
 0x148   : > { %v1051_v37 = vpop.f32.mrf.mxu1 }
 0x149   : > { %v1253_v53 = vpop.f32.mrf.mxu2  ;;  %v1052_v54 = vadd.f32 %v1051_v37, %v908_v50  ;;  %v576_v37 = vld [vmem:[%s4926_s20 + $0xd8] sm:$0xff] }
 0x14a   : > { %v5384_v58 = vpop.f32.mrf.mxu0  ;;  %v1479_v61 = vpop.f32.mrf.mxu3 }
 0x14b   : > { %v5388_v62 = vadd.f32 %v1245_v60, %v1052_v54  ;;  %v1172_v60 = vpack.c.bf16 %v1152_v15, %v1151_v14  ;;  %v611_v54 = vmul.f32 %v5129_v11, %v575_v41  ;;  %v1154_v14 = vld [vmem:[#allocation2 + $0x12a] sm:$0xff] }
 0x14d   : > { %v647_v47 = vadd.f32 %v5146_v16, %v611_v54 }
 0x14e   : > { %v1380_v26 = vld [vmem:[#allocation2 + $0x140] sm:$0xff] }
 0x14f   : > { %736 = vst.msk [vmem:[#allocation2 + $0x151] sm:$0xff] %vm653_vm2, %v647_v47  ;;  %v819_v47 = vld [vmem:[#allocation2 + $0x141] sm:$0xff] }
 0x150   : > { %v1054_v50 = vpop.f32.mrf.mxu1 }
 0x151   : > { %v1255_v20 = vpop.f32.mrf.mxu2  ;;  %v1055_v21 = vadd.f32 %v1054_v50, %v911_v9 }
 0x152   : > { %v921_v29 = vpop.f32.mrf.mxu0  ;;  %v1481_v31 = vpop.f32.mrf.mxu3 }
 0x153   : > { %4174 = vmatmul.msk.bf16.gmra.mxu1 %vm653_vm2, %v5327_v48  ;;  %v1325_v30 = vadd.f32 %v1248_v13, %v1055_v21  ;;  %v1173_v21 = vpack.c.bf16 %v1154_v14, %v1153_v7 }
 0x155   : > { %v5400_v35 = vadd.f32 %v1474_v22, %v1325_v30  ;;  %4156 = vmatmul.msk.bf16.gmra.mxu0 %vm653_vm2, %v5394_v25  ;;  %v612_v22 = vmul.f32 %v5129_v11, %v576_v37 }
 0x156   : > { %4196 = vmatmul.msk.bf16.gmra.mxu2 %vm653_vm2, %v1172_v60  ;;  %v1379_v60 = vld [vmem:[#allocation2 + $0x138] sm:$0xff] }
 0x157   : > { %4216 = vmatmul.msk.bf16.gmra.mxu3 %vm653_vm2, %v5398_v32  ;;  %v648_v59 = vadd.f32 %v5146_v16, %v612_v22 }
 0x158   : > { %v1056_v9 = vpop.f32.mrf.mxu1 }
 0x159   : > { %v1258_v39 = vpop.f32.mrf.mxu2  ;;  %v1057_v40 = vadd.f32 %v1056_v9, %v5359_v17  ;;  %737 = vst.msk [vmem:[#allocation2 + $0x159] sm:$0xff] %vm653_vm2, %v648_v59  ;;  %v5423_v9 = vpack.c.bf16 %v1380_v26, %v1379_v60  ;;  %v1155_v59 = vld [vmem:[#allocation2 + $0x13a] sm:$0xff]  ;;  %v4458_v26 = vld [vmem:[#allocation7 + $0x28] sm:$0xff] }
 0x15a   : > { %v923_v13 = vpop.f32.mrf.mxu0  ;;  %v1484_v57 = vpop.f32.mrf.mxu3  ;;  %1919 = vmatpush.bf16.msra.mxu1 %v4458_v26 }
 0x15b   : > { %v1326_v56 = vadd.f32 %v1250_v33, %v1057_v40  ;;  %v5419_v33 = vpack.c.bf16 %v817_v6, %v816_v5  ;;  %v1156_v5 = vld [vmem:[#allocation2 + $0x142] sm:$0xff] }
 0x15d   : > { %v5414_v0 = vadd.f32 %v1476_v44, %v1326_v56  ;;  %6466 = vst [vmem:[#allocation20_spill] sm:$0xff] %v5419_v33 }
 0x160   : > { %v1059_v17 = vpop.f32.mrf.mxu1  ;;  %v1382_v60 = vld [vmem:[#allocation2 + $0x158] sm:$0xff] }
 0x161   : > { %v1260_v15 = vpop.f32.mrf.mxu2  ;;  %v1060_v50 = vadd.f32 %v1059_v17, %v5369_v43 }
 0x162   : > { %v926_v27 = vpop.f32.mrf.mxu0  ;;  %v1486_v30 = vpop.f32.mrf.mxu3 }
 0x163   : > { %4175 = vmatmul.msk.bf16.gmra.mxu1 %vm653_vm2, %v5348_v10  ;;  %v1327_v44 = vadd.f32 %v1253_v53, %v1060_v50  ;;  %v1174_v50 = vpack.c.bf16 %v1156_v5, %v1155_v59  ;;  %v820_v5 = vld [vmem:[#allocation2 + $0x151] sm:$0xff] }
 0x165   : > { %v5425_v40 = vadd.f32 %v1479_v61, %v1327_v44  ;;  %4157 = vmatmul.msk.bf16.gmra.mxu0 %vm653_vm2, %v5419_v33  ;;  %v818_v61 = vld [vmem:[#allocation2 + $0x139] sm:$0xff] }
 0x166   : > { %4197 = vmatmul.msk.bf16.gmra.mxu2 %vm653_vm2, %v1173_v21  ;;  %v5437_v17 = vpack.c.bf16 %v819_v47, %v818_v61  ;;  %v1381_v21 = vld [vmem:[#allocation2 + $0x150] sm:$0xff]  ;;  %v4461_v61 = vld [vmem:[#allocation7 + $0x40] sm:$0xff]  ;;  %v580_v33 = vld [vmem:[%s4926_s20 + $0xf8] sm:$0xff] }
 0x167   : > { %4217 = vmatmul.msk.bf16.gmra.mxu3 %vm653_vm2, %v5423_v9  ;;  %v5441_v44 = vpack.c.bf16 %v1382_v60, %v1381_v21  ;;  %2598 = vmatpush.bf16.msra.mxu0 %v4461_v61  ;;  %v1158_v21 = vld [vmem:[#allocation2 + $0x15a] sm:$0xff] }
 0x168   : > { %v1061_v43 = vpop.f32.mrf.mxu1  ;;  %6467 = vst [vmem:[#allocation21_spill] sm:$0xff] %v5437_v17 }
 0x169   : > { %v1263_v41 = vpop.f32.mrf.mxu2  ;;  %v1062_v37 = vadd.f32 %v1061_v43, %v5384_v58 }
 0x16a   : > { %v5433_v54 = vpop.f32.mrf.mxu0  ;;  %v1489_v22 = vpop.f32.mrf.mxu3 }
 0x16b   : > { %v1328_v53 = vadd.f32 %v1255_v20, %v1062_v37 }
 0x16d   : > { %v5435_v56 = vadd.f32 %v1481_v31, %v1328_v53 }
 0x170   : > { %v1064_v6 = vpop.f32.mrf.mxu1 }
 0x171   : > { %v1265_v7 = vpop.f32.mrf.mxu2  ;;  %v1065_v14 = vadd.f32 %v1064_v6, %v921_v29  ;;  %v821_v6 = vld [vmem:[#allocation2 + $0x159] sm:$0xff] }
 0x172   : > { %v931_v58 = vpop.f32.mrf.mxu0  ;;  %v1491_v31 = vpop.f32.mrf.mxu3 }
 0x173   : > { %4176 = vmatmul.msk.bf16.gmra.mxu1 %vm653_vm2, %v5375_v52  ;;  %v1329_v20 = vadd.f32 %v1258_v39, %v1065_v14  ;;  %v1157_v14 = vld [vmem:[#allocation2 + $0x152] sm:$0xff] }
 0x174   : > { %v1384_v52 = vld [vmem:[#allocation2 + $0x170] sm:$0xff] }
 0x175   : > { %v5443_v43 = vadd.f32 %v1484_v57, %v1329_v20  ;;  %4158 = vmatmul.msk.bf16.gmra.mxu0 %vm653_vm2, %v5437_v17  ;;  %v5452_v20 = vpack.c.bf16 %v821_v6, %v820_v5  ;;  %v1175_v17 = vpack.c.bf16 %v1158_v21, %v1157_v14 }
 0x176   : > { %4198 = vmatmul.msk.bf16.gmra.mxu2 %vm653_vm2, %v1174_v50 }
 0x177   : > { %4218 = vmatmul.msk.bf16.gmra.mxu3 %vm653_vm2, %v5441_v44 }
 0x178   : > { %v1066_v29 = vpop.f32.mrf.mxu1 }
 0x179   : > { %v1268_v37 = vpop.f32.mrf.mxu2  ;;  %v1067_v53 = vadd.f32 %v1066_v29, %v923_v13  ;;  %v4460_v13 = vld [vmem:[#allocation7 + $0x38] sm:$0xff]  ;;  %v1383_v29 = vld [vmem:[#allocation2 + $0x168] sm:$0xff] }
 0x17a   : > { %v933_v47 = vpop.f32.mrf.mxu0  ;;  %v1494_v59 = vpop.f32.mrf.mxu3  ;;  %2372 = vmatpush.bf16.msrb.mxu3 %v4460_v13 }
 0x17b   : > { %v1330_v39 = vadd.f32 %v1260_v15, %v1067_v53  ;;  %v579_v53 = vld [vmem:[%s4926_s20 + $0xf0] sm:$0xff] }
 0x17d   : > { %v5450_v57 = vadd.f32 %v1486_v30, %v1330_v39  ;;  %v615_v39 = vmul.f32 %v5129_v11, %v579_v53 }
 0x17f   : > { %6468 = vst [vmem:[#allocation22_spill] sm:$0xff] %v5450_v57  ;;  %v616_v57 = vmul.f32 %v5129_v11, %v580_v33  ;;  %v651_v6 = vadd.f32 %v5146_v16, %v615_v39 }
 0x180   : > { %v1069_v50 = vpop.f32.mrf.mxu1 }
 0x181   : > { %v1270_v60 = vpop.f32.mrf.mxu2  ;;  %v1070_v26 = vadd.f32 %v1069_v50, %v926_v27  ;;  %v5460_v27 = vpack.c.bf16 %v1384_v52, %v1383_v29  ;;  %v652_v14 = vadd.f32 %v5146_v16, %v616_v57  ;;  %740 = vst.msk [vmem:[#allocation2 + $0x181] sm:$0xff] %vm653_vm2, %v651_v6 }
 0x182   : > { %v936_v15 = vpop.f32.mrf.mxu0  ;;  %v1496_v61 = vpop.f32.mrf.mxu3 }
 0x183   : > { %4177 = vmatmul.msk.bf16.gmra.mxu1 %vm653_vm2, %v5398_v32  ;;  %v1331_v30 = vadd.f32 %v1263_v41, %v1070_v26  ;;  %6469 = vst [vmem:[#allocation23_spill] sm:$0xff] %v5460_v27  ;;  %v1160_v26 = vld [vmem:[#allocation2 + $0x172] sm:$0xff] }
 0x184   : > { %741 = vst.msk [vmem:[#allocation2 + $0x189] sm:$0xff] %vm653_vm2, %v652_v14 }
 0x185   : > { %v5462_v5 = vadd.f32 %v1489_v22, %v1331_v30  ;;  %4159 = vmatmul.msk.bf16.gmra.mxu0 %vm653_vm2, %v5452_v20 }
 0x186   : > { %4199 = vmatmul.msk.bf16.gmra.mxu2 %vm653_vm2, %v1175_v17  ;;  %v1159_v17 = vld [vmem:[#allocation2 + $0x16a] sm:$0xff] }
 0x187   : > { %4219 = vmatmul.msk.bf16.gmra.mxu3 %vm653_vm2, %v5460_v27  ;;  %v1176_v29 = vpack.c.bf16 %v1160_v26, %v1159_v17 }
 0x188   : > { %v1071_v41 = vpop.f32.mrf.mxu1  ;;  %v1385_v53 = vld [vmem:[#allocation2 + $0x180] sm:$0xff] }
 0x189   : > { %v1273_v21 = vpop.f32.mrf.mxu2  ;;  %v1072_v11 = vadd.f32 %v1071_v41, %v5433_v54 }
 0x18a   : > { %v938_v52 = vpop.f32.mrf.mxu0  ;;  %v1499_v22 = vpop.f32.mrf.mxu3 }
 0x18b   : > { %v1332_v33 = vadd.f32 %v1265_v7, %v1072_v11  ;;  %v1386_v30 = vld [vmem:[#allocation2 + $0x188] sm:$0xff] }
 0x18c   : > { %v5478_v54 = vpack.c.bf16 %v1386_v30, %v1385_v53 }
 0x18d   : > { %v5474_v50 = vadd.f32 %v1491_v31, %v1332_v33  ;;  %v4459_v33 = vld [vmem:[#allocation7 + $0x30] sm:$0xff] }
 0x18e   : > { %6470 = vst [vmem:[#allocation24_spill] sm:$0xff] %v5478_v54  ;;  %2146 = vmatpush.bf16.msra.mxu2 %v4459_v33 }
 0x190   : > { %v1074_v13 = vpop.f32.mrf.mxu1 }
 0x191   : > { %v1275_v16 = vpop.f32.mrf.mxu2  ;;  %v1075_v57 = vadd.f32 %v1074_v13, %v931_v58 }
 0x192   : > { %v941_v39 = vpop.f32.mrf.mxu0  ;;  %v1501_v14 = vpop.f32.mrf.mxu3 }
 0x193   : > { %4178 = vmatmul.msk.bf16.gmra.mxu1 %vm653_vm2, %v5423_v9  ;;  %v1333_v6 = vadd.f32 %v1268_v37, %v1075_v57 }
 0x195   : > { %v5480_v7 = vadd.f32 %v1494_v59, %v1333_v6  ;;  %4225 = vmatmul.msk.bf16.vlgmr.msrb.gmra.mxu0 %vm653_vm2, %v5191_v45 }
 0x196   : > { %4200 = vmatmul.msk.bf16.gmra.mxu2 %vm653_vm2, %v1176_v29 }
 0x197   : > { %4220 = vmatmul.msk.bf16.gmra.mxu3 %vm653_vm2, %v5478_v54 }
 0x198   : > { %v1076_v31 = vpop.f32.mrf.mxu1 }
 0x199   : > { %v1278_v58 = vpop.f32.mrf.mxu2  ;;  %v1077_v41 = vadd.f32 %v1076_v31, %v933_v47 }
 0x19a   : > { %v943_v11 = vpop.f32.mrf.mxu0  ;;  %v1504_v37 = vpop.f32.mrf.mxu3 }
 0x19b   : > { %v1334_v17 = vadd.f32 %v1270_v60, %v1077_v41 }
 0x19d   : > { %v5487_v26 = vadd.f32 %v1496_v61, %v1334_v17 }
 0x1a0   : > { %v1079_v59 = vpop.f32.mrf.mxu1 }
 0x1a1   : > { %v1280_v13 = vpop.f32.mrf.mxu2  ;;  %v1080_v57 = vadd.f32 %v1079_v59, %v936_v15 }
 0x1a2   : > { %v946_v29 = vpop.f32.mrf.mxu0  ;;  %v1506_v53 = vpop.f32.mrf.mxu3 }
 0x1a3   : > { %4179 = vmatmul.msk.bf16.gmra.mxu1 %vm653_vm2, %v5441_v44  ;;  %v1335_v45 = vadd.f32 %v1273_v21, %v1080_v57 }
 0x1a5   : > { %v5491_v30 = vadd.f32 %v1499_v22, %v1335_v45  ;;  %4226 = vmatmul.msk.bf16.gmra.mxu0 %vm653_vm2, %v5208_v63 }
 0x1a6   : > { %4205 = vmatmul.msk.bf16.vlgmr.msrb.gmra.mxu2 %vm653_vm2, %v5225_v18 }
 0x1a7   : > { %4285 = vmatmul.msk.bf16.vlgmr.msrb.gmra.mxu3 %vm653_vm2, %v5208_v63 }
 0x1a8   : > { %v1081_v47 = vpop.f32.mrf.mxu1 }
 0x1a9   : > { %v1283_v60 = vpop.f32.mrf.mxu2  ;;  %v1082_v15 = vadd.f32 %v1081_v47, %v938_v52  ;;  %v1807_v47 = vld [vmem:[#allocation2 + $0x1a] sm:$0xff] }
 0x1aa   : > { %v948_v61 = vpop.f32.mrf.mxu0  ;;  %v1509_v31 = vpop.f32.mrf.mxu3 }
 0x1ab   : > { %v1336_v6 = vadd.f32 %v1275_v16, %v1082_v15 }
 0x1ad   : > { %v5499_v41 = vadd.f32 %v1501_v14, %v1336_v6 }
 0x1b0   : > { %v1084_v21 = vpop.f32.mrf.mxu1 }
 0x1b1   : > { %v1285_v22 = vpop.f32.mrf.mxu2  ;;  %v1085_v33 = vadd.f32 %v1084_v21, %v941_v39 }
 0x1b2   : > { %v951_v17 = vpop.f32.mrf.mxu0  ;;  %v1511_v59 = vpop.f32.mrf.mxu3 }
 0x1b3   : > { %4180 = vmatmul.msk.bf16.gmra.mxu1 %vm653_vm2, %v5460_v27  ;;  %v1337_v18 = vadd.f32 %v1278_v58, %v1085_v33  ;;  %v1808_v58 = vld [vmem:[#allocation2 + $0x22] sm:$0xff] }
 0x1b5   : > { %v5503_v57 = vadd.f32 %v1504_v37, %v1337_v18  ;;  %4227 = vmatmul.msk.bf16.gmra.mxu0 %vm653_vm2, %v5228_v19  ;;  %v1839_v37 = vpack.c.bf16 %v1808_v58, %v1807_v47 }
 0x1b6   : > { %4265 = vmatmul.msk.bf16.vlgmr.msra.gmra.mxu2 %vm653_vm2, %v5196_v49 }
 0x1b7   : > { %4286 = vmatmul.msk.bf16.gmra.mxu3 %vm653_vm2, %v5228_v19 }
 0x1b8   : > { %v1086_v63 = vpop.f32.mrf.mxu1 }
 0x1b9   : > { %v1288_v52 = vpop.f32.mrf.mxu2  ;;  %v1087_v16 = vadd.f32 %v1086_v63, %v943_v11 }
 0x1ba   : > { %v953_v39 = vpop.f32.mrf.mxu0  ;;  %v1514_v45 = vpop.f32.mrf.mxu3 }
 0x1bb   : > { %v1338_v14 = vadd.f32 %v1280_v13, %v1087_v16  ;;  %v1809_v16 = vld [vmem:[#allocation2 + $0x32] sm:$0xff] }
 0x1bd   : > { %v5511_v15 = vadd.f32 %v1506_v53, %v1338_v14 }
 0x1c0   : > { %v1089_v6 = vpop.f32.mrf.mxu1 }
 0x1c1   : > { %v1290_v21 = vpop.f32.mrf.mxu2  ;;  %v1090_v33 = vadd.f32 %v1089_v6, %v946_v29 }
 0x1c2   : > { %v956_v18 = vpop.f32.mrf.mxu0  ;;  %v1516_v54 = vpop.f32.mrf.mxu3 }
 0x1c3   : > { %4245 = vmatmul.msk.bf16.vlgmr.msra.gmra.mxu1 %vm653_vm2, %v1839_v37  ;;  %v1339_v49 = vadd.f32 %v1283_v60, %v1090_v33  ;;  %v1810_v60 = vld [vmem:[#allocation2 + $0x3a] sm:$0xff] }
 0x1c5   : > { %v5514_v27 = vadd.f32 %v1509_v31, %v1339_v49  ;;  %4228 = vmatmul.msk.bf16.gmra.mxu0 %vm653_vm2, %v5247_v34  ;;  %v5524_v31 = vpack.c.bf16 %v1810_v60, %v1809_v16 }
 0x1c6   : > { %4266 = vmatmul.msk.bf16.gmra.mxu2 %vm653_vm2, %v5211_v3 }
 0x1c7   : > { %4287 = vmatmul.msk.bf16.gmra.mxu3 %vm653_vm2, %v5247_v34 }
 0x1c8   : > { %v1091_v19 = vpop.f32.mrf.mxu1 }
 0x1c9   : > { %v1293_v11 = vpop.f32.mrf.mxu2  ;;  %v1092_v13 = vadd.f32 %v1091_v19, %v948_v61 }
 0x1ca   : > { %v958_v29 = vpop.f32.mrf.mxu0  ;;  %v1519_v63 = vpop.f32.mrf.mxu3 }
 0x1cb   : > { %v1340_v53 = vadd.f32 %v1285_v22, %v1092_v13  ;;  %v1811_v13 = vld [vmem:[#allocation2 + $0x4a] sm:$0xff] }
 0x1cd   : > { %v5522_v14 = vadd.f32 %v1511_v59, %v1340_v53 }
 0x1d0   : > { %v1094_v47 = vpop.f32.mrf.mxu1 }
 0x1d1   : > { %v1295_v58 = vpop.f32.mrf.mxu2  ;;  %v1095_v37 = vadd.f32 %v1094_v47, %v951_v17 }
 0x1d2   : > { %v961_v6 = vpop.f32.mrf.mxu0  ;;  %v1521_v33 = vpop.f32.mrf.mxu3 }
 0x1d3   : > { %4246 = vmatmul.msk.bf16.gmra.mxu1 %vm653_vm2, %v5524_v31  ;;  %v1341_v3 = vadd.f32 %v1288_v52, %v1095_v37  ;;  %v1812_v52 = vld [vmem:[#allocation2 + $0x52] sm:$0xff] }
 0x1d5   : > { %v5528_v34 = vadd.f32 %v1514_v45, %v1341_v3  ;;  %4229 = vmatmul.msk.bf16.gmra.mxu0 %vm653_vm2, %v5266_v51  ;;  %v5538_v45 = vpack.c.bf16 %v1812_v52, %v1811_v13 }
 0x1d6   : > { %4267 = vmatmul.msk.bf16.gmra.mxu2 %vm653_vm2, %v5232_v23 }
 0x1d7   : > { %4288 = vmatmul.msk.bf16.gmra.mxu3 %vm653_vm2, %v5266_v51 }
 0x1d8   : > { %v1096_v61 = vpop.f32.mrf.mxu1 }
 0x1d9   : > { %v1298_v22 = vpop.f32.mrf.mxu2  ;;  %v1097_v17 = vadd.f32 %v1096_v61, %v953_v39 }
 0x1da   : > { %v963_v59 = vpop.f32.mrf.mxu0  ;;  %v1524_v19 = vpop.f32.mrf.mxu3 }
 0x1db   : > { %v1342_v49 = vadd.f32 %v1290_v21, %v1097_v17 }
 0x1dd   : > { %v5536_v53 = vadd.f32 %v1516_v54, %v1342_v49  ;;  %v1813_v49 = vld [vmem:[#allocation2 + $0x62] sm:$0xff] }
 0x1e0   : > { %v1099_v16 = vpop.f32.mrf.mxu1 }
 0x1e1   : > { %v1300_v60 = vpop.f32.mrf.mxu2  ;;  %v1100_v47 = vadd.f32 %v1099_v16, %v956_v18 }
 0x1e2   : > { %v966_v37 = vpop.f32.mrf.mxu0  ;;  %v1526_v3 = vpop.f32.mrf.mxu3 }
 0x1e3   : > { %4247 = vmatmul.msk.bf16.gmra.mxu1 %vm653_vm2, %v5538_v45  ;;  %v1343_v23 = vadd.f32 %v1293_v11, %v1100_v47  ;;  %v1814_v11 = vld [vmem:[#allocation2 + $0x6a] sm:$0xff] }
 0x1e5   : > { %v5542_v51 = vadd.f32 %v1519_v63, %v1343_v23  ;;  %4230 = vmatmul.msk.bf16.gmra.mxu0 %vm653_vm2, %v5285_v4  ;;  %v5552_v63 = vpack.c.bf16 %v1814_v11, %v1813_v49  ;;  %v2270_v23 = vld [vmem:[#allocation2 + $0xa9] sm:$0xff] }
 0x1e6   : > { %4268 = vmatmul.msk.bf16.gmra.mxu2 %vm653_vm2, %v5251_v38  ;;  %v2271_v38 = vld [vmem:[#allocation2 + $0xb1] sm:$0xff] }
 0x1e7   : > { %6471 = vst [vmem:[#allocation25_spill] sm:$0xff] %v5542_v51  ;;  %4289 = vmatmul.msk.bf16.gmra.mxu3 %vm653_vm2, %v5285_v4 }
 0x1e8   : > { %v1101_v54 = vpop.f32.mrf.mxu1 }
 0x1e9   : > { %v1303_v39 = vpop.f32.mrf.mxu2  ;;  %v1102_v21 = vadd.f32 %v1101_v54, %v958_v29  ;;  %v2297_v54 = vpack.c.bf16 %v2271_v38, %v2270_v23 }
 0x1ea   : > { %v968_v18 = vpop.f32.mrf.mxu0  ;;  %v1529_v17 = vpop.f32.mrf.mxu3 }
 0x1eb   : > { %v1344_v61 = vadd.f32 %v1295_v58, %v1102_v21 }
 0x1ed   : > { %v5550_v13 = vadd.f32 %v1521_v33, %v1344_v61 }
 0x1f0   : > { %v1104_v52 = vpop.f32.mrf.mxu1 }
 0x1f1   : > { %v1305_v16 = vpop.f32.mrf.mxu2  ;;  %v1105_v47 = vadd.f32 %v1104_v52, %v961_v6  ;;  %v1815_v52 = vld [vmem:[#allocation2 + $0x7a] sm:$0xff] }
 0x1f2   : > { %v971_v51 = vpop.f32.mrf.mxu0  ;;  %v1531_v29 = vpop.f32.mrf.mxu3 }
 0x1f3   : > { %4248 = vmatmul.msk.bf16.gmra.mxu1 %vm653_vm2, %v5552_v63  ;;  %v1345_v4 = vadd.f32 %v1298_v22, %v1105_v47  ;;  %v1816_v22 = vld [vmem:[#allocation2 + $0x82] sm:$0xff] }
 0x1f5   : > { %v5556_v58 = vadd.f32 %v1524_v19, %v1345_v4  ;;  %4231 = vmatmul.msk.bf16.gmra.mxu0 %vm653_vm2, %v5304_v24  ;;  %v5565_v19 = vpack.c.bf16 %v1816_v22, %v1815_v52  ;;  %v2272_v4 = vld [vmem:[#allocation2 + $0xc1] sm:$0xff] }
 0x1f6   : > { %4269 = vmatmul.msk.bf16.gmra.mxu2 %vm653_vm2, %v5270_v55 }
 0x1f7   : > { %6472 = vst [vmem:[#allocation26_spill] sm:$0xff] %v5556_v58  ;;  %4290 = vmatmul.msk.bf16.gmra.mxu3 %vm653_vm2, %v2297_v54  ;;  %v2273_v58 = vld [vmem:[#allocation2 + $0xc9] sm:$0xff] }
 0x1f8   : > { %v1106_v33 = vpop.f32.mrf.mxu1 }
 0x1f9   : > { %v1308_v21 = vpop.f32.mrf.mxu2  ;;  %v1107_v6 = vadd.f32 %v1106_v33, %v963_v59  ;;  %v2298_v33 = vpack.c.bf16 %v2273_v58, %v2272_v4 }
 0x1fa   : > { %v973_v61 = vpop.f32.mrf.mxu0  ;;  %v1534_v11 = vpop.f32.mrf.mxu3 }
 0x1fb   : > { %v1346_v49 = vadd.f32 %v1300_v60, %v1107_v6 }
 0x1fd   : > { %v5563_v47 = vadd.f32 %v1526_v3, %v1346_v49 }
 0x200   : > { %v1109_v23 = vpop.f32.mrf.mxu1 }
 0x201   : > { %v1310_v38 = vpop.f32.mrf.mxu2  ;;  %v1110_v24 = vadd.f32 %v1109_v23, %v966_v37  ;;  %v1817_v23 = vld [vmem:[#allocation2 + $0x92] sm:$0xff] }
 0x202   : > { %v976_v55 = vpop.f32.mrf.mxu0  ;;  %v1536_v59 = vpop.f32.mrf.mxu3 }
 0x203   : > { %4249 = vmatmul.msk.bf16.gmra.mxu1 %vm653_vm2, %v5565_v19  ;;  %v1347_v54 = vadd.f32 %v1303_v39, %v1110_v24  ;;  %v1818_v39 = vld [vmem:[#allocation2 + $0x9a] sm:$0xff] }
 0x205   : > { %v5569_v60 = vadd.f32 %v1529_v17, %v1347_v54  ;;  %4232 = vmatmul.msk.bf16.gmra.mxu0 %vm653_vm2, %v5323_v42  ;;  %v5578_v17 = vpack.c.bf16 %v1818_v39, %v1817_v23  ;;  %v2274_v54 = vld [vmem:[#allocation2 + $0xd9] sm:$0xff]  ;;  %v1819_v39 = vld [vmem:[#allocation2 + $0xaa] sm:$0xff] }
 0x206   : > { %4270 = vmatmul.msk.bf16.gmra.mxu2 %vm653_vm2, %v5289_v8 }
 0x207   : > { %6473 = vst [vmem:[#allocation27_spill] sm:$0xff] %v5569_v60  ;;  %4291 = vmatmul.msk.bf16.gmra.mxu3 %vm653_vm2, %v2298_v33  ;;  %v2275_v60 = vld [vmem:[#allocation2 + $0xe1] sm:$0xff] }
 0x208   : > { %v1111_v3 = vpop.f32.mrf.mxu1 }
 0x209   : > { %v1313_v6 = vpop.f32.mrf.mxu2  ;;  %v1112_v37 = vadd.f32 %v1111_v3, %v968_v18  ;;  %v2299_v18 = vpack.c.bf16 %v2275_v60, %v2274_v54 }
 0x20a   : > { %v978_v49 = vpop.f32.mrf.mxu0  ;;  %v1539_v22 = vpop.f32.mrf.mxu3 }
 0x20b   : > { %v1348_v52 = vadd.f32 %v1305_v16, %v1112_v37 }
 0x20d   : > { %v5576_v24 = vadd.f32 %v1531_v29, %v1348_v52 }
 0x210   : > { %v1114_v58 = vpop.f32.mrf.mxu1 }
 0x211   : > { %v1315_v4 = vpop.f32.mrf.mxu2  ;;  %v1115_v42 = vadd.f32 %v1114_v58, %v971_v51  ;;  %v1820_v58 = vld [vmem:[#allocation2 + $0xb2] sm:$0xff] }
 0x212   : > { %v1695_v8 = vpop.f32.mrf.mxu0  ;;  %v1541_v16 = vpop.f32.mrf.mxu3 }
 0x213   : > { %4250 = vmatmul.msk.bf16.gmra.mxu1 %vm653_vm2, %v5578_v17  ;;  %v1349_v33 = vadd.f32 %v1308_v21, %v1115_v42 }
 0x215   : > { %v5582_v3 = vadd.f32 %v1534_v11, %v1349_v33  ;;  %4233 = vmatmul.msk.bf16.gmra.mxu0 %vm653_vm2, %v5344_v2  ;;  %v5591_v11 = vpack.c.bf16 %v1820_v58, %v1819_v39  ;;  %v2276_v33 = vld [vmem:[#allocation2 + $0xf1] sm:$0xff]  ;;  %v1821_v58 = vld [vmem:[#allocation2 + $0xc2] sm:$0xff] }
 0x216   : > { %4271 = vmatmul.msk.bf16.gmra.mxu2 %vm653_vm2, %v5308_v28  ;;  %v2277_v28 = vld [vmem:[#allocation2 + $0xf9] sm:$0xff] }
 0x217   : > { %6474 = vst [vmem:[#allocation28_spill] sm:$0xff] %v5582_v3  ;;  %4292 = vmatmul.msk.bf16.gmra.mxu3 %vm653_vm2, %v2299_v18 }
 0x218   : > { %v1116_v29 = vpop.f32.mrf.mxu1 }
 0x219   : > { %v1318_v37 = vpop.f32.mrf.mxu2  ;;  %v1117_v51 = vadd.f32 %v1116_v29, %v973_v61 }
 0x21a   : > { %v1697_v52 = vpop.f32.mrf.mxu0  ;;  %v1544_v60 = vpop.f32.mrf.mxu3 }
 0x21b   : > { %v1350_v23 = vadd.f32 %v1310_v38, %v1117_v51  ;;  %v2300_v38 = vpack.c.bf16 %v2277_v28, %v2276_v33 }
 0x21d   : > { %v5589_v21 = vadd.f32 %v1536_v59, %v1350_v23 }
 0x220   : > { %v1119_v42 = vpop.f32.mrf.mxu1 }
 0x221   : > { %v1320_v2 = vpop.f32.mrf.mxu2  ;;  %v1120_v54 = vadd.f32 %v1119_v42, %v976_v55  ;;  %v1822_v42 = vld [vmem:[#allocation2 + $0xca] sm:$0xff] }
 0x222   : > { %v1700_v3 = vpop.f32.mrf.mxu0 }
 0x223   : > { %4251 = vmatmul.msk.bf16.gmra.mxu1 %vm653_vm2, %v5591_v11  ;;  %v1351_v18 = vadd.f32 %v1313_v6, %v1120_v54  ;;  %v5596_v61 = vadd.f32 %v1700_v3, %v5400_v35  ;;  %v1546_v6 = vpop.f32.mrf.mxu3  ;;  %v5611_v54 = vpack.c.bf16 %v1822_v42, %v1821_v58 }
 0x225   : > { %v5598_v29 = vadd.f32 %v1539_v22, %v1351_v18  ;;  %4234 = vmatmul.msk.bf16.gmra.mxu0 %vm653_vm2, %v5367_v36  ;;  %v2279_v18 = vld [vmem:[#allocation2 + $0x111] sm:$0xff] }
 0x226   : > { %4272 = vmatmul.msk.bf16.gmra.mxu2 %vm653_vm2, %v5327_v48 }
 0x227   : > { %4293 = vmatmul.msk.bf16.gmra.mxu3 %vm653_vm2, %v2300_v38 }
 0x228   : > { %v1121_v55 = vpop.f32.mrf.mxu1 }
 0x229   : > { %v1469_v59 = vpop.f32.mrf.mxu2  ;;  %v1122_v51 = vadd.f32 %v1121_v55, %v978_v49 }
 0x22a   : > { %v1549_v23 = vadd.f32 %v1469_v59, %v5373_v46  ;;  %v1702_v39 = vpop.f32.mrf.mxu0  ;;  %v2278_v46 = vld [vmem:[#allocation2 + $0x109] sm:$0xff] }
 0x22b   : > { %v1352_v35 = vadd.f32 %v1315_v4, %v1122_v51  ;;  %v5607_v3 = vadd.f32 %v1702_v39, %v5414_v0  ;;  %v2301_v55 = vpack.c.bf16 %v2279_v18, %v2278_v46  ;;  %v6476_v46 = vld [vmem:[#allocation19_spill] sm:$0xff] }
 0x22c   : > { %v1775_v22 = vadd.f32 %v1695_v8, %v1549_v23  ;;  %v2374_v8 = vpop.f32.mrf.mxu3 }
 0x22d   : > { %v5609_v36 = vadd.f32 %v1541_v16, %v1352_v35 }
 0x230   : > { %v1124_v48 = vpop.f32.mrf.mxu1 }
 0x231   : > { %v1471_v33 = vpop.f32.mrf.mxu2  ;;  %v1125_v28 = vadd.f32 %v1124_v48, %v5342_v1  ;;  %v2280_v48 = vld [vmem:[#allocation2 + $0x121] sm:$0xff] }
 0x232   : > { %v1550_v49 = vadd.f32 %v1471_v33, %v5388_v62  ;;  %v1705_v38 = vpop.f32.mrf.mxu0  ;;  %v2281_v33 = vld [vmem:[#allocation2 + $0x129] sm:$0xff] }
 0x233   : > { %4252 = vmatmul.msk.bf16.gmra.mxu1 %vm653_vm2, %v5611_v54  ;;  %v1353_v0 = vadd.f32 %v1318_v37, %v1125_v28  ;;  %v5618_v4 = vadd.f32 %v1705_v38, %v5425_v40 }
 0x234   : > { %v1776_v16 = vadd.f32 %v1697_v52, %v1550_v49  ;;  %v1823_v52 = vld [vmem:[#allocation2 + $0xda] sm:$0xff]  ;;  %v2376_v35 = vpop.f32.mrf.mxu3 }
 0x235   : > { %v5620_v59 = vadd.f32 %v1544_v60, %v1353_v0  ;;  %4235 = vmatmul.msk.bf16.gmra.mxu0 %vm653_vm2, %v5394_v25  ;;  %v1824_v60 = vld [vmem:[#allocation2 + $0xe2] sm:$0xff] }
 0x236   : > { %4273 = vmatmul.msk.bf16.gmra.mxu2 %vm653_vm2, %v5348_v10  ;;  %v5633_v25 = vpack.c.bf16 %v1824_v60, %v1823_v52 }
 0x237   : > { %4294 = vmatmul.msk.bf16.gmra.mxu3 %vm653_vm2, %v2301_v55 }
 0x238   : > { %v1126_v1 = vpop.f32.mrf.mxu1 }
 0x239   : > { %v2148_v62 = vpop.f32.mrf.mxu2  ;;  %v1127_v37 = vadd.f32 %v1126_v1, %v5353_v12 }
 0x23a   : > { %v1707_v51 = vpop.f32.mrf.mxu0 }
 0x23b   : > { %v1354_v40 = vadd.f32 %v1320_v2, %v1127_v37  ;;  %v5629_v23 = vadd.f32 %v1707_v51, %v5435_v56  ;;  %v2302_v56 = vpack.c.bf16 %v2281_v33, %v2280_v48  ;;  %v1825_v37 = vld [vmem:[#allocation2 + $0xf2] sm:$0xff]  ;;  %v2283_v48 = vld [vmem:[#allocation2 + $0x141] sm:$0xff] }
 0x23d   : > { %v5631_v39 = vadd.f32 %v1546_v6, %v1354_v40  ;;  %v6475_v6 = vld [vmem:[#allocation20_spill] sm:$0xff] }
 0x240   : > { %v1921_v58 = vpop.f32.mrf.mxu1 }
 0x241   : > { %v2150_v10 = vpop.f32.mrf.mxu2  ;;  %v2001_v42 = vadd.f32 %v1921_v58, %v1775_v22  ;;  %v2379_v22 = vpop.f32.mrf.mxu3 }
 0x242   : > { %v1710_v28 = vpop.f32.mrf.mxu0 }
 0x243   : > { %v2228_v49 = vadd.f32 %v2148_v62, %v2001_v42  ;;  %4253 = vmatmul.msk.bf16.gmra.mxu1 %vm653_vm2, %v5633_v25  ;;  %v5638_v12 = vadd.f32 %v1710_v28, %v5443_v43  ;;  %v6477_v62 = vld [vmem:[#allocation22_spill] sm:$0xff]  ;;  %v2282_v42 = vld [vmem:[#allocation2 + $0x139] sm:$0xff] }
 0x245   : > { %v5640_v2 = vadd.f32 %v2374_v8, %v2228_v49  ;;  %4236 = vmatmul.msk.bf16.gmra.mxu0 %vm653_vm2, %v6475_v6  ;;  %v1826_v8 = vld [vmem:[#allocation2 + $0xfa] sm:$0xff]  ;;  %v2303_v49 = vpack.c.bf16 %v2283_v48, %v2282_v42 }
 0x246   : > { %4274 = vmatmul.msk.bf16.gmra.mxu2 %vm653_vm2, %v6476_v46  ;;  %v5652_v40 = vpack.c.bf16 %v1826_v8, %v1825_v37 }
 0x247   : > { %4295 = vmatmul.msk.bf16.gmra.mxu3 %vm653_vm2, %v2302_v56  ;;  %v6478_v56 = vld [vmem:[#allocation21_spill] sm:$0xff] }
 0x248   : > { %v1923_v18 = vpop.f32.mrf.mxu1 }
 0x249   : > { %v2153_v38 = vpop.f32.mrf.mxu2  ;;  %v2002_v0 = vadd.f32 %v1923_v18, %v1776_v16  ;;  %v2381_v28 = vpop.f32.mrf.mxu3 }
 0x24a   : > { %v1712_v55 = vpop.f32.mrf.mxu0 }
 0x24b   : > { %v2229_v1 = vadd.f32 %v2150_v10, %v2002_v0  ;;  %v5648_v43 = vadd.f32 %v1712_v55, %v6477_v62  ;;  %v1827_v0 = vld [vmem:[#allocation2 + $0x10a] sm:$0xff] }
 0x24d   : > { %v5650_v51 = vadd.f32 %v2376_v35, %v2229_v1 }
 0x250   : > { %v1926_v52 = vpop.f32.mrf.mxu1 }
 0x251   : > { %v2155_v60 = vpop.f32.mrf.mxu2  ;;  %v2003_v58 = vadd.f32 %v1926_v52, %v5596_v61  ;;  %v2384_v55 = vpop.f32.mrf.mxu3 }
 0x252   : > { %v1715_v33 = vpop.f32.mrf.mxu0 }
 0x253   : > { %v2230_v16 = vadd.f32 %v2153_v38, %v2003_v58  ;;  %4254 = vmatmul.msk.bf16.gmra.mxu1 %vm653_vm2, %v5652_v40  ;;  %v5658_v10 = vadd.f32 %v1715_v33, %v5462_v5 }
 0x255   : > { %v5660_v35 = vadd.f32 %v2379_v22, %v2230_v16  ;;  %4237 = vmatmul.msk.bf16.gmra.mxu0 %vm653_vm2, %v6478_v56  ;;  %v1828_v22 = vld [vmem:[#allocation2 + $0x112] sm:$0xff]  ;;  %v1830_v16 = vld [vmem:[#allocation2 + $0x12a] sm:$0xff] }
 0x256   : > { %4275 = vmatmul.msk.bf16.gmra.mxu2 %vm653_vm2, %v5398_v32  ;;  %v5673_v62 = vpack.c.bf16 %v1828_v22, %v1827_v0 }
 0x257   : > { %4296 = vmatmul.msk.bf16.gmra.mxu3 %vm653_vm2, %v2303_v49 }
 0x258   : > { %v1928_v61 = vpop.f32.mrf.mxu1 }
 0x259   : > { %v2004_v6 = vadd.f32 %v1928_v61, %v5607_v3  ;;  %v2158_v18 = vpop.f32.mrf.mxu2  ;;  %v2386_v58 = vpop.f32.mrf.mxu3  ;;  %v1609_v61 = vld [vmem:[#allocation2 + $0x169] sm:$0xff] }
 0x25a   : > { %v1717_v46 = vpop.f32.mrf.mxu0 }
 0x25b   : > { %v2231_v38 = vadd.f32 %v2155_v60, %v2004_v6  ;;  %v5669_v5 = vadd.f32 %v1717_v46, %v5474_v50  ;;  %v1610_v6 = vld [vmem:[#allocation2 + $0x171] sm:$0xff] }
 0x25d   : > { %v5671_v1 = vadd.f32 %v2381_v28, %v2231_v38  ;;  %v1829_v28 = vld [vmem:[#allocation2 + $0x122] sm:$0xff]  ;;  %v1627_v38 = vpack.c.bf16 %v1610_v6, %v1609_v61  ;;  %v1833_v61 = vld [vmem:[#allocation2 + $0x152] sm:$0xff]  ;;  %v1834_v6 = vld [vmem:[#allocation2 + $0x15a] sm:$0xff] }
 0x260   : > { %v1931_v37 = vpop.f32.mrf.mxu1 }
 0x261   : > { %v2005_v32 = vadd.f32 %v1931_v37, %v5618_v4  ;;  %v2160_v50 = vpop.f32.mrf.mxu2 }
 0x262   : > { %v1720_v8 = vpop.f32.mrf.mxu0 }
 0x263   : > { %v2232_v52 = vadd.f32 %v2158_v18, %v2005_v32  ;;  %4255 = vmatmul.msk.bf16.gmra.mxu1 %vm653_vm2, %v5673_v62  ;;  %v5679_v3 = vadd.f32 %v1720_v8, %v5480_v7  ;;  %v2389_v18 = vpop.f32.mrf.mxu3 }
 0x265   : > { %v5681_v60 = vadd.f32 %v2384_v55, %v2232_v52  ;;  %4238 = vmatmul.msk.bf16.gmra.mxu0 %vm653_vm2, %v5452_v20 }
 0x266   : > { %4276 = vmatmul.msk.bf16.gmra.mxu2 %vm653_vm2, %v5423_v9  ;;  %v5695_v9 = vpack.c.bf16 %v1830_v16, %v1829_v28 }
 0x267   : > { %4297 = vmatmul.msk.bf16.gmra.mxu3 %vm653_vm2, %v5452_v20 }
 0x268   : > { %v1933_v42 = vpop.f32.mrf.mxu1 }
 0x269   : > { %v2006_v4 = vadd.f32 %v1933_v42, %v5629_v23  ;;  %v2163_v56 = vpop.f32.mrf.mxu2 }
 0x26a   : > { %v1722_v48 = vpop.f32.mrf.mxu0 }
 0x26b   : > { %v2233_v33 = vadd.f32 %v2160_v50, %v2006_v4  ;;  %v5691_v7 = vadd.f32 %v1722_v48, %v5487_v26  ;;  %v2391_v32 = vpop.f32.mrf.mxu3  ;;  %v1611_v4 = vld [vmem:[#allocation2 + $0x181] sm:$0xff]  ;;  %v1612_v48 = vld [vmem:[#allocation2 + $0x189] sm:$0xff] }
 0x26d   : > { %v5693_v49 = vadd.f32 %v2386_v58, %v2233_v33  ;;  %v1832_v58 = vld [vmem:[#allocation2 + $0x142] sm:$0xff] }
 0x270   : > { %v1936_v46 = vpop.f32.mrf.mxu1 }
 0x271   : > { %v2007_v20 = vadd.f32 %v1936_v46, %v5638_v12  ;;  %v2165_v37 = vpop.f32.mrf.mxu2  ;;  %v5729_v46 = vpack.c.bf16 %v1834_v6, %v1833_v61 }
 0x272   : > { %v1725_v23 = vpop.f32.mrf.mxu0 }
 0x273   : > { %v2234_v0 = vadd.f32 %v2163_v56, %v2007_v20  ;;  %4256 = vmatmul.msk.bf16.gmra.mxu1 %vm653_vm2, %v5695_v9  ;;  %v5701_v26 = vadd.f32 %v1725_v23, %v5491_v30  ;;  %v1831_v30 = vld [vmem:[#allocation2 + $0x13a] sm:$0xff] }
 0x274   : > { %v5715_v33 = vpack.c.bf16 %v1832_v58, %v1831_v30  ;;  %v2291_v20 = vld [vmem:[#allocation2 + $0x1a1] sm:$0xff] }
 0x275   : > { %v5703_v22 = vadd.f32 %v2389_v18, %v2234_v0  ;;  %4239 = vmatmul.msk.bf16.gmra.mxu0 %vm653_vm2, %v1627_v38  ;;  %v2290_v18 = vld [vmem:[#allocation2 + $0x199] sm:$0xff] }
 0x276   : > { %4277 = vmatmul.msk.bf16.gmra.mxu2 %vm653_vm2, %v5441_v44  ;;  %v1628_v44 = vpack.c.bf16 %v1612_v48, %v1611_v4  ;;  %v2307_v23 = vpack.c.bf16 %v2291_v20, %v2290_v18  ;;  %v6480_v0 = vld [vmem:[#allocation24_spill] sm:$0xff]  ;;  %v1838_v48 = vld [vmem:[#allocation2 + $0x18a] sm:$0xff] }
 0x277   : > { %4298 = vmatmul.msk.bf16.gmra.mxu3 %vm653_vm2, %v1627_v38  ;;  %v1837_v4 = vld [vmem:[#allocation2 + $0x182] sm:$0xff]  ;;  %v6485_v20 = vld [vmem:[#allocation26_spill] sm:$0xff] }
 0x278   : > { %v1938_v55 = vpop.f32.mrf.mxu1 }
 0x279   : > { %v2008_v12 = vadd.f32 %v1938_v55, %v5648_v43 }
 0x27a   : > { %v1727_v8 = vpop.f32.mrf.mxu0 }
 0x27b   : > { %v2235_v52 = vadd.f32 %v2165_v37, %v2008_v12  ;;  %v5711_v50 = vadd.f32 %v1727_v8, %v5499_v41  ;;  %v6479_v41 = vld [vmem:[#allocation23_spill] sm:$0xff]  ;;  %v1835_v37 = vld [vmem:[#allocation2 + $0x16a] sm:$0xff]  ;;  %v2065_v8 = vld [vmem:[#allocation2 + $0x1a0] sm:$0xff] }
 0x27c   : > { %v1836_v12 = vld [vmem:[#allocation2 + $0x172] sm:$0xff] }
 0x27d   : > { %v5713_v42 = vadd.f32 %v2391_v32, %v2235_v52  ;;  %v2064_v32 = vld [vmem:[#allocation2 + $0x198] sm:$0xff]  ;;  %v5744_v52 = vpack.c.bf16 %v1836_v12, %v1835_v37  ;;  %v5779_v37 = vpop.f32.mrf.mxu2 }
 0x27e   : > { %v6488_v12 = vld [vmem:[#allocation27_spill] sm:$0xff] }
 0x282   : > { %v1730_v28 = vpop.f32.mrf.mxu0 }
 0x283   : > { %4257 = vmatmul.msk.bf16.gmra.mxu1 %vm653_vm2, %v5715_v33  ;;  %v5720_v43 = vadd.f32 %v1730_v28, %v5503_v57  ;;  %v4463_v28 = vld [vmem:[#allocation9 + $0x8] sm:$0xff] }
 0x284   : > { %3104 = vmatpush.bf16.msrb.mxu2 %v4463_v28 }
 0x285   : > { %4240 = vmatmul.msk.bf16.gmra.mxu0 %vm653_vm2, %v1628_v44 }
 0x286   : > { %4278 = vmatmul.msk.bf16.gmra.mxu2 %vm653_vm2, %v6479_v41 }
 0x287   : > { %4299 = vmatmul.msk.bf16.gmra.mxu3 %vm653_vm2, %v1628_v44  ;;  %v5757_v44 = vpack.c.bf16 %v1838_v48, %v1837_v4 }
 0x28a   : > { %v1732_v16 = vpop.f32.mrf.mxu0 }
 0x28b   : > { %v5727_v56 = vadd.f32 %v1732_v16, %v5511_v15 }
 0x292   : > { %v1735_v38 = vpop.f32.mrf.mxu0 }
 0x293   : > { %4258 = vmatmul.msk.bf16.gmra.mxu1 %vm653_vm2, %v5729_v46  ;;  %v5734_v57 = vadd.f32 %v1735_v38, %v5514_v27  ;;  %v2081_v27 = vpack.c.bf16 %v2065_v8, %v2064_v32 }
 0x295   : > { %4305 = vmatmul.msk.bf16.vlgmr.msra.gmra.mxu0 %vm653_vm2, %v5524_v31 }
 0x296   : > { %4279 = vmatmul.msk.bf16.gmra.mxu2 %vm653_vm2, %v6480_v0 }
 0x297   : > { %4300 = vmatmul.msk.bf16.gmra.mxu3 %vm653_vm2, %v2307_v23 }
 0x29a   : > { %v1737_v15 = vpop.f32.mrf.mxu0 }
 0x29b   : > { %v5742_v55 = vadd.f32 %v1737_v15, %v5522_v14  ;;  %v5777_v15 = vpop.f32.mrf.mxu1 }
 0x2a2   : > { %v1740_v30 = vpop.f32.mrf.mxu0 }
 0x2a3   : > { %4259 = vmatmul.msk.bf16.gmra.mxu1 %vm653_vm2, %v5744_v52  ;;  %v5749_v31 = vadd.f32 %v1740_v30, %v5528_v34  ;;  %v6482_v34 = vld [vmem:[#allocation25_spill] sm:$0xff]  ;;  %v5786_v8 = vpop.f32.mrf.mxu1  ;;  %v6491_v30 = vld [vmem:[#allocation28_spill] sm:$0xff] }
 0x2a5   : > { %4306 = vmatmul.msk.bf16.gmra.mxu0 %vm653_vm2, %v5538_v45  ;;  %v4467_v45 = vld [vmem:[#allocation9 + $0x28] sm:$0xff] }
 0x2a6   : > { %4280 = vmatmul.msk.bf16.gmra.mxu2 %vm653_vm2, %v2081_v27  ;;  %3182 = vmatpush.bf16.msra.mxu3 %v4467_v45  ;;  %v5791_v27 = vpop.f32.mrf.mxu2 }
 0x2aa   : > { %v1742_v14 = vpop.f32.mrf.mxu0 }
 0x2ab   : > { %v5755_v58 = vadd.f32 %v1742_v14, %v5536_v53  ;;  %v4465_v53 = vld [vmem:[#allocation9 + $0x18] sm:$0xff]  ;;  %v5796_v4 = vpop.f32.mrf.mxu1 }
 0x2ac   : > { %3051 = vmatpush.bf16.msrb.mxu1 %v4465_v53 }
 0x2ad   : > { %6481 = vst [vmem:[#allocation20_spill] sm:$0xff] %v5755_v58 }
 0x2ae   : > { %v5800_v48 = vpop.f32.mrf.mxu2 }
 0x2b2   : > { %v1745_v41 = vpop.f32.mrf.mxu0 }
 0x2b3   : > { %4260 = vmatmul.msk.bf16.gmra.mxu1 %vm653_vm2, %v5757_v44  ;;  %v5762_v16 = vadd.f32 %v1745_v41, %v6482_v34  ;;  %v5805_v41 = vpop.f32.mrf.mxu1 }
 0x2b5   : > { %6483 = vst [vmem:[#allocation19_spill] sm:$0xff] %v5762_v16  ;;  %4307 = vmatmul.msk.bf16.gmra.mxu0 %vm653_vm2, %v5552_v63 }
 0x2ba   : > { %v1747_v61 = vpop.f32.mrf.mxu0 }
 0x2bb   : > { %v5767_v6 = vadd.f32 %v1747_v61, %v5550_v13  ;;  %v5814_v53 = vpop.f32.mrf.mxu1 }
 0x2bd   : > { %6484 = vst [vmem:[#allocation22_spill] sm:$0xff] %v5767_v6 }
 0x2c2   : > { %v1750_v18 = vpop.f32.mrf.mxu0 }
 0x2c3   : > { %v5770_v38 = vadd.f32 %v1750_v18, %v6485_v20  ;;  %v5821_v20 = vpop.f32.mrf.mxu3 }
 0x2c5   : > { %6486 = vst [vmem:[#allocation21_spill] sm:$0xff] %v5770_v38  ;;  %4308 = vmatmul.msk.bf16.gmra.mxu0 %vm653_vm2, %v5565_v19 }
 0x2ca   : > { %v1752_v23 = vpop.f32.mrf.mxu0 }
 0x2cb   : > { %v5775_v0 = vadd.f32 %v1752_v23, %v5563_v47  ;;  %v5823_v23 = vpop.f32.mrf.mxu1 }
 0x2cd   : > { %6487 = vst [vmem:[#allocation23_spill] sm:$0xff] %v5775_v0 }
 0x2d2   : > { %v1755_v63 = vpop.f32.mrf.mxu0 }
 0x2d3   : > { %v5782_v32 = vadd.f32 %v1755_v63, %v6488_v12 }
 0x2d5   : > { %6489 = vst [vmem:[#allocation24_spill] sm:$0xff] %v5782_v32  ;;  %4309 = vmatmul.msk.bf16.gmra.mxu0 %vm653_vm2, %v5578_v17 }
 0x2da   : > { %v1757_v13 = vpop.f32.mrf.mxu0 }
 0x2db   : > { %v5789_v19 = vadd.f32 %v1757_v13, %v5576_v24  ;;  %v5807_v24 = vpop.f32.mrf.mxu2  ;;  %v5835_v13 = vpop.f32.mrf.mxu3 }
 0x2dd   : > { %6490 = vst [vmem:[#allocation25_spill] sm:$0xff] %v5789_v19 }
 0x2e2   : > { %v1760_v47 = vpop.f32.mrf.mxu0 }
 0x2e3   : > { %v5794_v14 = vadd.f32 %v1760_v47, %v6491_v30  ;;  %v5816_v61 = vpop.f32.mrf.mxu2 }
 0x2e5   : > { %6492 = vst [vmem:[#allocation26_spill] sm:$0xff] %v5794_v14  ;;  %4310 = vmatmul.msk.bf16.gmra.mxu0 %vm653_vm2, %v5591_v11 }
 0x2ea   : > { %v1762_v17 = vpop.f32.mrf.mxu0 }
 0x2eb   : > { %v5803_v28 = vadd.f32 %v1762_v17, %v5589_v21 }
 0x2ed   : > { %6493 = vst [vmem:[#allocation27_spill] sm:$0xff] %v5803_v28 }
 0x2f2   : > { %v1765_v34 = vpop.f32.mrf.mxu0 }
 0x2f3   : > { %v5810_v45 = vadd.f32 %v1765_v34, %v5598_v29  ;;  %v5828_v29 = vpop.f32.mrf.mxu2  ;;  %v5856_v34 = vld [vmem:[%s6427_s5] ss:$0 sm:$0xff] }
 0x2f5   : > { %6494 = vst [vmem:[#allocation28_spill] sm:$0xff] %v5810_v45  ;;  %4311 = vmatmul.msk.bf16.gmra.mxu0 %vm653_vm2, %v5611_v54  ;;  %v4462_v45 = vld [vmem:[#allocation9] sm:$0xff] }
 0x2f6   : > { %3105 = vmatpush.bf16.msrb.mxu2 %v4462_v45 }
 0x2fa   : > { %v1767_v11 = vpop.f32.mrf.mxu0 }
 0x2fb   : > { %v5819_v18 = vadd.f32 %v1767_v11, %v5609_v36  ;;  %v5837_v36 = vpop.f32.mrf.mxu1  ;;  %v5839_v47 = vpop.f32.mrf.mxu2 }
 0x2fc   : > { %v5860_v11 = vpop.f32.mrf.mxu3 }
 0x2fd   : > { %6495 = vst [vmem:[#allocation29_spill] sm:$0xff] %v5819_v18  ;;  %v4464_v18 = vld [vmem:[#allocation9 + $0x10] sm:$0xff] }
 0x2fe   : > { %3052 = vmatpush.bf16.msrb.mxu1 %v4464_v18 }
 0x302   : > { %v1770_v21 = vpop.f32.mrf.mxu0 }
 0x303   : > { %v5826_v63 = vadd.f32 %v1770_v21, %v5620_v59  ;;  %v5844_v59 = vld [vmem:[%s6430_s8] ss:$0 sm:$0xff]  ;;  %v5862_v21 = vpop.f32.mrf.mxu1 }
 0x304   : > { %v5872_v14 = vpop.f32.mrf.mxu3 }
 0x305   : > { %6496 = vst [vmem:[#allocation30_spill] sm:$0xff] %v5826_v63  ;;  %4312 = vmatmul.msk.bf16.gmra.mxu0 %vm653_vm2, %v5633_v25  ;;  %v5850_v25 = vld [vmem:[%s6431_s9] ss:$0 sm:$0xff] }
 0x30a   : > { %v1772_v54 = vpop.f32.mrf.mxu0 }
 0x30b   : > { %v5833_v12 = vadd.f32 %v1772_v54, %v5631_v39  ;;  %v5865_v54 = vpop.f32.mrf.mxu2  ;;  %v5874_v19 = vpop.f32.mrf.mxu1 }
 0x30d   : > { %6497 = vst [vmem:[#allocation31_spill] sm:$0xff] %v5833_v12 }
 0x312   : > { %v2600_v30 = vpop.f32.mrf.mxu0 }
 0x313   : > { %v2680_v17 = vadd.f32 %v2600_v30, %v5640_v2  ;;  %v5888_v32 = vpop.f32.mrf.mxu1 }
 0x315   : > { %v2716_v39 = vmul.f32 %v5844_v59, %v2680_v17  ;;  %4313 = vmatmul.msk.bf16.gmra.mxu0 %vm653_vm2, %v5652_v40  ;;  %v4466_v40 = vld [vmem:[#allocation9 + $0x20] sm:$0xff] }
 0x316   : > { %3183 = vmatpush.bf16.msra.mxu3 %v4466_v40  ;;  %v5886_v40 = vpop.f32.mrf.mxu3 }
 0x317   : > { %v2752_v2 = vadd.f32 %v5850_v25, %v2716_v39 }
 0x319   : > { %vm2784_vm4 = vcmp.gt.f32.partialorder %v2752_v2, 0.0  ;;  %v2820_v30 = vmul.f32 %v5856_v34, %v2752_v2 }
 0x31a   : > { %v2602_v17 = vpop.f32.mrf.mxu0 }
 0x31b   : > { %v2852_v12 = vsel %vm2784_vm4, %v2752_v2, %v2820_v30  ;;  %v2681_v63 = vadd.f32 %v2602_v17, %v5650_v51  ;;  %v5877_v30 = vpop.f32.mrf.mxu2 }
 0x31c   : > { %2941 = vst.msk [vmem:[#allocation3 + $0x19] sm:$0xff] %vm2884_vm0, %v2852_v12 }
 0x31d   : > { %v2717_v28 = vmul.f32 %v5844_v59, %v2681_v63 }
 0x31f   : > { %v2753_v39 = vadd.f32 %v5850_v25, %v2717_v28 }
 0x321   : > { %vm2785_vm5 = vcmp.gt.f32.partialorder %v2753_v39, 0.0  ;;  %v2821_v2 = vmul.f32 %v5856_v34, %v2753_v39 }
 0x322   : > { %v2605_v51 = vpop.f32.mrf.mxu0 }
 0x323   : > { %v2853_v12 = vsel %vm2785_vm5, %v2753_v39, %v2821_v2  ;;  %v2682_v17 = vadd.f32 %v2605_v51, %v5660_v35  ;;  %v5892_v2 = vpop.f32.mrf.mxu2 }
 0x324   : > { %2942 = vst.msk [vmem:[#allocation3 + $0x21] sm:$0xff] %vm2884_vm0, %v2853_v12 }
 0x325   : > { %v2718_v45 = vmul.f32 %v5844_v59, %v2682_v17  ;;  %4314 = vmatmul.msk.bf16.gmra.mxu0 %vm653_vm2, %v5673_v62 }
 0x327   : > { %v2754_v28 = vadd.f32 %v5850_v25, %v2718_v45 }
 0x329   : > { %vm2786_vm6 = vcmp.gt.f32.partialorder %v2754_v28, 0.0  ;;  %v2822_v18 = vmul.f32 %v5856_v34, %v2754_v28 }
 0x32a   : > { %v2607_v63 = vpop.f32.mrf.mxu0 }
 0x32b   : > { %v2854_v39 = vsel %vm2786_vm6, %v2754_v28, %v2822_v18  ;;  %v2683_v35 = vadd.f32 %v2607_v63, %v5671_v1  ;;  %v5899_v28 = vpop.f32.mrf.mxu3  ;;  %v5901_v1 = vpop.f32.mrf.mxu1 }
 0x32c   : > { %2943 = vst.msk [vmem:[#allocation3 + $0x31] sm:$0xff] %vm2884_vm0, %v2854_v39  ;;  %v5906_v63 = vpop.f32.mrf.mxu2 }
 0x32d   : > { %v2719_v51 = vmul.f32 %v5844_v59, %v2683_v35  ;;  %6498 = vst [vmem:[#allocation32_spill] sm:$0xff] %v5901_v1  ;;  %v2997_v35 = vld [vmem:[#allocation3 + $0x1] ss:$2 sm:$0xff] }
 0x32e   : > { %6499 = vst [vmem:[#allocation33_spill] sm:$0xff] %v5906_v63 }
 0x32f   : > { %v2755_v62 = vadd.f32 %v5850_v25, %v2719_v51 }
 0x331   : > { %vm2787_vm7 = vcmp.gt.f32.partialorder %v2755_v62, 0.0  ;;  %v2823_v12 = vmul.f32 %v5856_v34, %v2755_v62 }
 0x332   : > { %v2610_v17 = vpop.f32.mrf.mxu0 }
 0x333   : > { %v2855_v45 = vsel %vm2787_vm7, %v2755_v62, %v2823_v12  ;;  %v2684_v0 = vadd.f32 %v2610_v17, %v5681_v60  ;;  %v2973_v60 = vld [vmem:[#allocation3] ss:$2 sm:$0xff]  ;;  %v5915_v63 = vpop.f32.mrf.mxu3  ;;  %v5917_v1 = vpop.f32.mrf.mxu1 }
 0x334   : > { %2944 = vst.msk [vmem:[#allocation3 + $0x39] sm:$0xff] %vm2884_vm0, %v2855_v45  ;;  %v3128_v62 = vld [vmem:[#allocation3 + $0x2] ss:$2 sm:$0xff] }
 0x335   : > { %v2720_v18 = vmul.f32 %v5844_v59, %v2684_v0  ;;  %4315 = vmatmul.msk.bf16.gmra.mxu0 %vm653_vm2, %v5695_v9 }
 0x337   : > { %v2756_v39 = vadd.f32 %v5850_v25, %v2720_v18 }
 0x339   : > { %vm2788_vm8 = vcmp.gt.f32.partialorder %v2756_v39, 0.0  ;;  %v2824_v51 = vmul.f32 %v5856_v34, %v2756_v39 }
 0x33a   : > { %v2612_v12 = vpop.f32.mrf.mxu0 }
 0x33b   : > { %v2856_v17 = vsel %vm2788_vm8, %v2756_v39, %v2824_v51  ;;  %v2685_v45 = vadd.f32 %v2612_v12, %v5693_v49  ;;  %v2999_v38 = vld [vmem:[#allocation3 + $0x31] ss:$2 sm:$0xff]  ;;  %v2975_v6 = vld [vmem:[#allocation3 + $0x30] ss:$2 sm:$0xff]  ;;  %v5921_v39 = vpop.f32.mrf.mxu2  ;;  %v5934_v12 = vpop.f32.mrf.mxu1 }
 0x33c   : > { %v3130_v0 = vld [vmem:[#allocation3 + $0x32] ss:$2 sm:$0xff]  ;;  %2945 = vst.msk [vmem:[#allocation3 + $0x49] sm:$0xff] %vm2884_vm0, %v2856_v17  ;;  %v3012_v9 = vpack.c.bf16 %v2999_v38, %v2997_v35  ;;  %v2988_v16 = vpack.c.bf16 %v2975_v6, %v2973_v60 }
 0x33d   : > { %v3143_v58 = vpack.c.bf16 %v3130_v0, %v3128_v62  ;;  %v2721_v18 = vmul.f32 %v5844_v59, %v2685_v45  ;;  %v5932_v62 = vpop.f32.mrf.mxu3 }
 0x33e   : > { %4329 = vmatmul.msk.bf16.vlgmr.msrb.gmra.mxu1 %vm2884_vm0, %v3012_v9  ;;  %4341 = vmatmul.msk.bf16.vlgmr.msrb.gmra.mxu2 %vm2884_vm0, %v2988_v16 }
 0x33f   : > { %v2757_v49 = vadd.f32 %v5850_v25, %v2721_v18  ;;  %4353 = vmatmul.msk.bf16.vlgmr.msra.gmra.mxu3 %vm2884_vm0, %v3143_v58  ;;  %v2009_v58 = vadd.f32 %v5777_v15, %v5658_v10 }
 0x341   : > { %vm2789_vm9 = vcmp.gt.f32.partialorder %v2757_v49, 0.0  ;;  %v2825_v6 = vmul.f32 %v5856_v34, %v2757_v49 }
 0x342   : > { %v2615_v38 = vpop.f32.mrf.mxu0 }
 0x343   : > { %v2857_v35 = vsel %vm2789_vm9, %v2757_v49, %v2825_v6  ;;  %v2686_v51 = vadd.f32 %v2615_v38, %v5703_v22  ;;  %v5937_v45 = vpop.f32.mrf.mxu2  ;;  %v2010_v49 = vadd.f32 %v5786_v8, %v5669_v5 }
 0x344   : > { %2946 = vst.msk [vmem:[#allocation3 + $0x51] sm:$0xff] %vm2884_vm0, %v2857_v35 }
 0x345   : > { %v2722_v16 = vmul.f32 %v5844_v59, %v2686_v51  ;;  %4316 = vmatmul.msk.bf16.gmra.mxu0 %vm653_vm2, %v5715_v33  ;;  %v2236_v33 = vadd.f32 %v5779_v37, %v2009_v58  ;;  %v5948_v35 = vpop.f32.mrf.mxu3  ;;  %v2237_v37 = vadd.f32 %v5791_v27, %v2010_v49  ;;  %v2011_v58 = vadd.f32 %v5796_v4, %v5679_v3 }
 0x347   : > { %v2758_v60 = vadd.f32 %v5850_v25, %v2722_v16  ;;  %v2462_v15 = vadd.f32 %v5821_v20, %v2236_v33  ;;  %v2463_v8 = vadd.f32 %v5835_v13, %v2237_v37  ;;  %v2013_v37 = vadd.f32 %v5814_v53, %v5701_v26 }
 0x348   : > { %v2014_v26 = vadd.f32 %v5823_v23, %v5711_v50  ;;  %v2015_v23 = vadd.f32 %v5837_v36, %v5720_v43 }
 0x349   : > { %vm2790_vm10 = vcmp.gt.f32.partialorder %v2758_v60, 0.0  ;;  %v2826_v17 = vmul.f32 %v5856_v34, %v2758_v60 }
 0x34a   : > { %v2617_v22 = vpop.f32.mrf.mxu0  ;;  %v2242_v43 = vadd.f32 %v5839_v47, %v2015_v23 }
 0x34b   : > { %v2858_v0 = vsel %vm2790_vm10, %v2758_v60, %v2826_v17  ;;  %v2687_v9 = vadd.f32 %v2617_v22, %v5713_v42  ;;  %v5950_v42 = vpop.f32.mrf.mxu1  ;;  %v5954_v60 = vpop.f32.mrf.mxu2 }
 0x34c   : > { %2947 = vst.msk [vmem:[#allocation3 + $0x61] sm:$0xff] %vm2884_vm0, %v2858_v0  ;;  %v2468_v47 = vadd.f32 %v5915_v63, %v2242_v43 }
 0x34d   : > { %v2723_v18 = vmul.f32 %v5844_v59, %v2687_v9  ;;  %v2238_v9 = vadd.f32 %v5800_v48, %v2011_v58  ;;  %v5966_v33 = vpop.f32.mrf.mxu3 }
 0x34f   : > { %v2759_v10 = vadd.f32 %v5850_v25, %v2723_v18  ;;  %v2464_v4 = vadd.f32 %v5860_v11, %v2238_v9 }
 0x351   : > { %vm2791_vm11 = vcmp.gt.f32.partialorder %v2759_v10, 0.0  ;;  %v2827_v6 = vmul.f32 %v5856_v34, %v2759_v10 }
 0x352   : > { %v2620_v38 = vpop.f32.mrf.mxu0 }
 0x353   : > { %v2859_v51 = vsel %vm2791_vm11, %v2759_v10, %v2827_v6  ;;  %v2688_v16 = vadd.f32 %v2620_v38, %v2462_v15  ;;  %v5971_v13 = vpop.f32.mrf.mxu2  ;;  %v2012_v10 = vadd.f32 %v5805_v41, %v5691_v7 }
 0x354   : > { %2948 = vst.msk [vmem:[#allocation3 + $0x69] sm:$0xff] %vm2884_vm0, %v2859_v51 }
 0x355   : > { %v2724_v20 = vmul.f32 %v5844_v59, %v2688_v16  ;;  %4317 = vmatmul.msk.bf16.gmra.mxu0 %vm653_vm2, %v5729_v46  ;;  %v5968_v46 = vpop.f32.mrf.mxu1  ;;  %v2239_v38 = vadd.f32 %v5807_v24, %v2012_v10  ;;  %v5983_v16 = vpop.f32.mrf.mxu3 }
 0x357   : > { %v2760_v5 = vadd.f32 %v5850_v25, %v2724_v20  ;;  %v2465_v41 = vadd.f32 %v5872_v14, %v2239_v38 }
 0x359   : > { %vm2792_vm12 = vcmp.gt.f32.partialorder %v2760_v5, 0.0  ;;  %v2828_v17 = vmul.f32 %v5856_v34, %v2760_v5 }
 0x35a   : > { %v2622_v22 = vpop.f32.mrf.mxu0 }
 0x35b   : > { %v2860_v0 = vsel %vm2792_vm12, %v2760_v5, %v2828_v17  ;;  %v2689_v27 = vadd.f32 %v2622_v22, %v2463_v8  ;;  %v5991_v20 = vpop.f32.mrf.mxu2  ;;  %v3132_v38 = vld [vmem:[#allocation3 + $0x62] ss:$2 sm:$0xff] }
 0x35c   : > { %2949 = vst.msk [vmem:[#allocation3 + $0x79] sm:$0xff] %vm2884_vm0, %v2860_v0 }
 0x35d   : > { %v2725_v18 = vmul.f32 %v5844_v59, %v2689_v27  ;;  %v5985_v11 = vpop.f32.mrf.mxu1  ;;  %v6001_v53 = vpop.f32.mrf.mxu3 }
 0x35f   : > { %v2761_v3 = vadd.f32 %v5850_v25, %v2725_v18 }
 0x361   : > { %vm2793_vm13 = vcmp.gt.f32.partialorder %v2761_v3, 0.0  ;;  %v2829_v15 = vmul.f32 %v5856_v34, %v2761_v3 }
 0x362   : > { %v2625_v49 = vpop.f32.mrf.mxu0 }
 0x363   : > { %v2861_v48 = vsel %vm2793_vm13, %v2761_v3, %v2829_v15  ;;  %v2690_v6 = vadd.f32 %v2625_v49, %v2464_v4  ;;  %v6006_v18 = vpop.f32.mrf.mxu2  ;;  %v2241_v4 = vadd.f32 %v5828_v29, %v2014_v26 }
 0x364   : > { %2950 = vst.msk [vmem:[#allocation3 + $0x81] sm:$0xff] %vm2884_vm0, %v2861_v48  ;;  %v3001_v48 = vld [vmem:[#allocation3 + $0x61] ss:$2 sm:$0xff] }
 0x365   : > { %v2726_v51 = vmul.f32 %v5844_v59, %v2690_v6  ;;  %4318 = vmatmul.msk.bf16.gmra.mxu0 %vm653_vm2, %v5744_v52  ;;  %v2240_v52 = vadd.f32 %v5816_v61, %v2013_v37  ;;  %v6003_v0 = vpop.f32.mrf.mxu1  ;;  %v2467_v10 = vadd.f32 %v5899_v28, %v2241_v4  ;;  %v2977_v6 = vld [vmem:[#allocation3 + $0x60] ss:$2 sm:$0xff]  ;;  %v6018_v29 = vpop.f32.mrf.mxu3 }
 0x367   : > { %v2762_v7 = vadd.f32 %v5850_v25, %v2726_v51  ;;  %v2466_v14 = vadd.f32 %v5886_v40, %v2240_v52  ;;  %v2516_v52 = vld [vmem:[#allocation2 + $0x19a] sm:$0xff] }
 0x369   : > { %vm2794_vm14 = vcmp.gt.f32.partialorder %v2762_v7, 0.0  ;;  %v2830_v24 = vmul.f32 %v5856_v34, %v2762_v7 }
 0x36a   : > { %v2627_v5 = vpop.f32.mrf.mxu0 }
 0x36b   : > { %v2862_v8 = vsel %vm2794_vm14, %v2762_v7, %v2830_v24  ;;  %v2691_v58 = vadd.f32 %v2627_v5, %v2465_v41 }
 0x36c   : > { %2951 = vst.msk [vmem:[#allocation3 + $0x91] sm:$0xff] %vm2884_vm0, %v2862_v8  ;;  %v6024_v8 = vpop.f32.mrf.mxu2 }
 0x36d   : > { %v2727_v17 = vmul.f32 %v5844_v59, %v2691_v58  ;;  %v6020_v51 = vpop.f32.mrf.mxu1 }
 0x36f   : > { %v2763_v22 = vadd.f32 %v5850_v25, %v2727_v17  ;;  %v2517_v17 = vld [vmem:[#allocation2 + $0x1a2] sm:$0xff] }
 0x371   : > { %vm2795_vm15 = vcmp.gt.f32.partialorder %v2763_v22, 0.0  ;;  %v2831_v27 = vmul.f32 %v5856_v34, %v2763_v22 }
 0x372   : > { %v2630_v9 = vpop.f32.mrf.mxu0 }
 0x373   : > { %v2863_v61 = vsel %vm2795_vm15, %v2763_v22, %v2831_v27  ;;  %v2692_v3 = vadd.f32 %v2630_v9, %v2466_v14  ;;  %v2016_v14 = vadd.f32 %v5862_v21, %v5727_v56  ;;  %v2533_v27 = vpack.c.bf16 %v2517_v17, %v2516_v52 }
 0x374   : > { %2952 = vst.msk [vmem:[#allocation3 + $0x99] sm:$0xff] %vm2884_vm0, %v2863_v61  ;;  %v6043_v56 = vpop.f32.mrf.mxu2 }
 0x375   : > { %v2728_v40 = vmul.f32 %v5844_v59, %v2692_v3  ;;  %4319 = vmatmul.msk.bf16.gmra.mxu0 %vm653_vm2, %v5757_v44  ;;  %v2243_v4 = vadd.f32 %v5865_v54, %v2016_v14 }
 0x377   : > { %v2764_v50 = vadd.f32 %v5850_v25, %v2728_v40  ;;  %v6037_v40 = vpop.f32.mrf.mxu3  ;;  %v2469_v23 = vadd.f32 %v5932_v62, %v2243_v4 }
 0x379   : > { %vm2796_vm1 = vcmp.gt.f32.partialorder %v2764_v50, 0.0  ;;  %v2832_v15 = vmul.f32 %v5856_v34, %v2764_v50 }
 0x37a   : > { %v2632_v49 = vpop.f32.mrf.mxu0 }
 0x37b   : > { %v2864_v7 = vsel %vm2796_vm1, %v2764_v50, %v2832_v15  ;;  %v2693_v44 = vadd.f32 %v2632_v49, %v2467_v10  ;;  %v3003_v41 = vld [vmem:[#allocation3 + $0x91] ss:$2 sm:$0xff]  ;;  %v2979_v37 = vld [vmem:[#allocation3 + $0x90] ss:$2 sm:$0xff]  ;;  %v6039_v50 = vpop.f32.mrf.mxu1  ;;  %v2017_v10 = vadd.f32 %v5874_v19, %v5734_v57  ;;  %v2018_v19 = vadd.f32 %v5888_v32, %v5742_v55 }
 0x37c   : > { %v3134_v24 = vld [vmem:[#allocation3 + $0x92] ss:$2 sm:$0xff]  ;;  %2953 = vst.msk [vmem:[#allocation3 + $0xa9] sm:$0xff] %vm2884_vm0, %v2864_v7  ;;  %v3013_v36 = vpack.c.bf16 %v3003_v41, %v3001_v48  ;;  %v2989_v28 = vpack.c.bf16 %v2979_v37, %v2977_v6  ;;  %v6061_v41 = vpop.f32.mrf.mxu2 }
 0x37d   : > { %v3144_v5 = vpack.c.bf16 %v3134_v24, %v3132_v38  ;;  %v2729_v58 = vmul.f32 %v5844_v59, %v2693_v44  ;;  %v2244_v6 = vadd.f32 %v5877_v30, %v2017_v10  ;;  %v6500_v55 = vld [vmem:[#allocation32_spill] sm:$0xff] }
 0x37e   : > { %4330 = vmatmul.msk.bf16.gmra.mxu1 %vm2884_vm0, %v3013_v36  ;;  %4342 = vmatmul.msk.bf16.gmra.mxu2 %vm2884_vm0, %v2989_v28  ;;  %v2245_v36 = vadd.f32 %v5892_v2, %v2018_v19  ;;  %v2019_v32 = vadd.f32 %v6500_v55, %v5749_v31 }
 0x37f   : > { %v2765_v22 = vadd.f32 %v5850_v25, %v2729_v58  ;;  %4354 = vmatmul.msk.bf16.gmra.mxu3 %vm2884_vm0, %v3144_v5  ;;  %v6053_v7 = vpop.f32.mrf.mxu3  ;;  %v2470_v57 = vadd.f32 %v5948_v35, %v2244_v6  ;;  %v6503_v6 = vld [vmem:[#allocation19_spill] sm:$0xff] }
 0x380   : > { %v2471_v35 = vadd.f32 %v5966_v33, %v2245_v36 }
 0x381   : > { %vm2797_vm3 = vcmp.gt.f32.partialorder %v2765_v22, 0.0  ;;  %v2833_v26 = vmul.f32 %v5856_v34, %v2765_v22 }
 0x382   : > { %v2635_v9 = vpop.f32.mrf.mxu0 }
 0x383   : > { %v2865_v61 = vsel %vm2797_vm3, %v2765_v22, %v2833_v26  ;;  %v2694_v3 = vadd.f32 %v2635_v9, %v2468_v47  ;;  %v6055_v44 = vpop.f32.mrf.mxu1  ;;  %v6501_v26 = vld [vmem:[#allocation33_spill] sm:$0xff] }
 0x384   : > { %2954 = vst.msk [vmem:[#allocation3 + $0xb1] sm:$0xff] %vm2884_vm0, %v2865_v61  ;;  %v6076_v47 = vpop.f32.mrf.mxu2  ;;  %v6502_v61 = vld [vmem:[#allocation20_spill] sm:$0xff] }
 0x385   : > { %v2730_v63 = vmul.f32 %v5844_v59, %v2694_v3  ;;  %4320 = vmatmul.msk.bf16.gmra.mxu0 %vm653_vm2, %v2533_v27  ;;  %v2246_v27 = vadd.f32 %v6501_v26, %v2019_v32  ;;  %v2020_v3 = vadd.f32 %v5917_v1, %v6502_v61 }
 0x387   : > { %v2766_v21 = vadd.f32 %v5850_v25, %v2730_v63  ;;  %v6071_v58 = vpop.f32.mrf.mxu3  ;;  %v2472_v9 = vadd.f32 %v5983_v16, %v2246_v27 }
 0x389   : > { %vm2798_vm4 = vcmp.gt.f32.partialorder %v2766_v21, 0.0  ;;  %v2834_v54 = vmul.f32 %v5856_v34, %v2766_v21 }
 0x38a   : > { %v2637_v15 = vpop.f32.mrf.mxu0 }
 0x38b   : > { %v2866_v49 = vsel %vm2798_vm4, %v2766_v21, %v2834_v54  ;;  %v2695_v48 = vadd.f32 %v2637_v15, %v2469_v23  ;;  %v6073_v52 = vpop.f32.mrf.mxu1  ;;  %v2247_v15 = vadd.f32 %v5921_v39, %v2020_v3 }
 0x38c   : > { %2955 = vst.msk [vmem:[#allocation3 + $0xc1] sm:$0xff] %vm2884_vm0, %v2866_v49  ;;  %v6092_v49 = vpop.f32.mrf.mxu2 }
 0x38d   : > { %v2731_v38 = vmul.f32 %v5844_v59, %v2695_v48  ;;  %v2473_v48 = vadd.f32 %v6001_v53, %v2247_v15 }
 0x38f   : > { %v2767_v62 = vadd.f32 %v5850_v25, %v2731_v38  ;;  %v6086_v21 = vpop.f32.mrf.mxu3  ;;  %v2021_v38 = vadd.f32 %v5934_v12, %v6503_v6 }
 0x391   : > { %vm2799_vm5 = vcmp.gt.f32.partialorder %v2767_v62, 0.0  ;;  %v2835_v37 = vmul.f32 %v5856_v34, %v2767_v62  ;;  %v2248_v39 = vadd.f32 %v5937_v45, %v2021_v38 }
 0x392   : > { %v2640_v24 = vpop.f32.mrf.mxu0 }
 0x393   : > { %v2867_v30 = vsel %vm2799_vm5, %v2767_v62, %v2835_v37  ;;  %v2696_v43 = vadd.f32 %v2640_v24, %v2470_v57  ;;  %v6088_v23 = vpop.f32.mrf.mxu1  ;;  %v2474_v36 = vadd.f32 %v6018_v29, %v2248_v39  ;;  %v6506_v39 = vld [vmem:[#allocation23_spill] sm:$0xff] }
 0x394   : > { %2956 = vst.msk [vmem:[#allocation3 + $0xc9] sm:$0xff] %vm2884_vm0, %v2867_v30  ;;  %v6107_v53 = vpop.f32.mrf.mxu2 }
 0x395   : > { %v2732_v28 = vmul.f32 %v5844_v59, %v2696_v43 }
 0x397   : > { %v2768_v5 = vadd.f32 %v5850_v25, %v2732_v28  ;;  %v6102_v24 = vpop.f32.mrf.mxu3  ;;  %v6504_v28 = vld [vmem:[#allocation22_spill] sm:$0xff] }
 0x399   : > { %vm2800_vm6 = vcmp.gt.f32.partialorder %v2768_v5, 0.0  ;;  %v2836_v17 = vmul.f32 %v5856_v34, %v2768_v5 }
 0x39a   : > { %v2642_v22 = vpop.f32.mrf.mxu0 }
 0x39b   : > { %v2868_v2 = vsel %vm2800_vm6, %v2768_v5, %v2836_v17  ;;  %v2697_v14 = vadd.f32 %v2642_v22, %v2471_v35  ;;  %v6104_v30 = vpop.f32.mrf.mxu1  ;;  %v2022_v5 = vadd.f32 %v5950_v42, %v6504_v28  ;;  %v4471_v17 = vld [vmem:[#allocation9 + $0x48] sm:$0xff]  ;;  %v4473_v22 = vld [vmem:[#allocation9 + $0x58] sm:$0xff] }
 0x39c   : > { %2957 = vst.msk [vmem:[#allocation3 + $0xd9] sm:$0xff] %vm2884_vm0, %v2868_v2  ;;  %3353 = vmatpush.bf16.msra.mxu2 %v4471_v17  ;;  %3439 = vmatpush.bf16.msrb.mxu3 %v4473_v22  ;;  %v3005_v3 = vld [vmem:[#allocation3 + $0xc1] ss:$2 sm:$0xff] }
 0x39d   : > { %v2733_v33 = vmul.f32 %v5844_v59, %v2697_v14  ;;  %v2249_v2 = vadd.f32 %v5954_v60, %v2022_v5 }
 0x39f   : > { %v2769_v31 = vadd.f32 %v5850_v25, %v2733_v33  ;;  %v6117_v29 = vpop.f32.mrf.mxu3  ;;  %v2475_v27 = vadd.f32 %v6037_v40, %v2249_v2  ;;  %v6505_v33 = vld [vmem:[#allocation21_spill] sm:$0xff] }
 0x3a1   : > { %vm2801_vm7 = vcmp.gt.f32.partialorder %v2769_v31, 0.0  ;;  %v2837_v4 = vmul.f32 %v5856_v34, %v2769_v31 }
 0x3a2   : > { %v2645_v63 = vpop.f32.mrf.mxu0 }
 0x3a3   : > { %v2869_v10 = vsel %vm2801_vm7, %v2769_v31, %v2837_v4  ;;  %v2698_v54 = vadd.f32 %v2645_v63, %v2472_v9  ;;  %v6119_v26 = vpop.f32.mrf.mxu1  ;;  %v2023_v31 = vadd.f32 %v5968_v46, %v6505_v33  ;;  %v6125_v9 = vpop.f32.mrf.mxu2  ;;  %v2981_v4 = vld [vmem:[#allocation3 + $0xc0] ss:$2 sm:$0xff]  ;;  %v4469_v46 = vld [vmem:[#allocation9 + $0x38] sm:$0xff] }
 0x3a4   : > { %2958 = vst.msk [vmem:[#allocation3 + $0xe1] sm:$0xff] %vm2884_vm0, %v2869_v10  ;;  %v3136_v63 = vld [vmem:[#allocation3 + $0xc2] ss:$2 sm:$0xff]  ;;  %3267 = vmatpush.bf16.msra.mxu1 %v4469_v46 }
 0x3a5   : > { %v2734_v16 = vmul.f32 %v5844_v59, %v2698_v54  ;;  %v2250_v38 = vadd.f32 %v5971_v13, %v2023_v31 }
 0x3a7   : > { %v2770_v1 = vadd.f32 %v5850_v25, %v2734_v16 }
 0x3a9   : > { %vm2802_vm8 = vcmp.gt.f32.partialorder %v2770_v1, 0.0  ;;  %v2838_v62 = vmul.f32 %v5856_v34, %v2770_v1 }
 0x3aa   : > { %v2647_v57 = vpop.f32.mrf.mxu0 }
 0x3ab   : > { %v2870_v19 = vsel %vm2802_vm8, %v2770_v1, %v2838_v62  ;;  %v2699_v37 = vadd.f32 %v2647_v57, %v2473_v48  ;;  %vm3814_vm8 = vcmask 1041408  }
 0x3ac   : > { %2959 = vst.msk [vmem:[#allocation3 + $0xf1] sm:$0xff] %vm2884_vm0, %v2870_v19 }
 0x3ad   : > { %v2735_v43 = vmul.f32 %v5844_v59, %v2699_v37  ;;  %v2476_v37 = vadd.f32 %v6053_v7, %v2250_v38 }
 0x3af   : > { %v2771_v12 = vadd.f32 %v5850_v25, %v2735_v43  ;;  %v2024_v43 = vadd.f32 %v5985_v11, %v6506_v39 }
 0x3b1   : > { %vm2803_vm9 = vcmp.gt.f32.partialorder %v2771_v12, 0.0  ;;  %v2839_v35 = vmul.f32 %v5856_v34, %v2771_v12 }
 0x3b2   : > { %v2650_v55 = vpop.f32.mrf.mxu0 }
 0x3b3   : > { %v2871_v45 = vsel %vm2803_vm9, %v2771_v12, %v2839_v35  ;;  %v2700_v32 = vadd.f32 %v2650_v55, %v2474_v36  ;;  %v6140_v12 = vpop.f32.mrf.mxu3  ;;  %v2251_v55 = vadd.f32 %v5991_v20, %v2024_v43 }
 0x3b4   : > { %2960 = vst.msk [vmem:[#allocation3 + $0xf9] sm:$0xff] %vm2884_vm0, %v2871_v45 }
 0x3b5   : > { %v2736_v14 = vmul.f32 %v5844_v59, %v2700_v32  ;;  %v2477_v11 = vadd.f32 %v6071_v58, %v2251_v55  ;;  %v6507_v32 = vld [vmem:[#allocation24_spill] sm:$0xff] }
 0x3b6   : > { %v2025_v17 = vadd.f32 %v6003_v0, %v6507_v32 }
 0x3b7   : > { %v2772_v42 = vadd.f32 %v5850_v25, %v2736_v14 }
 0x3b9   : > { %vm2804_vm10 = vcmp.gt.f32.partialorder %v2772_v42, 0.0  ;;  %v2840_v60 = vmul.f32 %v5856_v34, %v2772_v42 }
 0x3ba   : > { %v2652_v61 = vpop.f32.mrf.mxu0 }
 0x3bb   : > { %v2872_v10 = vsel %vm2804_vm10, %v2772_v42, %v2840_v60  ;;  %v2701_v54 = vadd.f32 %v2652_v61, %v2475_v27  ;;  %v3007_v15 = vld [vmem:[#allocation3 + $0xf1] ss:$2 sm:$0xff]  ;;  %v2983_v16 = vld [vmem:[#allocation3 + $0xf0] ss:$2 sm:$0xff]  ;;  %v6134_v19 = vpop.f32.mrf.mxu1  ;;  %v2444_v33 = vpop.f32.mrf.mxu3  ;;  %v2252_v60 = vadd.f32 %v6006_v18, %v2025_v17  ;;  %vm3810_vm10 = vcmask 15360  }
 0x3bc   : > { %v3138_v1 = vld [vmem:[#allocation3 + $0xf2] ss:$2 sm:$0xff]  ;;  %2961 = vst.msk [vmem:[#allocation3 + $0x109] sm:$0xff] %vm2884_vm0, %v2872_v10  ;;  %v3014_v40 = vpack.c.bf16 %v3007_v15, %v3005_v3  ;;  %v2990_v48 = vpack.c.bf16 %v2983_v16, %v2981_v4 }
 0x3bd   : > { %v3145_v6 = vpack.c.bf16 %v3138_v1, %v3136_v63  ;;  %v2737_v62 = vmul.f32 %v5844_v59, %v2701_v54  ;;  %v2478_v0 = vadd.f32 %v6086_v21, %v2252_v60  ;;  %v6508_v3 = vld [vmem:[#allocation25_spill] sm:$0xff]  ;;  %v4472_v1 = vld [vmem:[#allocation9 + $0x50] sm:$0xff] }
 0x3be   : > { %4331 = vmatmul.msk.bf16.gmra.mxu1 %vm2884_vm0, %v3014_v40  ;;  %4343 = vmatmul.msk.bf16.gmra.mxu2 %vm2884_vm0, %v2990_v48  ;;  %v2026_v4 = vadd.f32 %v6020_v51, %v6508_v3  ;;  %v4470_v16 = vld [vmem:[#allocation9 + $0x40] sm:$0xff] }
 0x3bf   : > { %v2773_v57 = vadd.f32 %v5850_v25, %v2737_v62  ;;  %4355 = vmatmul.msk.bf16.gmra.mxu3 %vm2884_vm0, %v3145_v6  ;;  %3354 = vmatpush.bf16.msra.mxu2 %v4470_v16  ;;  %v6509_v6 = vld [vmem:[#allocation26_spill] sm:$0xff] }
 0x3c0   : > { %v2253_v18 = vadd.f32 %v6024_v8, %v2026_v4  ;;  %3440 = vmatpush.bf16.msrb.mxu3 %v4472_v1  ;;  %v2027_v46 = vadd.f32 %v6039_v50, %v6509_v6  ;;  %v4468_v8 = vld [vmem:[#allocation9 + $0x30] sm:$0xff]  ;;  %v6513_v1 = vld [vmem:[#allocation30_spill] sm:$0xff] }
 0x3c1   : > { %vm2805_vm11 = vcmp.gt.f32.partialorder %v2773_v57, 0.0  ;;  %v2841_v13 = vmul.f32 %v5856_v34, %v2773_v57  ;;  %v6143_v36 = vpop.f32.mrf.mxu2  ;;  %3268 = vmatpush.bf16.msra.mxu1 %v4468_v8 }
 0x3c2   : > { %v2655_v28 = vpop.f32.mrf.mxu0  ;;  %v2479_v51 = vadd.f32 %v6102_v24, %v2253_v18  ;;  %v2254_v39 = vadd.f32 %v6043_v56, %v2027_v46  ;;  %v2031_v18 = vadd.f32 %v6104_v30, %v6513_v1 }
 0x3c3   : > { %v2873_v5 = vsel %vm2805_vm11, %v2773_v57, %v2841_v13  ;;  %v2702_v35 = vadd.f32 %v2655_v28, %v2476_v37  ;;  %v3056_v2 = vpop.f32.mrf.mxu1  ;;  %v2446_v40 = vpop.f32.mrf.mxu3  ;;  %v6510_v28 = vld [vmem:[#allocation27_spill] sm:$0xff] }
 0x3c4   : > { %2962 = vst.msk [vmem:[#allocation3 + $0x111] sm:$0xff] %vm2884_vm0, %v2873_v5  ;;  %v2480_v50 = vadd.f32 %v6117_v29, %v2254_v39  ;;  %v2028_v5 = vadd.f32 %v6055_v44, %v6510_v28  ;;  %v6511_v29 = vld [vmem:[#allocation28_spill] sm:$0xff]  ;;  %v2258_v30 = vadd.f32 %v6107_v53, %v2031_v18 }
 0x3c5   : > { %v2738_v45 = vmul.f32 %v5844_v59, %v2702_v35  ;;  %v3305_v18 = vld [vmem:[#allocation3 + $0xa9] ss:$2 sm:$0xff] }
 0x3c6   : > { %v2255_v56 = vadd.f32 %v6061_v41, %v2028_v5 }
 0x3c7   : > { %v2774_v7 = vadd.f32 %v5850_v25, %v2738_v45 }
 0x3c8   : > { %v2481_v17 = vadd.f32 %v6140_v12, %v2255_v56 }
 0x3c9   : > { %vm2806_vm12 = vcmp.gt.f32.partialorder %v2774_v7, 0.0  ;;  %v2842_v22 = vmul.f32 %v5856_v34, %v2774_v7  ;;  %v3109_v14 = vpop.f32.mrf.mxu2 }
 0x3ca   : > { %v6153_v42 = vadd.f32 %v3109_v14, %v3056_v2  ;;  %v2657_v27 = vpop.f32.mrf.mxu0 }
 0x3cb   : > { %v2874_v31 = vsel %vm2806_vm12, %v2774_v7, %v2842_v22  ;;  %v2703_v20 = vadd.f32 %v2657_v27, %v2477_v11  ;;  %v6174_v13 = vpop.f32.mrf.mxu3  ;;  %v2029_v22 = vadd.f32 %v6073_v52, %v6511_v29 }
 0x3cc   : > { %2963 = vst.msk [vmem:[#allocation3 + $0x121] sm:$0xff] %vm2884_vm0, %v2874_v31  ;;  %v2484_v5 = vadd.f32 %v6174_v13, %v2258_v30 }
 0x3cd   : > { %v2739_v58 = vmul.f32 %v5844_v59, %v2703_v20  ;;  %v2256_v41 = vadd.f32 %v6076_v47, %v2029_v22  ;;  %v4479_v47 = vld [vmem:[#allocation9 + $0x88] sm:$0xff] }
 0x3ce   : > { %3697 = vmatpush.bf16.msra.mxu3 %v4479_v47 }
 0x3cf   : > { %v2775_v61 = vadd.f32 %v5850_v25, %v2739_v58  ;;  %v2482_v12 = vadd.f32 %v2444_v33, %v2256_v41  ;;  %v6512_v58 = vld [vmem:[#allocation29_spill] sm:$0xff]  ;;  %v3215_v41 = vld [vmem:[#allocation3 + $0x48] ss:$2 sm:$0xff] }
 0x3d0   : > { %v2030_v52 = vadd.f32 %v6088_v23, %v6512_v58  ;;  %v3387_v58 = vld [vmem:[#allocation3 + $0x4a] ss:$2 sm:$0xff] }
 0x3d1   : > { %vm2807_vm13 = vcmp.gt.f32.partialorder %v2775_v61, 0.0  ;;  %v2843_v63 = vmul.f32 %v5856_v34, %v2775_v61 }
 0x3d2   : > { %v2660_v10 = vpop.f32.mrf.mxu0 }
 0x3d3   : > { %v2875_v54 = vsel %vm2807_vm13, %v2775_v61, %v2843_v63  ;;  %v2704_v15 = vadd.f32 %v2660_v10, %v2478_v0  ;;  %v6188_v44 = vpop.f32.mrf.mxu3  ;;  %v4477_v10 = vld [vmem:[#allocation9 + $0x78] sm:$0xff] }
 0x3d4   : > { %2964 = vst.msk [vmem:[#allocation3 + $0x129] sm:$0xff] %vm2884_vm0, %v2875_v54  ;;  %v4475_v54 = vld [vmem:[#allocation9 + $0x68] sm:$0xff]  ;;  %3611 = vmatpush.bf16.msrb.mxu2 %v4477_v10 }
 0x3d5   : > { %v2740_v48 = vmul.f32 %v5844_v59, %v2704_v15  ;;  %v2257_v15 = vadd.f32 %v6092_v49, %v2030_v52  ;;  %3525 = vmatpush.bf16.msrb.mxu1 %v4475_v54 }
 0x3d7   : > { %v2776_v21 = vadd.f32 %v5850_v25, %v2740_v48  ;;  %v2483_v16 = vadd.f32 %v2446_v40, %v2257_v15  ;;  %v4476_v15 = vld [vmem:[#allocation9 + $0x70] sm:$0xff] }
 0x3d8   : > { %3612 = vmatpush.bf16.msrb.mxu2 %v4476_v15  ;;  %v3647_v15 = vld [vmem:[#allocation3 + $0x92] ss:$2 sm:$0xff] }
 0x3d9   : > { %vm2808_vm14 = vcmp.gt.f32.partialorder %v2776_v21, 0.0  ;;  %v2844_v38 = vmul.f32 %v5856_v34, %v2776_v21 }
 0x3da   : > { %v2662_v62 = vpop.f32.mrf.mxu0 }
 0x3db   : > { %v2876_v57 = vsel %vm2808_vm14, %v2776_v21, %v2844_v38  ;;  %v2705_v37 = vadd.f32 %v2662_v62, %v2479_v51  ;;  %v6197_v61 = vpop.f32.mrf.mxu3  ;;  %v3009_v51 = vld [vmem:[#allocation3 + $0x121] ss:$2 sm:$0xff]  ;;  %v2985_v6 = vld [vmem:[#allocation3 + $0x120] ss:$2 sm:$0xff] }
 0x3dc   : > { %2965 = vst.msk [vmem:[#allocation3 + $0x139] sm:$0xff] %vm2884_vm0, %v2876_v57  ;;  %v3140_v46 = vld [vmem:[#allocation3 + $0x122] ss:$2 sm:$0xff] }
 0x3dd   : > { %v2741_v43 = vmul.f32 %v5844_v59, %v2705_v37 }
 0x3df   : > { %v2777_v24 = vadd.f32 %v5850_v25, %v2741_v43 }
 0x3e1   : > { %vm2809_vm15 = vcmp.gt.f32.partialorder %v2777_v24, 0.0  ;;  %v2845_v35 = vmul.f32 %v5856_v34, %v2777_v24 }
 0x3e2   : > { %v2665_v55 = vpop.f32.mrf.mxu0 }
 0x3e3   : > { %v2877_v45 = vsel %vm2809_vm15, %v2777_v24, %v2845_v35  ;;  %v2706_v7 = vadd.f32 %v2665_v55, %v2480_v50  ;;  %v6207_v38 = vpop.f32.mrf.mxu3  ;;  %v6514_v35 = vld [vmem:[#allocation31_spill] sm:$0xff] }
 0x3e4   : > { %2966 = vst.msk [vmem:[#allocation3 + $0x141] sm:$0xff] %vm2884_vm0, %v2877_v45  ;;  %v2032_v55 = vadd.f32 %v6119_v26, %v6514_v35 }
 0x3e5   : > { %v2742_v11 = vmul.f32 %v5844_v59, %v2706_v7 }
 0x3e6   : > { %v2259_v22 = vadd.f32 %v6125_v9, %v2032_v55  ;;  %v3213_v9 = vld [vmem:[#allocation3 + $0x18] ss:$2 sm:$0xff] }
 0x3e7   : > { %v2778_v32 = vadd.f32 %v5850_v25, %v2742_v11 }
 0x3e8   : > { %v2485_v26 = vadd.f32 %v6188_v44, %v2259_v22  ;;  %v3385_v44 = vld [vmem:[#allocation3 + $0x1a] ss:$2 sm:$0xff] }
 0x3e9   : > { %vm2810_vm1 = vcmp.gt.f32.partialorder %v2778_v32, 0.0  ;;  %v2846_v2 = vmul.f32 %v5856_v34, %v2778_v32  ;;  %v3400_v47 = vpack.c.bf16 %v3387_v58, %v3385_v44  ;;  %v3475_v44 = vld [vmem:[#allocation3 + $0x90] ss:$2 sm:$0xff] }
 0x3ea   : > { %v2667_v14 = vpop.f32.mrf.mxu0 }
 0x3eb   : > { %v2878_v27 = vsel %vm2810_vm1, %v2778_v32, %v2846_v2  ;;  %v2707_v31 = vadd.f32 %v2667_v14, %v2481_v17  ;;  %v3225_v35 = vld [vmem:[#allocation3 + $0x138] ss:$2 sm:$0xff]  ;;  %v3311_v55 = vld [vmem:[#allocation3 + $0x139] ss:$2 sm:$0xff] }
 0x3ec   : > { %2967 = vst.msk [vmem:[#allocation3 + $0x151] sm:$0xff] %vm2884_vm0, %v2878_v27 }
 0x3ed   : > { %v2743_v20 = vmul.f32 %v5844_v59, %v2707_v31 }
 0x3ef   : > { %v2779_v60 = vadd.f32 %v5850_v25, %v2743_v20  ;;  %v3301_v20 = vld [vmem:[#allocation3 + $0x49] ss:$2 sm:$0xff] }
 0x3f1   : > { %vm2811_vm3 = vcmp.gt.f32.partialorder %v2779_v60, 0.0  ;;  %v2847_v0 = vmul.f32 %v5856_v34, %v2779_v60 }
 0x3f2   : > { %v2670_v3 = vpop.f32.mrf.mxu0 }
 0x3f3   : > { %v2879_v4 = vsel %vm2811_vm3, %v2779_v60, %v2847_v0  ;;  %v2708_v63 = vadd.f32 %v2670_v3, %v2482_v12  ;;  %v3299_v3 = vld [vmem:[#allocation3 + $0x19] ss:$2 sm:$0xff] }
 0x3f4   : > { %2968 = vst.msk [vmem:[#allocation3 + $0x159] sm:$0xff] %vm2884_vm0, %v2879_v4  ;;  %v3228_v4 = vpack.c.bf16 %v3215_v41, %v3213_v9  ;;  %v3645_v41 = vld [vmem:[#allocation3 + $0x62] ss:$2 sm:$0xff] }
 0x3f5   : > { %v2744_v33 = vmul.f32 %v5844_v59, %v2708_v63  ;;  %v3314_v63 = vpack.c.bf16 %v3301_v20, %v3299_v3  ;;  %v3471_v20 = vld [vmem:[#allocation3 + $0x30] ss:$2 sm:$0xff]  ;;  %v3477_v3 = vld [vmem:[#allocation3 + $0xc0] ss:$2 sm:$0xff] }
 0x3f7   : > { %v2780_v23 = vadd.f32 %v5850_v25, %v2744_v33  ;;  %v4478_v33 = vld [vmem:[#allocation9 + $0x80] sm:$0xff] }
 0x3f8   : > { %3698 = vmatpush.bf16.msra.mxu3 %v4478_v33 }
 0x3f9   : > { %vm2812_vm4 = vcmp.gt.f32.partialorder %v2780_v23, 0.0  ;;  %v2848_v48 = vmul.f32 %v5856_v34, %v2780_v23 }
 0x3fa   : > { %v2672_v21 = vpop.f32.mrf.mxu0 }
 0x3fb   : > { %v2880_v49 = vsel %vm2812_vm4, %v2780_v23, %v2848_v48  ;;  %v2709_v62 = vadd.f32 %v2672_v21, %v2483_v16  ;;  %v3011_v57 = vld [vmem:[#allocation3 + $0x151] ss:$2 sm:$0xff]  ;;  %v2987_v37 = vld [vmem:[#allocation3 + $0x150] ss:$2 sm:$0xff]  ;;  %v3059_v28 = vpop.f32.mrf.mxu1 }
 0x3fc   : > { %v3142_v8 = vld [vmem:[#allocation3 + $0x152] ss:$2 sm:$0xff]  ;;  %2969 = vst.msk [vmem:[#allocation3 + $0x169] sm:$0xff] %vm2884_vm0, %v2880_v49  ;;  %v3015_v40 = vpack.c.bf16 %v3011_v57, %v3009_v51  ;;  %v2991_v39 = vpack.c.bf16 %v2987_v37, %v2985_v6  ;;  %v3303_v51 = vld [vmem:[#allocation3 + $0x79] ss:$2 sm:$0xff] }
 0x3fd   : > { %v3146_v43 = vpack.c.bf16 %v3142_v8, %v3140_v46  ;;  %v2745_v24 = vmul.f32 %v5844_v59, %v2709_v62  ;;  %v4474_v23 = vld [vmem:[#allocation9 + $0x60] sm:$0xff]  ;;  %v3315_v6 = vpack.c.bf16 %v3305_v18, %v3303_v51  ;;  %v3309_v62 = vld [vmem:[#allocation3 + $0x109] ss:$2 sm:$0xff] }
 0x3fe   : > { %4332 = vmatmul.msk.bf16.gmra.mxu1 %vm2884_vm0, %v3015_v40  ;;  %4344 = vmatmul.msk.bf16.gmra.mxu2 %vm2884_vm0, %v2991_v39  ;;  %v3391_v48 = vld [vmem:[#allocation3 + $0xaa] ss:$2 sm:$0xff]  ;;  %v3389_v46 = vld [vmem:[#allocation3 + $0x7a] ss:$2 sm:$0xff]  ;;  %v3307_v8 = vld [vmem:[#allocation3 + $0xd9] ss:$2 sm:$0xff] }
 0x3ff   : > { %v2781_v50 = vadd.f32 %v5850_v25, %v2745_v24  ;;  %4356 = vmatmul.msk.bf16.gmra.mxu3 %vm2884_vm0, %v3146_v43  ;;  %3526 = vmatpush.bf16.msrb.mxu1 %v4474_v23  ;;  %v3217_v21 = vld [vmem:[#allocation3 + $0x78] ss:$2 sm:$0xff]  ;;  %v3401_v49 = vpack.c.bf16 %v3391_v48, %v3389_v46  ;;  %v3316_v39 = vpack.c.bf16 %v3309_v62, %v3307_v8  ;;  %v3565_v18 = vld [vmem:[#allocation3 + $0xf1] ss:$2 sm:$0xff] }
 0x400   : > { %v3395_v57 = vld [vmem:[#allocation3 + $0x10a] ss:$2 sm:$0xff]  ;;  %v3393_v43 = vld [vmem:[#allocation3 + $0xda] ss:$2 sm:$0xff] }
 0x401   : > { %vm2813_vm5 = vcmp.gt.f32.partialorder %v2781_v50, 0.0  ;;  %v2849_v45 = vmul.f32 %v5856_v34, %v2781_v50  ;;  %v3112_v53 = vpop.f32.mrf.mxu2  ;;  %v3221_v37 = vld [vmem:[#allocation3 + $0xd8] ss:$2 sm:$0xff]  ;;  %v3402_v30 = vpack.c.bf16 %v3395_v57, %v3393_v43 }
 0x402   : > { %v3113_v7 = vadd.f32 %v3112_v53, %v3059_v28  ;;  %v2675_v56 = vpop.f32.mrf.mxu0  ;;  %v3190_v32 = vpop.f32.mrf.mxu3  ;;  %v3481_v23 = vld [vmem:[#allocation3 + $0x120] ss:$2 sm:$0xff]  ;;  %v3483_v57 = vld [vmem:[#allocation3 + $0x150] ss:$2 sm:$0xff] }
 0x403   : > { %v2881_v11 = vsel %vm2813_vm5, %v2781_v50, %v2849_v45  ;;  %v2710_v17 = vadd.f32 %v2675_v56, %v2484_v5  ;;  %v3061_v27 = vpop.f32.mrf.mxu1  ;;  %v3651_v51 = vld [vmem:[#allocation3 + $0xf2] ss:$2 sm:$0xff] }
 0x404   : > { %2970 = vst.msk [vmem:[#allocation3 + $0x171] sm:$0xff] %vm2884_vm0, %v2881_v11  ;;  %v6221_v29 = vadd.f32 %v3190_v32, %v3113_v7  ;;  %v3397_v7 = vld [vmem:[#allocation3 + $0x13a] ss:$2 sm:$0xff] }
 0x405   : > { %v2746_v13 = vmul.f32 %v5844_v59, %v2710_v17 }
 0x407   : > { %v2782_v2 = vadd.f32 %v5850_v25, %v2746_v13 }
 0x409   : > { %vm2814_vm6 = vcmp.gt.f32.partialorder %v2782_v2, 0.0  ;;  %v2850_v14 = vmul.f32 %v5856_v34, %v2782_v2  ;;  %v3114_v31 = vpop.f32.mrf.mxu2 }
 0x40a   : > { %v6228_v60 = vadd.f32 %v3114_v31, %v3061_v27  ;;  %v2677_v12 = vpop.f32.mrf.mxu0  ;;  %v6244_v5 = vpop.f32.mrf.mxu3  ;;  %v3559_v27 = vld [vmem:[#allocation3 + $0x61] ss:$2 sm:$0xff] }
 0x40b   : > { %v2882_v52 = vsel %vm2814_vm6, %v2782_v2, %v2850_v14  ;;  %v2711_v0 = vadd.f32 %v2677_v12, %v2485_v26  ;;  %v3227_v24 = vld [vmem:[#allocation3 + $0x168] ss:$2 sm:$0xff]  ;;  %v3313_v50 = vld [vmem:[#allocation3 + $0x169] ss:$2 sm:$0xff] }
 0x40c   : > { %2971 = vst.msk [vmem:[#allocation3 + $0x181] sm:$0xff] %vm2884_vm0, %v2882_v52  ;;  %v3399_v28 = vld [vmem:[#allocation3 + $0x16a] ss:$2 sm:$0xff]  ;;  %v3231_v45 = vpack.c.bf16 %v3227_v24, %v3225_v35  ;;  %v3317_v53 = vpack.c.bf16 %v3313_v50, %v3311_v55  ;;  %v3557_v12 = vld [vmem:[#allocation3 + $0x31] ss:$2 sm:$0xff]  ;;  %v3108_v55 = vadd.f32 %v6143_v36, %v6134_v19 }
 0x40d   : > { %v2747_v10 = vmul.f32 %v5844_v59, %v2711_v0  ;;  %v3219_v59 = vld [vmem:[#allocation3 + $0xa8] ss:$2 sm:$0xff]  ;;  %v3403_v56 = vpack.c.bf16 %v3399_v28, %v3397_v7  ;;  %v3572_v52 = vpack.c.bf16 %v3559_v27, %v3557_v12 }
 0x40e   : > { %4365 = vmatmul.msk.bf16.vlgmr.msra.gmra.mxu1 %vm2884_vm0, %v3228_v4  ;;  %4377 = vmatmul.msk.bf16.vlgmr.msra.gmra.mxu2 %vm2884_vm0, %v3314_v63  ;;  %v3473_v14 = vld [vmem:[#allocation3 + $0x60] ss:$2 sm:$0xff]  ;;  %v3563_v4 = vld [vmem:[#allocation3 + $0xc1] ss:$2 sm:$0xff] }
 0x40f   : > { %v2783_v54 = vadd.f32 %v5850_v25, %v2747_v10  ;;  %4389 = vmatmul.msk.bf16.vlgmr.msrb.gmra.mxu3 %vm2884_vm0, %v3400_v47  ;;  %v3229_v25 = vpack.c.bf16 %v3219_v59, %v3217_v21  ;;  %v3486_v58 = vpack.c.bf16 %v3473_v14, %v3471_v20  ;;  %v3643_v0 = vld [vmem:[#allocation3 + $0x32] ss:$2 sm:$0xff]  ;;  %v3649_v63 = vld [vmem:[#allocation3 + $0xc2] ss:$2 sm:$0xff]  ;;  %v3561_v10 = vld [vmem:[#allocation3 + $0x91] ss:$2 sm:$0xff]  ;;  %v3487_v47 = vpack.c.bf16 %v3477_v3, %v3475_v44 }
 0x410   : > { %v3658_v9 = vpack.c.bf16 %v3645_v41, %v3643_v0  ;;  %v3659_v33 = vpack.c.bf16 %v3649_v63, %v3647_v15  ;;  %v3479_v59 = vld [vmem:[#allocation3 + $0xf0] ss:$2 sm:$0xff]  ;;  %v3208_v0 = vadd.f32 %v6244_v5, %v6228_v60 }
 0x411   : > { %vm2815_vm7 = vcmp.gt.f32.partialorder %v2783_v54, 0.0  ;;  %v2851_v16 = vmul.f32 %v5856_v34, %v2783_v54  ;;  %v3223_v34 = vld [vmem:[#allocation3 + $0x108] ss:$2 sm:$0xff]  ;;  %v3488_v48 = vpack.c.bf16 %v3481_v23, %v3479_v59 }
 0x412   : > { %v3230_v40 = vpack.c.bf16 %v3223_v34, %v3221_v37  ;;  %v3569_v37 = vld [vmem:[#allocation3 + $0x151] ss:$2 sm:$0xff] }
 0x413   : > { %v2883_v1 = vsel %vm2815_vm7, %v2783_v54, %v2851_v16  ;;  %v3573_v54 = vpack.c.bf16 %v3563_v4, %v3561_v10  ;;  %v3567_v16 = vld [vmem:[#allocation3 + $0x121] ss:$2 sm:$0xff] }
 0x414   : > { %2972 = vst.msk [vmem:[#allocation3 + $0x189] sm:$0xff] %vm2884_vm0, %v2883_v1  ;;  %v3653_v1 = vld [vmem:[#allocation3 + $0x122] ss:$2 sm:$0xff]  ;;  %v3574_v21 = vpack.c.bf16 %v3567_v16, %v3565_v18 }
 0x41b   : > { %v3571_v46 = vld [vmem:[#allocation3 + $0x181] ss:$2 sm:$0xff]  ;;  %v3657_v34 = vld [vmem:[#allocation3 + $0x182] ss:$2 sm:$0xff] }
 0x41e   : > { %4366 = vmatmul.msk.bf16.gmra.mxu1 %vm2884_vm0, %v3229_v25  ;;  %4378 = vmatmul.msk.bf16.gmra.mxu2 %vm2884_vm0, %v3315_v6  ;;  %v3660_v25 = vpack.c.bf16 %v3653_v1, %v3651_v51  ;;  %v3485_v6 = vld [vmem:[#allocation3 + $0x180] ss:$2 sm:$0xff] }
 0x41f   : > { %4390 = vmatmul.msk.bf16.gmra.mxu3 %vm2884_vm0, %v3401_v49  ;;  %v3489_v8 = vpack.c.bf16 %v3485_v6, %v3483_v57 }
 0x42e   : > { %4367 = vmatmul.msk.bf16.gmra.mxu1 %vm2884_vm0, %v3230_v40  ;;  %4379 = vmatmul.msk.bf16.gmra.mxu2 %vm2884_vm0, %v3316_v39  ;;  %v3575_v40 = vpack.c.bf16 %v3571_v46, %v3569_v37  ;;  %v3655_v39 = vld [vmem:[#allocation3 + $0x152] ss:$2 sm:$0xff] }
 0x42f   : > { %4391 = vmatmul.msk.bf16.gmra.mxu3 %vm2884_vm0, %v3402_v30  ;;  %v3661_v43 = vpack.c.bf16 %v3657_v34, %v3655_v39 }
 0x43b   : > { %v3064_v11 = vpop.f32.mrf.mxu1 }
 0x43e   : > { %4368 = vmatmul.msk.bf16.gmra.mxu1 %vm2884_vm0, %v3231_v45  ;;  %4380 = vmatmul.msk.bf16.gmra.mxu2 %vm2884_vm0, %v3317_v53  ;;  %v3205_v53 = vadd.f32 %v6197_v61, %v3108_v55 }
 0x43f   : > { %4392 = vmatmul.msk.bf16.gmra.mxu3 %vm2884_vm0, %v3403_v56 }
 0x441   : > { %v3117_v32 = vpop.f32.mrf.mxu2 }
 0x442   : > { %v3118_v17 = vadd.f32 %v3117_v32, %v3064_v11  ;;  %v3195_v22 = vpop.f32.mrf.mxu3 }
 0x443   : > { %v3066_v2 = vpop.f32.mrf.mxu1 }
 0x444   : > { %v6249_v13 = vadd.f32 %v3195_v22, %v3118_v17  ;;  %v3206_v22 = vadd.f32 %v6207_v38, %v6153_v42 }
 0x449   : > { %v3119_v26 = vpop.f32.mrf.mxu2 }
 0x44a   : > { %v6251_v31 = vadd.f32 %v3119_v26, %v3066_v2  ;;  %v3197_v49 = vpop.f32.mrf.mxu3 }
 0x44c   : > { %v3210_v23 = vadd.f32 %v3197_v49, %v6251_v31  ;;  %v3784_v49 = vld [vmem:[%s6425_s3 + $0x18] sm:$0xff] }
 0x44d   : > { %3800 = vmatpush.msra.mxu1 %v3784_v49 }
 0x44e   : > { %4401 = vmatmul.msk.bf16.vlgmr.msrb.gmra.mxu1 %vm2884_vm0, %v3486_v58  ;;  %4413 = vmatmul.msk.bf16.vlgmr.msrb.gmra.mxu2 %vm2884_vm0, %v3572_v52 }
 0x44f   : > { %4425 = vmatmul.msk.bf16.vlgmr.msra.gmra.mxu3 %vm2884_vm0, %v3658_v9 }
 0x45e   : > { %4402 = vmatmul.msk.bf16.gmra.mxu1 %vm2884_vm0, %v3487_v47  ;;  %4414 = vmatmul.msk.bf16.gmra.mxu2 %vm2884_vm0, %v3573_v54 }
 0x45f   : > { %4426 = vmatmul.msk.bf16.gmra.mxu3 %vm2884_vm0, %v3659_v33 }
 0x46e   : > { %4403 = vmatmul.msk.bf16.gmra.mxu1 %vm2884_vm0, %v3488_v48  ;;  %4415 = vmatmul.msk.bf16.gmra.mxu2 %vm2884_vm0, %v3574_v21 }
 0x46f   : > { %4427 = vmatmul.msk.bf16.gmra.mxu3 %vm2884_vm0, %v3660_v25 }
 0x47b   : > { %v3069_v62 = vpop.f32.mrf.mxu1 }
 0x47e   : > { %4404 = vmatmul.msk.bf16.gmra.mxu1 %vm2884_vm0, %v3489_v8  ;;  %4416 = vmatmul.msk.bf16.gmra.mxu2 %vm2884_vm0, %v3575_v40 }
 0x47f   : > { %4428 = vmatmul.msk.bf16.gmra.mxu3 %vm2884_vm0, %v3661_v43 }
 0x481   : > { %v3122_v30 = vpop.f32.mrf.mxu2 }
 0x482   : > { %v3123_v24 = vadd.f32 %v3122_v30, %v3069_v62  ;;  %v3200_v50 = vpop.f32.mrf.mxu3 }
 0x483   : > { %v3071_v28 = vpop.f32.mrf.mxu1 }
 0x484   : > { %v3211_v35 = vadd.f32 %v3200_v50, %v3123_v24  ;;  %v3783_v50 = vld [vmem:[%s6425_s3 + $0x10] sm:$0xff] }
 0x485   : > { %3801 = vmatpush.msra.mxu1 %v3783_v50 }
 0x489   : > { %v3124_v45 = vpop.f32.mrf.mxu2 }
 0x48a   : > { %v6268_v7 = vadd.f32 %v3124_v45, %v3071_v28  ;;  %v6270_v56 = vpop.f32.mrf.mxu3 }
 0x48b   : > { %v3270_v11 = vpop.f32.mrf.mxu1 }
 0x48c   : > { %v3290_v32 = vadd.f32 %v3270_v11, %v3205_v53 }
 0x491   : > { %v3356_v17 = vpop.f32.mrf.mxu2 }
 0x492   : > { %v3376_v2 = vadd.f32 %v3356_v17, %v3290_v32  ;;  %v3442_v26 = vpop.f32.mrf.mxu3  ;;  %v3782_v32 = vld [vmem:[%s6425_s3 + $0x8] sm:$0xff] }
 0x493   : > { %v3272_v14 = vpop.f32.mrf.mxu1  ;;  %3802 = vmatpush.msra.mxu1 %v3782_v32 }
 0x494   : > { %v6274_v27 = vadd.f32 %v3442_v26, %v3376_v2  ;;  %v3291_v41 = vadd.f32 %v3272_v14, %v3206_v22 }
 0x499   : > { %v3358_v19 = vpop.f32.mrf.mxu2 }
 0x49a   : > { %v3377_v36 = vadd.f32 %v3358_v19, %v3291_v41  ;;  %v3444_v20 = vpop.f32.mrf.mxu3 }
 0x49b   : > { %v3275_v61 = vpop.f32.mrf.mxu1 }
 0x49c   : > { %v3463_v12 = vadd.f32 %v3444_v20, %v3377_v36  ;;  %v3292_v58 = vadd.f32 %v3275_v61, %v6221_v29 }
 0x4a1   : > { %v3361_v52 = vpop.f32.mrf.mxu2 }
 0x4a2   : > { %v3378_v9 = vadd.f32 %v3361_v52, %v3292_v58  ;;  %v3447_v3 = vpop.f32.mrf.mxu3 }
 0x4a3   : > { %v3277_v42 = vpop.f32.mrf.mxu1 }
 0x4a4   : > { %v3464_v38 = vadd.f32 %v3447_v3, %v3378_v9  ;;  %v3293_v4 = vadd.f32 %v3277_v42, %v3208_v0  ;;  %v6296_v3 = vld [vmem:[%s6432_s10] ss:$0 sm:$0xff] }
 0x4a9   : > { %v3363_v63 = vpop.f32.mrf.mxu2 }
 0x4aa   : > { %v3379_v44 = vadd.f32 %v3363_v63, %v3293_v4  ;;  %v3449_v10 = vpop.f32.mrf.mxu3 }
 0x4ab   : > { %v3280_v47 = vpop.f32.mrf.mxu1 }
 0x4ac   : > { %v3465_v54 = vadd.f32 %v3449_v10, %v3379_v44  ;;  %v3294_v15 = vadd.f32 %v3280_v47, %v6249_v13 }
 0x4b1   : > { %v3366_v33 = vpop.f32.mrf.mxu2 }
 0x4b2   : > { %v3380_v29 = vadd.f32 %v3366_v33, %v3294_v15  ;;  %v3452_v16 = vpop.f32.mrf.mxu3  ;;  %v4565_v33 = vld [vmem:[%s6433_s11] ss:$0 sm:$0xff] }
 0x4b3   : > { %v3282_v1 = vpop.f32.mrf.mxu1 }
 0x4b4   : > { %v3466_v59 = vadd.f32 %v3452_v16, %v3380_v29  ;;  %v3295_v60 = vadd.f32 %v3282_v1, %v3210_v23 }
 0x4b9   : > { %v3368_v5 = vpop.f32.mrf.mxu2 }
 0x4ba   : > { %v3381_v18 = vadd.f32 %v3368_v5, %v3295_v60  ;;  %v3454_v48 = vpop.f32.mrf.mxu3 }
 0x4bb   : > { %v3285_v21 = vpop.f32.mrf.mxu1 }
 0x4bc   : > { %v3467_v51 = vadd.f32 %v3454_v48, %v3381_v18  ;;  %v3296_v25 = vadd.f32 %v3285_v21, %v3211_v35 }
 0x4c1   : > { %v3371_v6 = vpop.f32.mrf.mxu2 }
 0x4c2   : > { %v3382_v46 = vadd.f32 %v3371_v6, %v3296_v25  ;;  %v3457_v34 = vpop.f32.mrf.mxu3 }
 0x4c3   : > { %v3287_v62 = vpop.f32.mrf.mxu1 }
 0x4c4   : > { %v3468_v57 = vadd.f32 %v3457_v34, %v3382_v46  ;;  %v4480_v46 = vld [vmem:[%s6434_s12] sm:$0xff] }
 0x4c5   : > { %v3809_v34 = vld [vmem:[%s6426_s4] sm:$0x3]  ;;  %3912 = vmatpush.bf16.msrb.mxu3 %v4480_v46 }
 0x4c6   : > { %4430 = vmatpush.msk.msra.mxu2 %vm3814_vm8, %v3809_v34 }
 0x4c9   : > { %v3373_v13 = vpop.f32.mrf.mxu2 }
 0x4ca   : > { %v6281_v37 = vpop.f32.mrf.mxu3 }
 0x4cb   : > { %v3528_v31 = vpop.f32.mrf.mxu1 }
 0x4cc   : > { %v3548_v26 = vadd.f32 %v3528_v31, %v6274_v27 }
 0x4d1   : > { %v3614_v8 = vpop.f32.mrf.mxu2 }
 0x4d2   : > { %v3700_v40 = vpop.f32.mrf.mxu3  ;;  %v3634_v36 = vadd.f32 %v3614_v8, %v3548_v26  ;;  %v4432_v8 = vld [vmem:[%s4926_s20 + $0x20] ss:$2 sm:$0xff] }
 0x4d3   : > { %v3530_v39 = vpop.f32.mrf.mxu1 }
 0x4d4   : > { %v3549_v22 = vadd.f32 %v3530_v39, %v3463_v12  ;;  %v3720_v9 = vadd.f32 %v3700_v40, %v3634_v36 }
 0x4d6   : > { %v3732_v15 = vmul.f32 %v6296_v3, %v3720_v9 }
 0x4d8   : > { %v6309_v48 = vadd.f32 %v4565_v33, %v3732_v15 }
 0x4d9   : > { %v3616_v43 = vpop.f32.mrf.mxu2 }
 0x4da   : > { %v3702_v30 = vpop.f32.mrf.mxu3  ;;  %v3635_v41 = vadd.f32 %v3616_v43, %v3549_v22  ;;  %v4743_v43 = vmov 64.0  }
 0x4db   : > { %v3533_v24 = vpop.f32.mrf.mxu1  ;;  %4568 = vrcp.f32 %v4743_v43 }
 0x4dc   : > { %v3550_v19 = vadd.f32 %v3533_v24, %v3464_v38  ;;  %v3721_v58 = vadd.f32 %v3702_v30, %v3635_v41  ;;  %v3752_v24 = vsel %vm2884_vm0, %v6309_v48, 0.0 }
 0x4de   : > { %v3733_v38 = vmul.f32 %v6296_v3, %v3721_v58 }
 0x4e0   : > { %v6306_v1 = vadd.f32 %v4565_v33, %v3733_v38 }
 0x4e1   : > { %v3619_v28 = vpop.f32.mrf.mxu2  ;;  %v4569_v26 = vpop.eup %4568 }
 0x4e2   : > { %v3705_v35 = vpop.f32.mrf.mxu3  ;;  %v3636_v20 = vadd.f32 %v3619_v28, %v3550_v19  ;;  %vm3778_vm9 = vweird.f32 %v4569_v26 }
 0x4e3   : > { %v3535_v55 = vpop.f32.mrf.mxu1 }
 0x4e4   : > { %v3551_v61 = vadd.f32 %v3535_v55, %v3465_v54  ;;  %v3722_v12 = vadd.f32 %v3705_v35, %v3636_v20  ;;  %v3212_v54 = vadd.f32 %v6270_v56, %v6268_v7  ;;  %v3781_v56 = vld [vmem:[%s6425_s3] sm:$0xff] }
 0x4e5   : > { %3803 = vmatpush.msra.mxu1 %v3781_v56  ;;  %v4438_v56 = vld [vmem:[%s4926_s20 + $0xe0] ss:$2 sm:$0xff] }
 0x4e6   : > { %v3734_v23 = vmul.f32 %v6296_v3, %v3722_v12  ;;  %v3297_v16 = vadd.f32 %v3287_v62, %v3212_v54  ;;  %v3866_v62 = vld [vmem:[%s4926_s20] ss:$2 sm:$0xff] }
 0x4e7   : > { %v3881_v30 = vpack.c.bf16 %v4432_v8, %v3866_v62  ;;  %v4433_v12 = vld [vmem:[%s4926_s20 + $0x40] ss:$2 sm:$0xff] }
 0x4e8   : > { %v3383_v18 = vadd.f32 %v3373_v13, %v3297_v16  ;;  %v6314_v21 = vadd.f32 %v4565_v33, %v3734_v23 }
 0x4e9   : > { %v3621_v45 = vpop.f32.mrf.mxu2  ;;  %4443 = vmatmul.msk.bf16.vlgmr.msrb.gmra.mxu3 %vm653_vm2, %v3881_v30 }
 0x4ea   : > { %v3707_v53 = vpop.f32.mrf.mxu3  ;;  %v3637_v52 = vadd.f32 %v3621_v45, %v3551_v61  ;;  %v3469_v40 = vadd.f32 %v6281_v37, %v3383_v18  ;;  %v3755_v50 = vsel %vm2884_vm0, %v6314_v21, 0.0 }
 0x4eb   : > { %v3538_v11 = vpop.f32.mrf.mxu1 }
 0x4ec   : > { %v3552_v0 = vadd.f32 %v3538_v11, %v3466_v59  ;;  %v3723_v10 = vadd.f32 %v3707_v53, %v3637_v52  ;;  %v3774_v52 = vmul.f32 64.0, %v4569_v26 }
 0x4ee   : > { %v3735_v59 = vmul.f32 %v6296_v3, %v3723_v10 }
 0x4f0   : > { %v6326_v13 = vadd.f32 %v4565_v33, %v3735_v59 }
 0x4f1   : > { %v3624_v17 = vpop.f32.mrf.mxu2 }
 0x4f2   : > { %v3710_v2 = vpop.f32.mrf.mxu3  ;;  %v3638_v4 = vadd.f32 %v3624_v17, %v3552_v0  ;;  %v3757_v45 = vsel %vm2884_vm0, %v6326_v13, 0.0 }
 0x4f3   : > { %v3540_v14 = vpop.f32.mrf.mxu1 }
 0x4f4   : > { %v3553_v63 = vadd.f32 %v3540_v14, %v3467_v51  ;;  %v3724_v29 = vadd.f32 %v3710_v2, %v3638_v4  ;;  %v4434_v4 = vld [vmem:[%s4926_s20 + $0x60] ss:$2 sm:$0xff] }
 0x4f5   : > { %v3882_v38 = vpack.c.bf16 %v4434_v4, %v4433_v12 }
 0x4f6   : > { %v3736_v51 = vmul.f32 %v6296_v3, %v3724_v29 }
 0x4f8   : > { %v6335_v28 = vadd.f32 %v4565_v33, %v3736_v51 }
 0x4f9   : > { %v3626_v42 = vpop.f32.mrf.mxu2  ;;  %4444 = vmatmul.msk.bf16.gmra.mxu3 %vm653_vm2, %v3882_v38 }
 0x4fa   : > { %v3712_v27 = vpop.f32.mrf.mxu3  ;;  %v3639_v47 = vadd.f32 %v3626_v42, %v3553_v63  ;;  %v3759_v17 = vsel %vm2884_vm0, %v6335_v28, 0.0 }
 0x4fb   : > { %v3543_v44 = vpop.f32.mrf.mxu1 }
 0x4fc   : > { %v3725_v60 = vadd.f32 %v3712_v27, %v3639_v47  ;;  %v3554_v5 = vadd.f32 %v3543_v44, %v3468_v57  ;;  %v3753_v57 = vsel %vm2884_vm0, %v6306_v1, 0.0  ;;  %v3775_v27 = vsub.f32 1.0, %v3774_v52 }
 0x4fd   : > { %v3754_v55 = vadd.f32 %v3753_v57, %v3752_v24 }
 0x4fe   : > { %v3737_v31 = vmul.f32 %v6296_v3, %v3725_v60  ;;  %v3776_v47 = vmul.f32 %v4569_v26, %v3775_v27  ;;  %v4435_v60 = vld [vmem:[%s4926_s20 + $0x80] ss:$2 sm:$0xff] }
 0x4ff   : > { %v3756_v11 = vadd.f32 %v3755_v50, %v3754_v55  ;;  %v4566_v55 = vld [vmem:[%s6435_s13] ss:$0 sm:$0xff] }
 0x500   : > { %v6340_v37 = vadd.f32 %v4565_v33, %v3737_v31  ;;  %v3777_v15 = vadd.f32 %v4569_v26, %v3776_v47 }
 0x501   : > { %v3629_v7 = vpop.f32.mrf.mxu2  ;;  %v3758_v14 = vadd.f32 %v3757_v45, %v3756_v11 }
 0x502   : > { %v3640_v25 = vadd.f32 %v3629_v7, %v3554_v5  ;;  %v3715_v6 = vpop.f32.mrf.mxu3  ;;  %v3761_v19 = vsel %vm2884_vm0, %v6340_v37, 0.0  ;;  %v3779_v29 = vsel %vm3778_vm9, %v4569_v26, %v3777_v15  ;;  %v4436_v5 = vld [vmem:[%s4926_s20 + $0xa0] ss:$2 sm:$0xff] }
 0x503   : > { %v3545_v39 = vpop.f32.mrf.mxu1  ;;  %v3760_v20 = vadd.f32 %v3759_v17, %v3758_v14  ;;  %v3883_v18 = vpack.c.bf16 %v4436_v5, %v4435_v60  ;;  %v4437_v7 = vld [vmem:[%s4926_s20 + $0xc0] ss:$2 sm:$0xff]  ;;  %s4678_s20 = sshra.s32 %s3990_s23, 4  ;;  %s4679_s20 = int_to_ptr.hbm [resolvable:$true] %s4678_s20 }
 0x504   : > { %v3726_v49 = vadd.f32 %v3715_v6, %v3640_v25  ;;  %v3555_v53 = vadd.f32 %v3545_v39, %v3469_v40  ;;  %v3884_v51 = vpack.c.bf16 %v4438_v56, %v4437_v7  ;;  %s4680_s2 = scalar_lea.hbm %s4679_s20, 64  ;;  %p4685_p11 = scmp.lt.s32.totalorder %s4679_s20, %s6516_s26 }
 0x505   : > { %v3762_v0 = vadd.f32 %v3761_v19, %v3760_v20  ;;  %p4681_p1 = scmp.ne.s32.totalorder %s4679_s20, %s4680_s2 }
 0x506   : > { %v3738_v35 = vmul.f32 %v6296_v3, %v3726_v49 }
 0x507   : > { %p4682_p4 = pnand %p4681_p1, %p4892_p3 }
 0x508   : > { %v6345_v22 = vadd.f32 %v4565_v33, %v3738_v35 }
 0x509   : > { %v3631_v32 = vpop.f32.mrf.mxu2  ;;  %4445 = vmatmul.msk.bf16.gmra.mxu3 %vm653_vm2, %v3883_v18  ;;  %p4683_p8 = pneg %p4682_p4 }
 0x50a   : > { %v3641_v2 = vadd.f32 %v3631_v32, %v3555_v53  ;;  %v3717_v41 = vpop.f32.mrf.mxu3  ;;  %v3763_v61 = vsel %vm2884_vm0, %v6345_v22, 0.0 }
 0x50b   : > { %v3764_v42 = vadd.f32 %v3763_v61, %v3762_v0 }
 0x50c   : > { %v3727_v36 = vadd.f32 %v3717_v41, %v3641_v2  ;;  %v4567_v2 = vld [vmem:[%s6515_s29] ss:$0 sm:$0xff]  ;;  %s4684_s29 = scalar_lea.hbm %s6516_s26, 128 }
 0x50d   : > { %p4686_p2 = scmp.lt.s32.totalorder %s4684_s29, %s4680_s2 }
 0x50e   : > { %v3739_v58 = vmul.f32 %v6296_v3, %v3727_v36 }
 0x50f   : > { %p4687_p9 = por %p4686_p2, %p4685_p11 }
 0x510   : > { %v6352_v9 = vadd.f32 %v4565_v33, %v3739_v58 }
 0x511   : > { %p4688_p10 = pnand %p4687_p9, %p4683_p8 }
 0x512   : > { %v3765_v63 = vsel %vm2884_vm0, %v6352_v9, 0.0 }
 0x513   : > { %v3766_v44 = vadd.f32 %v3765_v63, %v3764_v42 }
 0x515   : > { %v3767_v10 = vrot.slane %v3766_v44, 4 }
 0x517   : > { %v3768_v54 = vadd.f32 %v3767_v10, %v3766_v44 }
 0x519   : > { %v3769_v3 = vrot.slane %v3768_v54, 2  ;;  %4446 = vmatmul.msk.bf16.gmra.mxu3 %vm653_vm2, %v3884_v51 }
 0x51b   : > { %v3770_v33 = vadd.f32 %v3769_v3, %v3768_v54 }
 0x51d   : > { %v3771_v23 = vrot.slane %v3770_v33, 1 }
 0x51f   : > { %v3772_v16 = vadd.f32 %v3771_v23, %v3770_v33 }
 0x521   : > { %v3780_v59 = vmul.f32 %v3779_v29, %v3772_v16 }
 0x523   : > { %4429 = vmatmul.msk.f32.vlgmr.msra.gmra.mxu1 %vm2884_vm0, %v3780_v59 }
 0x56c   : > { %v3914_v46 = vpop.f32.mrf.mxu3 }
 0x56d   : > { %v3938_v17 = vmul.f32 %v4566_v55, %v3914_v46 }
 0x56f   : > { %v3950_v58 = vadd.f32 %v4567_v2, %v3938_v17 }
 0x574   : > { %v3916_v34 = vpop.f32.mrf.mxu3 }
 0x575   : > { %v3939_v14 = vmul.f32 %v4566_v55, %v3916_v34 }
 0x577   : > { %v3951_v12 = vadd.f32 %v4567_v2, %v3939_v14 }
 0x57c   : > { %v3919_v62 = vpop.f32.mrf.mxu3 }
 0x57d   : > { %v3940_v41 = vmul.f32 %v4566_v55, %v3919_v62 }
 0x57f   : > { %v3952_v4 = vadd.f32 %v4567_v2, %v3940_v41 }
 0x584   : > { %v3921_v57 = vpop.f32.mrf.mxu3 }
 0x585   : > { %v3941_v52 = vmul.f32 %v4566_v55, %v3921_v57 }
 0x587   : > { %v3953_v23 = vadd.f32 %v4567_v2, %v3941_v52 }
 0x58c   : > { %v3924_v49 = vpop.f32.mrf.mxu3 }
 0x58d   : > { %v3942_v63 = vmul.f32 %v4566_v55, %v3924_v49 }
 0x594   : > { %v3926_v43 = vpop.f32.mrf.mxu3 }
 0x595   : > { %v3943_v61 = vmul.f32 %v4566_v55, %v3926_v43 }
 0x597   : > { %v3955_v15 = vadd.f32 %v4567_v2, %v3943_v61 }
 0x59c   : > { %v3929_v35 = vpop.f32.mrf.mxu3 }
 0x59d   : > { %v3944_v27 = vmul.f32 %v4566_v55, %v3929_v35 }
 0x5a0   : > { %v3805_v25 = vpop.f32.mrf.mxu1 }
 0x5a1   : > { %v3808_v6 = vmax.f32 %v3805_v25, 0.0 }
 0x5a3   : > { %4431 = vmatmul.msk.f32.vlgmr.msra.gmra.mxu2 %vm3810_vm10, %v3808_v6 }
 0x5a4   : > { %v3931_v42 = vpop.f32.mrf.mxu3 }
 0x5a5   : > { %v3945_v33 = vmul.f32 %v4566_v55, %v3931_v42 }
 0x5a7   : > { %v3957_v5 = vadd.f32 %v4567_v2, %v3945_v33 }
 0x626   : > { %v3835_v31 = vpop.f32.mrf.mxu2 }
 0x627   : > { %v3838_v8 = vsub.f32 0.0, %v3835_v31 }
 0x629   : > { %v3839_v40 = vmul.f32 1.442695, %v3838_v8 }
 0x62b   : > { %4570 = vpow2.f32 %v3839_v40 }
 0x631   : > { %v4571_v39 = vpop.eup %4570 }
 0x632   : > { %v3841_v30 = vadd.f32 1.0, %v4571_v39 }
 0x634   : > { %4572 = vrcp.f32 %v3841_v30  ;;  %v3853_v53 = vand.u32 2147483648, %v3841_v30  ;;  %v3851_v32 = vand.u32 2147483647, %v3841_v30  ;;  %vm3847_vm11 = vweird.f32 %v3841_v30 }
 0x636   : > { %v3854_v19 = vor.u32 1.1754944e-38, %v3853_v53  ;;  %vm3852_vm13 = vcmp.eq.f32.partialorder %v3851_v32, 8.507059e+37 }
 0x63a   : > { %v4573_v24 = vpop.eup %4572 }
 0x63b   : > { %v3843_v50 = vmul.f32 %v4573_v24, %v3841_v30  ;;  %vm3848_vm2 = vweird.f32 %v4573_v24 }
 0x63c   : > { %vm3849_vm12 = vmor %vm3847_vm11, %vm3848_vm2 }
 0x63d   : > { %v3844_v45 = vsub.f32 1.0, %v3843_v50 }
 0x63f   : > { %v3845_v11 = vmul.f32 %v4573_v24, %v3844_v45 }
 0x641   : > { %v3846_v26 = vadd.f32 %v4573_v24, %v3845_v11 }
 0x643   : > { %v3850_v36 = vsel %vm3849_vm12, %v4573_v24, %v3846_v26 }
 0x644   : > { %v3855_v20 = vsel %vm3852_vm13, %v3854_v19, %v3850_v36 }
 0x645   : > { %v3857_v0 = vperm.slane %v3855_v20, 0 }
 0x647   : > { %v3858_v44 = vmul.f32 %v3857_v0, %v6309_v48  ;;  %v3859_v38 = vmul.f32 %v3857_v0, %v6306_v1  ;;  %v3860_v10 = vmul.f32 %v3857_v0, %v6314_v21  ;;  %v3861_v47 = vmul.f32 %v3857_v0, %v6326_v13 }
 0x648   : > { %v3862_v54 = vmul.f32 %v3857_v0, %v6335_v28  ;;  %v3863_v3 = vmul.f32 %v3857_v0, %v6340_v37  ;;  %v3864_v59 = vmul.f32 %v3857_v0, %v6345_v22  ;;  %v3954_v1 = vadd.f32 %v4567_v2, %v3942_v63 }
 0x649   : > { %v3958_v29 = vadd.f32 %v3950_v58, %v3858_v44  ;;  %v3959_v16 = vadd.f32 %v3951_v12, %v3859_v38  ;;  %v3960_v48 = vadd.f32 %v3952_v4, %v3860_v10  ;;  %v3865_v13 = vmul.f32 %v3857_v0, %v6352_v9 }
 0x64a   : > { %v3963_v21 = vadd.f32 %v3955_v15, %v3863_v3  ;;  %v3961_v60 = vadd.f32 %v3953_v23, %v3861_v47  ;;  %v3956_v28 = vadd.f32 %v4567_v2, %v3944_v27  ;;  %v3962_v37 = vadd.f32 %v3954_v1, %v3862_v54 }
 0x64b   : > { %3966 = vst.msk [vmem:[%s547_s16] sm:$0xff] %vm2884_vm0, %v3958_v29  ;;  %v3965_v18 = vadd.f32 %v3957_v5, %v3865_v13 }
 0x64c   : > { %3971 = vst.msk [vmem:[%s547_s16 + $0x28] sm:$0xff] %vm2884_vm0, %v3963_v21  ;;  %v3964_v22 = vadd.f32 %v3956_v28, %v3864_v59 }
 0x64d   : > { %3967 = vst.msk [vmem:[%s547_s16 + $0x8] sm:$0xff] %vm2884_vm0, %v3959_v16 }
 0x64e   : > { %3968 = vst.msk [vmem:[%s547_s16 + $0x10] sm:$0xff] %vm2884_vm0, %v3960_v48 }
 0x64f   : > { %3969 = vst.msk [vmem:[%s547_s16 + $0x18] sm:$0xff] %vm2884_vm0, %v3961_v60 }
 0x650   : > { %3970 = vst.msk [vmem:[%s547_s16 + $0x20] sm:$0xff] %vm2884_vm0, %v3962_v37 }
 0x651   : > { %3972 = vst.msk [vmem:[%s547_s16 + $0x30] sm:$0xff] %vm2884_vm0, %v3964_v22 }
 0x652   : > { %3973 = vst.msk [vmem:[%s547_s16 + $0x38] sm:$0xff] %vm2884_vm0, %v3965_v18 }
 0x653   : > { %4691 = shalt.err (!%p4688_p10)
}
 0x654   : > { %s4744_s1 = smov 128   ;;  %s4745_s22 = smov 8  }
 0x655   : > { %4494 = dma.vmem_to_hbm [thread:$0]  (%p4892_p3), %s3988_s30, 1024, %s3990_s23, %s3975_s28, %s4744_s1, %s4744_s1, %s4745_s22  }
 0x656 PF: > { %s6517_s25 = sld [smem:[#allocation14_spill]]  ;;  %p6519_p12 = scmp.ge.s32.totalorder %s4734_s21, 2 }
 0x658   : > { %p4508_p13 = pnand %p6519_p12, %p4861_p6 }
 0x65a   : > { %p4509_p0 = pneg %p4508_p13 }
 0x65c   : > { %s4004_s16 = sand.u32 1, %s6517_s25  }
 0x65d   : > { %s4005_s18 = scalar_lea.sflag [#allocation6], %s4004_s16 }
 0x65e   : > { %4717 = dma.done.wait (%p4509_p0), %s4005_s18, 1024  }
 0x65f   : > { %4719 = vsyncadd (%p4509_p0), %s4005_s18, 4294966272  ;;  %s6520_s21 = sld [smem:[#allocation17_spill]]  ;;  %s6523_s18 = smov %s4726_s19 }
 0x660   : > { %s6521_s20 = sld [smem:[#allocation15_spill]] }
 0x661   : > { %s6522_s2 = sld [smem:[#allocation18_spill]] }
 0x665   : > { %p29_p5 = scmp.ge.s32.totalorder %s6520_s21, 4  }
 0x666   : > { %s6524_s19 = smov %s6521_s20 }
 0x667   : > { %s6525_s20 = smov %s6522_s2  ;;  %31 = sbr.rel (!%p29_p5) target bundleno = 11 (0xb), region = 229 }
 0x66c   :  { %4011 = vsyncpa [#allocation5], 1 }
 0x66d   :  { %4013 = vsyncpa [#allocation5 + $0x1], 1 }
 0x66e   :  { %4014 = vsyncpa [#allocation8], 1 }
 0x66f   :  { %4015 = vsyncpa [#allocation6], 1 }
 0x670   :  { %4017 = vsyncpa [#allocation6 + $0x1], 1 }

</bundles_post_ra>
